<compile_context>
chip_gen: v7x
topology: tpu7x:2x2x1
jax: 0.10.0
libtpu: 0.0.40
codegen_flags: <defaults>
</compile_context>

<pallas_src>
import functools

import numpy as np
import jax
import jax.numpy as jnp
from jax import lax
from jax.experimental import pallas as pl
from jax.experimental.pallas import tpu as pltpu


def _bilinear_x2_matrix(size: int) -> np.ndarray:
    """(2*size, size) interpolation matrix for scale_factor=2 bilinear upsample,
    align_corners=False (the nn.Upsample default)."""
    m = np.zeros((2 * size, size), dtype=np.float32)
    for o in range(2 * size):
        src = max((o + 0.5) / 2.0 - 0.5, 0.0)
        i0 = min(int(np.floor(src)), size - 1)
        frac = src - i0
        i1 = min(i0 + 1, size - 1)
        m[o, i0] += 1.0 - frac
        m[o, i1] += frac
    return m


# ---------------------------------------------------------------------------
# Fused kernel: per-batch  upsample(x2) -> 3x3 conv -> BatchNorm(train) -> ReLU
# Single grid step; the whole batch is resident in VMEM.
# Output layout: (N, Cout, H2*W2)  (lane-dense last dim, free reshape to NCHW).
# ---------------------------------------------------------------------------
def _fused_kernel(x_ref, uw_ref, w_ref, g_ref, b_ref, o_ref,
                  *, N, Cin, Cout, H, W, eps, apply_relu):
    H2, W2 = 2 * H, 2 * W
    M = H2 * W2

    # ---- bilinear x2 upsample along W for the WHOLE batch: one MXU matmul --
    xw = jnp.dot(x_ref[...], uw_ref[...],
                 preferred_element_type=jnp.float32)        # (N*Cin*H, 2W)
    a = xw.reshape(N * Cin, H, W2)

    # ---- bilinear x2 upsample along H: closed-form 2-tap (0.25/0.75), VPU --
    a_prev = jnp.concatenate([a[:, :1, :], a[:, :-1, :]], axis=1)   # clamped
    a_next = jnp.concatenate([a[:, 1:, :], a[:, -1:, :]], axis=1)   # clamped
    even = 0.25 * a_prev + 0.75 * a                                 # rows 2k
    odd = 0.75 * a + 0.25 * a_next                                  # rows 2k+1
    up_all = jnp.concatenate([even, odd], axis=2).reshape(N, Cin, M)

    # ---- border masks, built once, no div/mod (iota per spatial axis) ------
    rr = lax.broadcasted_iota(jnp.int32, (1, H2, W2), 1).reshape(1, M)
    cc = lax.broadcasted_iota(jnp.int32, (1, H2, W2), 2).reshape(1, M)
    top, bot = rr == 0, rr == H2 - 1
    lft, rgt = cc == 0, cc == W2 - 1

    # static tap plan: (flat roll shift, combined zero-mask or None)
    tap_plan = []
    for dy in (-1, 0, 1):
        for dx in (-1, 0, 1):
            s = dy * W2 + dx
            zm = None
            if dy == 1:
                zm = bot
            elif dy == -1:
                zm = top
            if dx == 1:
                zm = rgt if zm is None else (zm | rgt)
            elif dx == -1:
                zm = lft if zm is None else (zm | lft)
            tap_plan.append((s, zm))

    # ---- per-image 3x3 conv; pre-BN activations staged in the output block -
    s1 = jnp.zeros((Cout, 1), jnp.float32)
    s2 = jnp.zeros((Cout, 1), jnp.float32)
    for n in range(N):                                   # static, fully unrolled
        up = up_all[n]                                   # (Cin, M)
        taps = []
        for s, zm in tap_plan:
            # tap[m] = up[m + s]; roll wrap-around lands only on masked borders
            t = up if s == 0 else pltpu.roll(up, shift=(-s) % M, axis=1)
            if zm is not None:
                t = jnp.where(zm, 0.0, t)
            taps.append(t)
        patches = jnp.concatenate(taps, axis=0)          # (9*Cin, M)
        # conv bias intentionally omitted: training-mode BN cancels it exactly
        y = jnp.dot(w_ref[...], patches,
                    preferred_element_type=jnp.float32)  # (Cout, M)
        o_ref[n] = y                                     # stays in VMEM
        s1 = s1 + jnp.sum(y, axis=1, keepdims=True)
        s2 = s2 + jnp.sum(y * y, axis=1, keepdims=True)

    # ---- BatchNorm (batch mean, biased variance) + optional ReLU -----------
    cnt = jnp.float32(N * M)
    mean = s1 / cnt
    var = jnp.maximum(s2 / cnt - mean * mean, 0.0)       # biased (training) var
    inv = lax.rsqrt(var + eps)
    scale = g_ref[...] * inv                             # (Cout, 1)
    shift = b_ref[...] - mean * scale                    # (Cout, 1)

    out = o_ref[...] * scale.reshape(1, Cout, 1) + shift.reshape(1, Cout, 1)
    if apply_relu:
        out = jnp.maximum(out, 0.0)
    o_ref[...] = out


def basic_upsample_forward(x_nchw, conv_w_oihw, conv_b, bn_gamma, bn_beta,
                           *, relu=True, eps=1e-5):
    """BasicUpSample forward. Inputs/outputs are NCHW (PyTorch convention)."""
    N, Cin, H, W = x_nchw.shape
    Cout = conv_w_oihw.shape[0]
    H2, W2 = 2 * H, 2 * W
    M = H2 * W2

    # conv bias is dropped: training-mode BatchNorm output is invariant to a
    # per-channel additive constant (mean absorbs it, variance unchanged).
    del conv_b

    # -------- layout glue (cheap, one-time XLA ops on tiny tensors) --------
    x2d = x_nchw.astype(jnp.float32).reshape(N * Cin * H, W)
    uw_t = jnp.asarray(_bilinear_x2_matrix(W).T)                    # (W, 2W)
    w2d = jnp.transpose(conv_w_oihw.astype(jnp.float32),
                        (0, 2, 3, 1)).reshape(Cout, 9 * Cin)        # (Cout, 9*Cin)
    g2d = bn_gamma.astype(jnp.float32).reshape(Cout, 1)
    b2d = bn_beta.astype(jnp.float32).reshape(Cout, 1)

    # -------- VMEM budget: derived from actual block / temporary sizes -----
    out_bytes = N * Cout * M * 4
    in_bytes = (x2d.size + uw_t.size + w2d.size + g2d.size + b2d.size) * 4
    tmp_bytes = (N * Cin * M            # up_all
                 + 10 * Cin * M         # taps + patches (per image)
                 + Cout * M) * 4        # y (per image)
    need = out_bytes + in_bytes + tmp_bytes
    if need > 24 * 1024 * 1024:
        # TODO(synk): tiled (H2-split, stats+recompute) path for large shapes.
        raise NotImplementedError(
            f"fused BasicUpSample kernel working set ~{need >> 20} MiB "
            "exceeds the single-pass VMEM budget")
    vmem_limit = int(min(100 * 1024 * 1024, max(4 * 1024 * 1024, 2 * need)))

    kern = functools.partial(_fused_kernel, N=N, Cin=Cin, Cout=Cout, H=H, W=W,
                             eps=eps, apply_relu=relu)
    out = pl.pallas_call(
        kern,
        out_shape=jax.ShapeDtypeStruct((N, Cout, M), jnp.float32),
        grid_spec=pltpu.PrefetchScalarGridSpec(
            num_scalar_prefetch=0,
            grid=(1,),
            in_specs=[pl.BlockSpec((N * Cin * H, W), lambda i: (0, 0)),
                      pl.BlockSpec((W, W2), lambda i: (0, 0)),
                      pl.BlockSpec((Cout, 9 * Cin), lambda i: (0, 0)),
                      pl.BlockSpec((Cout, 1), lambda i: (0, 0)),
                      pl.BlockSpec((Cout, 1), lambda i: (0, 0))],
            out_specs=pl.BlockSpec((N, Cout, M), lambda i: (0, 0, 0))),
        compiler_params=pltpu.CompilerParams(
            dimension_semantics=("arbitrary",),
            vmem_limit_bytes=vmem_limit),
    )(x2d, uw_t, w2d, g2d, b2d)

    # last-dim split is a free row-major reshape; layout is already NCHW-major
    return out.reshape(N, Cout, H2, W2)


def reference_forward(x, w, b, gamma, beta, *, relu=True, eps=1e-5):
    """Plain-JAX reference of the same forward pass (NCHW), including the bias."""
    uh = jnp.asarray(_bilinear_x2_matrix(x.shape[2]))
    uw = jnp.asarray(_bilinear_x2_matrix(x.shape[3]))
    up = jnp.einsum('ah,nchw->ncaw', uh, x)
    up = jnp.einsum('bw,ncaw->ncab', uw, up)
    y = lax.conv_general_dilated(up, w, window_strides=(1, 1),
                                 padding=((1, 1), (1, 1)),
                                 dimension_numbers=('NCHW', 'OIHW', 'NCHW'))
    y = y + b[None, :, None, None]
    mean = jnp.mean(y, axis=(0, 2, 3), keepdims=True)
    var = jnp.mean(jnp.square(y - mean), axis=(0, 2, 3), keepdims=True)
    y = gamma[None, :, None, None] * (y - mean) * lax.rsqrt(var + eps) \
        + beta[None, :, None, None]
    return jnp.maximum(y, 0.0) if relu else y


if __name__ == "__main__":
    key = jax.random.PRNGKey(0)
    kx, kw, kb, kg, kbt = jax.random.split(key, 5)

    N, Cin, Cout, H, W = 2, 4, 8, 16, 16
    x = jax.random.normal(kx, (N, Cin, H, W), jnp.float32)

    # Deterministic parameter init (shapes per Conv2d(Cin, Cout, 3) / BatchNorm2d(Cout)).
    bound = 1.0 / np.sqrt(Cin * 9)
    w = jax.random.uniform(kw, (Cout, Cin, 3, 3), jnp.float32, -bound, bound)
    b = jax.random.uniform(kb, (Cout,), jnp.float32, -bound, bound)
    gamma = 1.0 + 0.1 * jax.random.normal(kg, (Cout,), jnp.float32)
    beta = 0.1 * jax.random.normal(kbt, (Cout,), jnp.float32)

    out = jax.block_until_ready(
        basic_upsample_forward(x, w, b, gamma, beta, relu=True))
    ref = jax.block_until_ready(
        reference_forward(x, w, b, gamma, beta, relu=True))

    assert out.shape == (N, Cout, 2 * H, 2 * W), out.shape
    err = float(jnp.max(jnp.abs(out - ref)))
    if err > 2e-2:
        raise AssertionError(f"kernel / reference mismatch: max abs err = {err}")
    print("KERNEL_OK")
</pallas_src>

<mosaic_0001>
module attributes {stable_mosaic.version = 11 : i64} {
  func.func @_fused_kernel(%arg0: i32, %arg1: memref<128x16xf32, #tpu.memory_space<vmem>>, %arg2: memref<16x32xf32, #tpu.memory_space<vmem>>, %arg3: memref<8x36xf32, #tpu.memory_space<vmem>>, %arg4: memref<8x1xf32, #tpu.memory_space<vmem>>, %arg5: memref<8x1xf32, #tpu.memory_space<vmem>>, %arg6: memref<2x8x1024xf32, #tpu.memory_space<vmem>>) attributes {dimension_semantics = [#tpu.dimension_semantics<arbitrary>], iteration_bounds = array<i64: 1>, scalar_prefetch = 0 : i64, scratch_operands = 0 : i64, tpu.core_type = #tpu.core_type<tc>, window_params = [{pipeline_mode = #tpu.pipeline_mode<synchronous>, transform_indices = @transform_0, window_bounds = array<i64: 128, 16>}, {pipeline_mode = #tpu.pipeline_mode<synchronous>, transform_indices = @transform_1, window_bounds = array<i64: 16, 32>}, {pipeline_mode = #tpu.pipeline_mode<synchronous>, transform_indices = @transform_2, window_bounds = array<i64: 8, 36>}, {pipeline_mode = #tpu.pipeline_mode<synchronous>, transform_indices = @transform_3, window_bounds = array<i64: 8, 1>}, {pipeline_mode = #tpu.pipeline_mode<synchronous>, transform_indices = @transform_4, window_bounds = array<i64: 8, 1>}, {pipeline_mode = #tpu.pipeline_mode<synchronous>, transform_indices = @transform_5, window_bounds = array<i64: 2, 8, 1024>}]} {
    %c0 = arith.constant 0 : index
    %c0_0 = arith.constant 0 : index
    %0 = vector.load %arg1[%c0, %c0_0] : memref<128x16xf32, #tpu.memory_space<vmem>>, vector<128x16xf32>
    %c0_1 = arith.constant 0 : index
    %c0_2 = arith.constant 0 : index
    %1 = vector.load %arg2[%c0_1, %c0_2] : memref<16x32xf32, #tpu.memory_space<vmem>>, vector<16x32xf32>
    %cst = arith.constant dense<0.000000e+00> : vector<128x32xf32>
    %2 = tpu.matmul %0, %1, %cst {dimension_numbers = #tpu.dot_dimension_numbers<[1], [0], [0], [1], [0, 0, 1, 1], [], []>} : vector<128x16xf32>, vector<16x32xf32>, vector<128x32xf32> -> vector<128x32xf32>
    %3 = vector.shape_cast %2 : vector<128x32xf32> to vector<8x16x32xf32>
    %4 = vector.extract_strided_slice %3 {offsets = [0, 0, 0], sizes = [8, 1, 32], strides = [1, 1, 1]} : vector<8x16x32xf32> to vector<8x1x32xf32>
    %5 = vector.extract_strided_slice %3 {offsets = [0, 0, 0], sizes = [8, 15, 32], strides = [1, 1, 1]} : vector<8x16x32xf32> to vector<8x15x32xf32>
    %6 = tpu.concatenate %4, %5 in 1 : vector<8x1x32xf32>, vector<8x15x32xf32> -> vector<8x16x32xf32>
    %7 = vector.extract_strided_slice %3 {offsets = [0, 1, 0], sizes = [8, 15, 32], strides = [1, 1, 1]} : vector<8x16x32xf32> to vector<8x15x32xf32>
    %8 = vector.extract_strided_slice %3 {offsets = [0, 15, 0], sizes = [8, 1, 32], strides = [1, 1, 1]} : vector<8x16x32xf32> to vector<8x1x32xf32>
    %9 = tpu.concatenate %7, %8 in 1 : vector<8x15x32xf32>, vector<8x1x32xf32> -> vector<8x16x32xf32>
    %cst_3 = arith.constant 2.500000e-01 : f32
    %10 = vector.broadcast %cst_3 : f32 to vector<8x16x32xf32>
    %11 = arith.mulf %10, %6 : vector<8x16x32xf32>
    %cst_4 = arith.constant 7.500000e-01 : f32
    %12 = vector.broadcast %cst_4 : f32 to vector<8x16x32xf32>
    %13 = arith.mulf %12, %3 : vector<8x16x32xf32>
    %14 = arith.addf %11, %13 : vector<8x16x32xf32>
    %cst_5 = arith.constant 7.500000e-01 : f32
    %15 = vector.broadcast %cst_5 : f32 to vector<8x16x32xf32>
    %16 = arith.mulf %15, %3 : vector<8x16x32xf32>
    %cst_6 = arith.constant 2.500000e-01 : f32
    %17 = vector.broadcast %cst_6 : f32 to vector<8x16x32xf32>
    %18 = arith.mulf %17, %9 : vector<8x16x32xf32>
    %19 = arith.addf %16, %18 : vector<8x16x32xf32>
    %20 = tpu.concatenate %14, %19 in 2 : vector<8x16x32xf32>, vector<8x16x32xf32> -> vector<8x16x64xf32>
    %21 = vector.shape_cast %20 : vector<8x16x64xf32> to vector<2x4x1024xf32>
    %22 = tpu.iota {dimensions = array<i32: 1>} : vector<1x32x32xi32>
    %23 = vector.shape_cast %22 : vector<1x32x32xi32> to vector<1x1024xi32>
    %24 = tpu.iota {dimensions = array<i32: 2>} : vector<1x32x32xi32>
    %25 = vector.shape_cast %24 : vector<1x32x32xi32> to vector<1x1024xi32>
    %c0_i32 = arith.constant 0 : i32
    %26 = vector.broadcast %c0_i32 : i32 to vector<1x1024xi32>
    %27 = arith.cmpi eq, %23, %26 : vector<1x1024xi32>
    %c31_i32 = arith.constant 31 : i32
    %28 = vector.broadcast %c31_i32 : i32 to vector<1x1024xi32>
    %29 = arith.cmpi eq, %23, %28 : vector<1x1024xi32>
    %c0_i32_7 = arith.constant 0 : i32
    %30 = vector.broadcast %c0_i32_7 : i32 to vector<1x1024xi32>
    %31 = arith.cmpi eq, %25, %30 : vector<1x1024xi32>
    %c31_i32_8 = arith.constant 31 : i32
    %32 = vector.broadcast %c31_i32_8 : i32 to vector<1x1024xi32>
    %33 = arith.cmpi eq, %25, %32 : vector<1x1024xi32>
    %34 = arith.ori %27, %31 : vector<1x1024xi1>
    %35 = arith.ori %27, %33 : vector<1x1024xi1>
    %36 = arith.ori %29, %31 : vector<1x1024xi1>
    %37 = arith.ori %29, %33 : vector<1x1024xi1>
    %cst_9 = arith.constant 0.000000e+00 : f32
    %38 = vector.broadcast %cst_9 : f32 to vector<8x1xf32>
    %cst_10 = arith.constant 0.000000e+00 : f32
    %39 = vector.broadcast %cst_10 : f32 to vector<8x1xf32>
    %40 = vector.extract_strided_slice %21 {offsets = [0, 0, 0], sizes = [1, 4, 1024], strides = [1, 1, 1]} : vector<2x4x1024xf32> to vector<1x4x1024xf32>
    %41 = vector.shape_cast %40 : vector<1x4x1024xf32> to vector<4x1024xf32>
    %c33_i32 = arith.constant 33 : i32
    %42 = tpu.dynamic_rotate %41 by %c33_i32 dim 1 : vector<4x1024xf32>, i32 -> vector<4x1024xf32>
    %cst_11 = arith.constant 0.000000e+00 : f32
    %43 = vector.shape_cast %34 : vector<1x1024xi1> to vector<1x1024xi1>
    %44 = vector.broadcast %43 : vector<1x1024xi1> to vector<4x1024xi1>
    %45 = vector.broadcast %cst_11 : f32 to vector<4x1024xf32>
    %46 = arith.select %44, %45, %42 : vector<4x1024xi1>, vector<4x1024xf32>
    %c32_i32 = arith.constant 32 : i32
    %47 = tpu.dynamic_rotate %41 by %c32_i32 dim 1 : vector<4x1024xf32>, i32 -> vector<4x1024xf32>
    %cst_12 = arith.constant 0.000000e+00 : f32
    %48 = vector.shape_cast %27 : vector<1x1024xi1> to vector<1x1024xi1>
    %49 = vector.broadcast %48 : vector<1x1024xi1> to vector<4x1024xi1>
    %50 = vector.broadcast %cst_12 : f32 to vector<4x1024xf32>
    %51 = arith.select %49, %50, %47 : vector<4x1024xi1>, vector<4x1024xf32>
    %c31_i32_13 = arith.constant 31 : i32
    %52 = tpu.dynamic_rotate %41 by %c31_i32_13 dim 1 : vector<4x1024xf32>, i32 -> vector<4x1024xf32>
    %cst_14 = arith.constant 0.000000e+00 : f32
    %53 = vector.shape_cast %35 : vector<1x1024xi1> to vector<1x1024xi1>
    %54 = vector.broadcast %53 : vector<1x1024xi1> to vector<4x1024xi1>
    %55 = vector.broadcast %cst_14 : f32 to vector<4x1024xf32>
    %56 = arith.select %54, %55, %52 : vector<4x1024xi1>, vector<4x1024xf32>
    %c1_i32 = arith.constant 1 : i32
    %57 = tpu.dynamic_rotate %41 by %c1_i32 dim 1 : vector<4x1024xf32>, i32 -> vector<4x1024xf32>
    %cst_15 = arith.constant 0.000000e+00 : f32
    %58 = vector.shape_cast %31 : vector<1x1024xi1> to vector<1x1024xi1>
    %59 = vector.broadcast %58 : vector<1x1024xi1> to vector<4x1024xi1>
    %60 = vector.broadcast %cst_15 : f32 to vector<4x1024xf32>
    %61 = arith.select %59, %60, %57 : vector<4x1024xi1>, vector<4x1024xf32>
    %c1023_i32 = arith.constant 1023 : i32
    %62 = tpu.dynamic_rotate %41 by %c1023_i32 dim 1 : vector<4x1024xf32>, i32 -> vector<4x1024xf32>
    %cst_16 = arith.constant 0.000000e+00 : f32
    %63 = vector.shape_cast %33 : vector<1x1024xi1> to vector<1x1024xi1>
    %64 = vector.broadcast %63 : vector<1x1024xi1> to vector<4x1024xi1>
    %65 = vector.broadcast %cst_16 : f32 to vector<4x1024xf32>
    %66 = arith.select %64, %65, %62 : vector<4x1024xi1>, vector<4x1024xf32>
    %c993_i32 = arith.constant 993 : i32
    %67 = tpu.dynamic_rotate %41 by %c993_i32 dim 1 : vector<4x1024xf32>, i32 -> vector<4x1024xf32>
    %cst_17 = arith.constant 0.000000e+00 : f32
    %68 = vector.shape_cast %36 : vector<1x1024xi1> to vector<1x1024xi1>
    %69 = vector.broadcast %68 : vector<1x1024xi1> to vector<4x1024xi1>
    %70 = vector.broadcast %cst_17 : f32 to vector<4x1024xf32>
    %71 = arith.select %69, %70, %67 : vector<4x1024xi1>, vector<4x1024xf32>
    %c992_i32 = arith.constant 992 : i32
    %72 = tpu.dynamic_rotate %41 by %c992_i32 dim 1 : vector<4x1024xf32>, i32 -> vector<4x1024xf32>
    %cst_18 = arith.constant 0.000000e+00 : f32
    %73 = vector.shape_cast %29 : vector<1x1024xi1> to vector<1x1024xi1>
    %74 = vector.broadcast %73 : vector<1x1024xi1> to vector<4x1024xi1>
    %75 = vector.broadcast %cst_18 : f32 to vector<4x1024xf32>
    %76 = arith.select %74, %75, %72 : vector<4x1024xi1>, vector<4x1024xf32>
    %c991_i32 = arith.constant 991 : i32
    %77 = tpu.dynamic_rotate %41 by %c991_i32 dim 1 : vector<4x1024xf32>, i32 -> vector<4x1024xf32>
    %cst_19 = arith.constant 0.000000e+00 : f32
    %78 = vector.shape_cast %37 : vector<1x1024xi1> to vector<1x1024xi1>
    %79 = vector.broadcast %78 : vector<1x1024xi1> to vector<4x1024xi1>
    %80 = vector.broadcast %cst_19 : f32 to vector<4x1024xf32>
    %81 = arith.select %79, %80, %77 : vector<4x1024xi1>, vector<4x1024xf32>
    %82 = tpu.concatenate %46, %51, %56, %61, %41, %66, %71, %76, %81 in 0 : vector<4x1024xf32>, vector<4x1024xf32>, vector<4x1024xf32>, vector<4x1024xf32>, vector<4x1024xf32>, vector<4x1024xf32>, vector<4x1024xf32>, vector<4x1024xf32>, vector<4x1024xf32> -> vector<36x1024xf32>
    %c0_20 = arith.constant 0 : index
    %c0_21 = arith.constant 0 : index
    %83 = vector.load %arg3[%c0_20, %c0_21] : memref<8x36xf32, #tpu.memory_space<vmem>>, vector<8x36xf32>
    %cst_22 = arith.constant dense<0.000000e+00> : vector<8x1024xf32>
    %84 = tpu.matmul %83, %82, %cst_22 {dimension_numbers = #tpu.dot_dimension_numbers<[1], [0], [0], [1], [0, 0, 1, 1], [], []>} : vector<8x36xf32>, vector<36x1024xf32>, vector<8x1024xf32> -> vector<8x1024xf32>
    %c0_23 = arith.constant 0 : index
    %c0_24 = arith.constant 0 : index
    %c0_25 = arith.constant 0 : index
    %85 = vector.load %arg6[%c0_23, %c0_24, %c0_25] : memref<2x8x1024xf32, #tpu.memory_space<vmem>>, vector<1x8x1024xf32>
    %86 = vector.shape_cast %85 : vector<1x8x1024xf32> to vector<8x1024xf32>
    %87 = vector.shape_cast %84 : vector<8x1024xf32> to vector<1x8x1024xf32>
    tpu.vector_store %arg6[%c0_23, %c0_24, %c0_25], %87 {strides = array<i32>} : memref<2x8x1024xf32, #tpu.memory_space<vmem>>, vector<1x8x1024xf32>,
    %cst_26 = arith.constant dense<0.000000e+00> : vector<8xf32>
    %88 = vector.multi_reduction <add>, %84, %cst_26 [1] : vector<8x1024xf32> to vector<8xf32>
    %89 = vector.shape_cast %88 : vector<8xf32> to vector<8x1xf32>
    %90 = arith.addf %38, %89 : vector<8x1xf32>
    %91 = arith.mulf %84, %84 : vector<8x1024xf32>
    %cst_27 = arith.constant dense<0.000000e+00> : vector<8xf32>
    %92 = vector.multi_reduction <add>, %91, %cst_27 [1] : vector<8x1024xf32> to vector<8xf32>
    %93 = vector.shape_cast %92 : vector<8xf32> to vector<8x1xf32>
    %94 = arith.addf %39, %93 : vector<8x1xf32>
    %95 = vector.extract_strided_slice %21 {offsets = [1, 0, 0], sizes = [1, 4, 1024], strides = [1, 1, 1]} : vector<2x4x1024xf32> to vector<1x4x1024xf32>
    %96 = vector.shape_cast %95 : vector<1x4x1024xf32> to vector<4x1024xf32>
    %c33_i32_28 = arith.constant 33 : i32
    %97 = tpu.dynamic_rotate %96 by %c33_i32_28 dim 1 : vector<4x1024xf32>, i32 -> vector<4x1024xf32>
    %cst_29 = arith.constant 0.000000e+00 : f32
    %98 = vector.shape_cast %34 : vector<1x1024xi1> to vector<1x1024xi1>
    %99 = vector.broadcast %98 : vector<1x1024xi1> to vector<4x1024xi1>
    %100 = vector.broadcast %cst_29 : f32 to vector<4x1024xf32>
    %101 = arith.select %99, %100, %97 : vector<4x1024xi1>, vector<4x1024xf32>
    %c32_i32_30 = arith.constant 32 : i32
    %102 = tpu.dynamic_rotate %96 by %c32_i32_30 dim 1 : vector<4x1024xf32>, i32 -> vector<4x1024xf32>
    %cst_31 = arith.constant 0.000000e+00 : f32
    %103 = vector.shape_cast %27 : vector<1x1024xi1> to vector<1x1024xi1>
    %104 = vector.broadcast %103 : vector<1x1024xi1> to vector<4x1024xi1>
    %105 = vector.broadcast %cst_31 : f32 to vector<4x1024xf32>
    %106 = arith.select %104, %105, %102 : vector<4x1024xi1>, vector<4x1024xf32>
    %c31_i32_32 = arith.constant 31 : i32
    %107 = tpu.dynamic_rotate %96 by %c31_i32_32 dim 1 : vector<4x1024xf32>, i32 -> vector<4x1024xf32>
    %cst_33 = arith.constant 0.000000e+00 : f32
    %108 = vector.shape_cast %35 : vector<1x1024xi1> to vector<1x1024xi1>
    %109 = vector.broadcast %108 : vector<1x1024xi1> to vector<4x1024xi1>
    %110 = vector.broadcast %cst_33 : f32 to vector<4x1024xf32>
    %111 = arith.select %109, %110, %107 : vector<4x1024xi1>, vector<4x1024xf32>
    %c1_i32_34 = arith.constant 1 : i32
    %112 = tpu.dynamic_rotate %96 by %c1_i32_34 dim 1 : vector<4x1024xf32>, i32 -> vector<4x1024xf32>
    %cst_35 = arith.constant 0.000000e+00 : f32
    %113 = vector.shape_cast %31 : vector<1x1024xi1> to vector<1x1024xi1>
    %114 = vector.broadcast %113 : vector<1x1024xi1> to vector<4x1024xi1>
    %115 = vector.broadcast %cst_35 : f32 to vector<4x1024xf32>
    %116 = arith.select %114, %115, %112 : vector<4x1024xi1>, vector<4x1024xf32>
    %c1023_i32_36 = arith.constant 1023 : i32
    %117 = tpu.dynamic_rotate %96 by %c1023_i32_36 dim 1 : vector<4x1024xf32>, i32 -> vector<4x1024xf32>
    %cst_37 = arith.constant 0.000000e+00 : f32
    %118 = vector.shape_cast %33 : vector<1x1024xi1> to vector<1x1024xi1>
    %119 = vector.broadcast %118 : vector<1x1024xi1> to vector<4x1024xi1>
    %120 = vector.broadcast %cst_37 : f32 to vector<4x1024xf32>
    %121 = arith.select %119, %120, %117 : vector<4x1024xi1>, vector<4x1024xf32>
    %c993_i32_38 = arith.constant 993 : i32
    %122 = tpu.dynamic_rotate %96 by %c993_i32_38 dim 1 : vector<4x1024xf32>, i32 -> vector<4x1024xf32>
    %cst_39 = arith.constant 0.000000e+00 : f32
    %123 = vector.shape_cast %36 : vector<1x1024xi1> to vector<1x1024xi1>
    %124 = vector.broadcast %123 : vector<1x1024xi1> to vector<4x1024xi1>
    %125 = vector.broadcast %cst_39 : f32 to vector<4x1024xf32>
    %126 = arith.select %124, %125, %122 : vector<4x1024xi1>, vector<4x1024xf32>
    %c992_i32_40 = arith.constant 992 : i32
    %127 = tpu.dynamic_rotate %96 by %c992_i32_40 dim 1 : vector<4x1024xf32>, i32 -> vector<4x1024xf32>
    %cst_41 = arith.constant 0.000000e+00 : f32
    %128 = vector.shape_cast %29 : vector<1x1024xi1> to vector<1x1024xi1>
    %129 = vector.broadcast %128 : vector<1x1024xi1> to vector<4x1024xi1>
    %130 = vector.broadcast %cst_41 : f32 to vector<4x1024xf32>
    %131 = arith.select %129, %130, %127 : vector<4x1024xi1>, vector<4x1024xf32>
    %c991_i32_42 = arith.constant 991 : i32
    %132 = tpu.dynamic_rotate %96 by %c991_i32_42 dim 1 : vector<4x1024xf32>, i32 -> vector<4x1024xf32>
    %cst_43 = arith.constant 0.000000e+00 : f32
    %133 = vector.shape_cast %37 : vector<1x1024xi1> to vector<1x1024xi1>
    %134 = vector.broadcast %133 : vector<1x1024xi1> to vector<4x1024xi1>
    %135 = vector.broadcast %cst_43 : f32 to vector<4x1024xf32>
    %136 = arith.select %134, %135, %132 : vector<4x1024xi1>, vector<4x1024xf32>
    %137 = tpu.concatenate %101, %106, %111, %116, %96, %121, %126, %131, %136 in 0 : vector<4x1024xf32>, vector<4x1024xf32>, vector<4x1024xf32>, vector<4x1024xf32>, vector<4x1024xf32>, vector<4x1024xf32>, vector<4x1024xf32>, vector<4x1024xf32>, vector<4x1024xf32> -> vector<36x1024xf32>
    %c0_44 = arith.constant 0 : index
    %c0_45 = arith.constant 0 : index
    %138 = vector.load %arg3[%c0_44, %c0_45] : memref<8x36xf32, #tpu.memory_space<vmem>>, vector<8x36xf32>
    %cst_46 = arith.constant dense<0.000000e+00> : vector<8x1024xf32>
    %139 = tpu.matmul %138, %137, %cst_46 {dimension_numbers = #tpu.dot_dimension_numbers<[1], [0], [0], [1], [0, 0, 1, 1], [], []>} : vector<8x36xf32>, vector<36x1024xf32>, vector<8x1024xf32> -> vector<8x1024xf32>
    %c1 = arith.constant 1 : index
    %c0_47 = arith.constant 0 : index
    %c0_48 = arith.constant 0 : index
    %140 = vector.load %arg6[%c1, %c0_47, %c0_48] : memref<2x8x1024xf32, #tpu.memory_space<vmem>>, vector<1x8x1024xf32>
    %141 = vector.shape_cast %140 : vector<1x8x1024xf32> to vector<8x1024xf32>
    %142 = vector.shape_cast %139 : vector<8x1024xf32> to vector<1x8x1024xf32>
    tpu.vector_store %arg6[%c1, %c0_47, %c0_48], %142 {strides = array<i32>} : memref<2x8x1024xf32, #tpu.memory_space<vmem>>, vector<1x8x1024xf32>,
    %cst_49 = arith.constant dense<0.000000e+00> : vector<8xf32>
    %143 = vector.multi_reduction <add>, %139, %cst_49 [1] : vector<8x1024xf32> to vector<8xf32>
    %144 = vector.shape_cast %143 : vector<8xf32> to vector<8x1xf32>
    %145 = arith.addf %90, %144 : vector<8x1xf32>
    %146 = arith.mulf %139, %139 : vector<8x1024xf32>
    %cst_50 = arith.constant dense<0.000000e+00> : vector<8xf32>
    %147 = vector.multi_reduction <add>, %146, %cst_50 [1] : vector<8x1024xf32> to vector<8xf32>
    %148 = vector.shape_cast %147 : vector<8xf32> to vector<8x1xf32>
    %149 = arith.addf %94, %148 : vector<8x1xf32>
    %cst_51 = arith.constant 2.048000e+03 : f32
    %150 = vector.broadcast %cst_51 : f32 to vector<8x1xf32>
    %151 = arith.divf %145, %150 : vector<8x1xf32>
    %cst_52 = arith.constant 2.048000e+03 : f32
    %152 = vector.broadcast %cst_52 : f32 to vector<8x1xf32>
    %153 = arith.divf %149, %152 : vector<8x1xf32>
    %154 = arith.mulf %151, %151 : vector<8x1xf32>
    %155 = arith.subf %153, %154 : vector<8x1xf32>
    %cst_53 = arith.constant 0.000000e+00 : f32
    %156 = vector.broadcast %cst_53 : f32 to vector<8x1xf32>
    %157 = arith.maximumf %155, %156 : vector<8x1xf32>
    %cst_54 = arith.constant 9.99999974E-6 : f32
    %158 = vector.broadcast %cst_54 : f32 to vector<8x1xf32>
    %159 = arith.addf %157, %158 : vector<8x1xf32>
    %160 = math.rsqrt %159 : vector<8x1xf32>
    %c0_55 = arith.constant 0 : index
    %c0_56 = arith.constant 0 : index
    %161 = vector.load %arg4[%c0_55, %c0_56] : memref<8x1xf32, #tpu.memory_space<vmem>>, vector<8x1xf32>
    %162 = arith.mulf %161, %160 : vector<8x1xf32>
    %c0_57 = arith.constant 0 : index
    %c0_58 = arith.constant 0 : index
    %163 = vector.load %arg5[%c0_57, %c0_58] : memref<8x1xf32, #tpu.memory_space<vmem>>, vector<8x1xf32>
    %164 = arith.mulf %151, %162 : vector<8x1xf32>
    %165 = arith.subf %163, %164 : vector<8x1xf32>
    %c0_59 = arith.constant 0 : index
    %c0_60 = arith.constant 0 : index
    %c0_61 = arith.constant 0 : index
    %166 = vector.load %arg6[%c0_59, %c0_60, %c0_61] : memref<2x8x1024xf32, #tpu.memory_space<vmem>>, vector<2x8x1024xf32>
    %167 = vector.shape_cast %162 : vector<8x1xf32> to vector<1x8x1xf32>
    %168 = vector.broadcast %167 : vector<1x8x1xf32> to vector<2x8x1024xf32>
    %169 = arith.mulf %166, %168 : vector<2x8x1024xf32>
    %170 = vector.shape_cast %165 : vector<8x1xf32> to vector<1x8x1xf32>
    %171 = vector.broadcast %170 : vector<1x8x1xf32> to vector<2x8x1024xf32>
    %172 = arith.addf %169, %171 : vector<2x8x1024xf32>
    %cst_62 = arith.constant 0.000000e+00 : f32
    %173 = vector.broadcast %cst_62 : f32 to vector<2x8x1024xf32>
    %174 = arith.maximumf %172, %173 : vector<2x8x1024xf32>
    %c0_63 = arith.constant 0 : index
    %c0_64 = arith.constant 0 : index
    %c0_65 = arith.constant 0 : index
    %175 = vector.load %arg6[%c0_63, %c0_64, %c0_65] : memref<2x8x1024xf32, #tpu.memory_space<vmem>>, vector<2x8x1024xf32>
    tpu.vector_store %arg6[%c0_63, %c0_64, %c0_65], %174 {strides = array<i32>} : memref<2x8x1024xf32, #tpu.memory_space<vmem>>, vector<2x8x1024xf32>,
    return
  }
  func.func @transform_0(%arg0: i32) -> (i32, i32) {
    %c0_i32 = arith.constant 0 : i32
    %c0_i32_0 = arith.constant 0 : i32
    %c0_i32_1 = arith.constant 0 : i32
    return %c0_i32, %c0_i32_0 : i32, i32
  }
  func.func @transform_1(%arg0: i32) -> (i32, i32) {
    %c0_i32 = arith.constant 0 : i32
    %c0_i32_0 = arith.constant 0 : i32
    %c0_i32_1 = arith.constant 0 : i32
    return %c0_i32, %c0_i32_0 : i32, i32
  }
  func.func @transform_2(%arg0: i32) -> (i32, i32) {
    %c0_i32 = arith.constant 0 : i32
    %c0_i32_0 = arith.constant 0 : i32
    %c0_i32_1 = arith.constant 0 : i32
    return %c0_i32, %c0_i32_0 : i32, i32
  }
  func.func @transform_3(%arg0: i32) -> (i32, i32) {
    %c0_i32 = arith.constant 0 : i32
    %c0_i32_0 = arith.constant 0 : i32
    %c0_i32_1 = arith.constant 0 : i32
    return %c0_i32, %c0_i32_0 : i32, i32
  }
  func.func @transform_4(%arg0: i32) -> (i32, i32) {
    %c0_i32 = arith.constant 0 : i32
    %c0_i32_0 = arith.constant 0 : i32
    %c0_i32_1 = arith.constant 0 : i32
    return %c0_i32, %c0_i32_0 : i32, i32
  }
  func.func @transform_5(%arg0: i32) -> (i32, i32, i32) {
    %c0_i32 = arith.constant 0 : i32
    %c0_i32_0 = arith.constant 0 : i32
    %c0_i32_1 = arith.constant 0 : i32
    %c0_i32_2 = arith.constant 0 : i32
    return %c0_i32, %c0_i32_0, %c0_i32_1 : i32, i32, i32
  }
}

</mosaic_0001>

<bundles_post_ra>
// kernel: tpu_custom_call.1
= control target key start
LH: loop header
LB: loop body
LE: loop exit
PB: predicated region body
PF: predicated region fallthrough
CT: control target
= control target key end

     0   :  { %vm39_vm0 = vcmask 130048   ;;  %v513_v3 = vlaneseq  ;;  %v6808_v5 = vmov 0   ;;  %v3630_v6 = vmov 1983009808   ;;  %s6802_s0 = inlined_call_operand.vmem [shape: f32[128,16], index: 0, kind: input, shape index: {}]   ;;  %s6803_s1 = inlined_call_operand.vmem [shape: f32[16,32], index: 1, kind: input, shape index: {}]   ;;  %s6804_s2 = inlined_call_operand.vmem [shape: f32[8,36], index: 2, kind: input, shape index: {}]   ;;  %s6805_s3 = inlined_call_operand.vmem [shape: f32[8,1], index: 3, kind: input, shape index: {}]   ;;  %s6806_s4 = inlined_call_operand.vmem [shape: f32[8,1], index: 4, kind: input, shape index: {}]   ;;  %s6807_s5 = inlined_call_operand.hbm [shape: f32[2,8,1024], index: 5, kind: output, shape index: {}]  }
   0x1   :  { %v37_v0 = vld [vmem:[%s6803_s1] sm:$0xff]  ;;  %v38_v1 = vld [vmem:[%s6803_s1 + $0x8] sm:$0xff]  ;;  %3601 = vset.pattern.permute.xlu1 %v6808_v5  ;;  %v511_v7 = vunpack.c.l.s4 %v3630_v6  ;;  %3602 = vset.pattern.permute.xlu0 %v6808_v5  ;;  %v3631_v9 = vmov 1934713408   ;;  %v23_v15 = vld [vmem:[%s6802_s0 + $0x10] sm:$0xff] }
   0x2   :  { %v21_v2 = vld [vmem:[%s6802_s0] sm:$0xff]  ;;  %v3248_v4 = vpack.c.bf16 %v38_v1, %v37_v0  ;;  %v3685_v8 = vshrl.u32 %v513_v3, 7  ;;  %v543_v10 = vunpack.c.l.s4 %v3631_v9  ;;  %v3688_v11 = vand.u32 127, %v513_v3  ;;  %v22_v12 = vld [vmem:[%s6802_s0 + $0x8] sm:$0xff] }
   0x3   :  { %3224 = vmatprep.mubr.msk.f32.mxu0 %vm39_vm0, %v21_v2  ;;  %v512_v13 = vunpack.c.0.s8 %v511_v7 }
   0x4   :  { %3249 = vmatprep.subr.bf16.mxu0 %v3248_v4  ;;  %7000 = vst [vmem:[#allocation5_spill] sm:$0xff] %v3688_v11  ;;  %v866_v14 = vcombine.high %v3685_v8, %v6808_v5  ;;  %v544_v16 = vunpack.c.0.s8 %v543_v10  ;;  %v1137_v17 = vcombine.high %v3688_v11, %v6808_v5 }
   0x5   :  { %3251 = vmatpush3.bf16.msra.mxu0 %v3248_v4  ;;  %v3701_v18 = vsub.s32 %v512_v13, %v3685_v8 }
   0x6   :  { %10 = vsyncpa [#allocation3], 0  ;;  %v3705_v19 = vsub.s32 %v544_v16, %v3685_v8  ;;  %v24_v20 = vld [vmem:[%s6802_s0 + $0x18] sm:$0xff]  ;;  %v25_v24 = vld [vmem:[%s6802_s0 + $0x20] sm:$0xff]  ;;  %s3632_s10 = smov 32   ;;  %v863_v40 = vadd.s32 8, %v3685_v8 }
   0x7   :  { %v880_v21 = vrot.slane %v866_v14, %v3701_v18  ;;  %v1151_v22 = vrot.slane %v1137_v17, %v3701_v18  ;;  %v873_v23 = vrot.slane %v3685_v8, %v3701_v18  ;;  %v1144_v25 = vrot.slane %v3688_v11, %v3701_v18  ;;  %v26_v30 = vld [vmem:[%s6802_s0 + $0x28] sm:$0xff]  ;;  %v27_v33 = vld [vmem:[%s6802_s0 + $0x30] sm:$0xff]  ;;  %v28_v38 = vld [vmem:[%s6802_s0 + $0x38] sm:$0xff]  ;;  %s3633_s15 = smov 64   ;;  %s3634_s1 = smov 96  }
   0x8   :  { %3225 = vmatmul.mubr.msk.f32.vlgmr.msra.gmra.mrb[0].mxu0 %vm39_vm0, %v22_v12  ;;  %v29_v39 = vld [vmem:[%s6802_s0 + $0x40] sm:$0xff]  ;;  %v30_v44 = vld [vmem:[%s6802_s0 + $0x48] sm:$0xff]  ;;  %v31_v45 = vld [vmem:[%s6802_s0 + $0x50] sm:$0xff]  ;;  %v915_v46 = vcombine.high %v863_v40, %v6808_v5  ;;  %v922_v55 = vrot.slane %v863_v40, %v3701_v18  ;;  %v864_v59 = vadd.s32 16, %v3685_v8  ;;  %v865_v16 = vadd.s32 24, %v3685_v8  ;;  %s3637_s30 = smov 97  }
   0x9   :  { %3227 = vmatprep.mubr.msk.f32.mxu0 %vm39_vm0, %v23_v15  ;;  %v3721_v26 = vrot.slane %v880_v21, %v3705_v19  ;;  %v3724_v27 = vrot.slane %v1151_v22, %v3705_v19  ;;  %v3727_v28 = vrot.slane %v873_v23, %v3705_v19  ;;  %v896_v29 = vcombine.high %v880_v21, %v6808_v5  ;;  %v32_v50 = vld [vmem:[%s6802_s0 + $0x58] sm:$0xff]  ;;  %v33_v51 = vld [vmem:[%s6802_s0 + $0x60] sm:$0xff]  ;;  %v34_v56 = vld [vmem:[%s6802_s0 + $0x68] sm:$0xff]  ;;  %s3638_s6 = smov 33   ;;  %s3639_s7 = smov 1  }
   0xa   :  { %v3743_v34 = vrot.slane %v1144_v25, %v3705_v19  ;;  %v1167_v37 = vcombine.high %v1151_v22, %v6808_v5  ;;  %v881_v43 = vcombine.high %v873_v23, %v6808_v5  ;;  %v1152_v49 = vcombine.high %v1144_v25, %v6808_v5  ;;  %v35_v57 = vld [vmem:[%s6802_s0 + $0x70] sm:$0xff]  ;;  %v36_v63 = vld [vmem:[%s6802_s0 + $0x78] sm:$0xff]  ;;  %s3636_s0 = smov 127   ;;  %s3640_s8 = smov 31  }
   0xb   :  { %v913_v31 = vcombine.high %v3721_v26, %v6808_v5  ;;  %v1184_v32 = vcombine.high %v3724_v27, %v6808_v5  ;;  %v911_v35 = vcombine.high %v3727_v28, %v6808_v5  ;;  %v910_v36 = vrot.slane %v896_v29, %v3705_v19  ;;  %s3641_s9 = smov 95  }
   0xc   :  { %3228 = vmatmul.mubr.msk.f32.gmra.mrb[2].mxu0 %vm39_vm0, %v24_v20  ;;  %v1182_v41 = vcombine.high %v3743_v34, %v6808_v5  ;;  %v1181_v42 = vrot.slane %v1167_v37, %v3705_v19  ;;  %v895_v47 = vrot.slane %v881_v43, %v3705_v19  ;;  %v929_v52 = vrot.slane %v915_v46, %v3701_v18 }
   0xd   :  { %3230 = vmatprep.mubr.msk.f32.mxu0 %vm39_vm0, %v25_v24  ;;  %1068 = vrot.lane.b32.xlu0 %v913_v31, %s3632_s10  ;;  %v914_v48 = vcombine.high %v910_v36, %v6808_v5  ;;  %v1166_v53 = vrot.slane %v1152_v49, %v3705_v19  ;;  %v3811_v62 = vrot.slane %v922_v55, %v3705_v19  ;;  %vm298_vm1 = vcmask 1046528  }
   0xe   :  { %1192 = vrot.lane.b32.xlu1 %v1184_v32, %s3632_s10  ;;  %v1185_v54 = vcombine.high %v1181_v42, %v6808_v5  ;;  %v3803_v58 = vrot.slane %v929_v52, %v3705_v19  ;;  %v912_v60 = vcombine.high %v895_v47, %v6808_v5  ;;  %v945_v0 = vcombine.high %v929_v52, %v6808_v5 }
   0xf   :  { %v1183_v61 = vcombine.high %v1166_v53, %v6808_v5  ;;  %v964_v1 = vcombine.high %v864_v59, %v6808_v5  ;;  %v960_v3 = vcombine.high %v3811_v62, %v6808_v5  ;;  %v930_v4 = vcombine.high %v922_v55, %v6808_v5 }
  0x10   :  { %3231 = vmatmul.mubr.msk.f32.gmra.mrb[4].mxu0 %vm39_vm0, %v26_v30  ;;  %v962_v2 = vcombine.high %v3803_v58, %v6808_v5  ;;  %v959_v7 = vrot.slane %v945_v0, %v3705_v19  ;;  %v971_v10 = vrot.slane %v864_v59, %v3701_v18  ;;  %v1020_v22 = vrot.slane %v865_v16, %v3701_v18 }
  0x11   :  { %3233 = vmatprep.mubr.msk.f32.mxu0 %vm39_vm0, %v27_v33  ;;  %1062 = vrot.lane.b32.xlu0 %v911_v35, %s3632_s10  ;;  %v978_v6 = vrot.slane %v964_v1, %v3701_v18  ;;  %v944_v9 = vrot.slane %v930_v4, %v3705_v19  ;;  %v1013_v30 = vcombine.high %v865_v16, %v6808_v5  ;;  %vm249_vm2 = vcmask 1040384  }
  0x12   :  { %1070 = vrot.lane.b32.xlu1 %v910_v36, %s3633_s15  ;;  %v963_v13 = vcombine.high %v959_v7, %v6808_v5  ;;  %v3842_v15 = vrot.slane %v971_v10, %v3705_v19  ;;  %v979_v24 = vcombine.high %v971_v10, %v6808_v5  ;;  %v3859_v29 = vrot.slane %v1020_v22, %v3705_v19 }
  0x13   :  { %v3835_v12 = vrot.slane %v978_v6, %v3705_v19  ;;  %v961_v14 = vcombine.high %v944_v9, %v6808_v5  ;;  %v994_v17 = vcombine.high %v978_v6, %v6808_v5  ;;  %v1028_v33 = vcombine.high %v1020_v22, %v6808_v5 }
  0x14   :  { %3234 = vmatmul.mubr.msk.f32.gmra.mrb[6].mxu0 %vm39_vm0, %v28_v38  ;;  %7001 = vst [vmem:[#allocation6_spill] sm:$0xff] %v3842_v15  ;;  %v1009_v21 = vcombine.high %v3842_v15, %v6808_v5  ;;  %7002 = vst [vmem:[#allocation7_spill] sm:$0xff] %v3859_v29  ;;  %v993_v31 = vrot.slane %v979_v24, %v3705_v19  ;;  %v1058_v32 = vcombine.high %v3859_v29, %v6808_v5  ;;  %vm491_vm3 = vcmask 261120  }
  0x15   :  { %3236 = vmatprep.mubr.msk.f32.mxu0 %vm39_vm0, %v29_v39  ;;  %1186 = vrot.lane.b32.xlu0 %v1182_v41, %s3632_s10  ;;  %v1011_v20 = vcombine.high %v3835_v12, %v6808_v5  ;;  %v1008_v23 = vrot.slane %v994_v17, %v3705_v19  ;;  %v1027_v35 = vrot.slane %v1013_v30, %v3701_v18  ;;  %vm844_vm4 = vcmask 523264  }
  0x16   :  { %1194 = vrot.lane.b32.xlu1 %v1181_v42, %s3633_s15  ;;  %v1010_v36 = vcombine.high %v993_v31, %v6808_v5  ;;  %v1042_v37 = vrot.slane %v1028_v33, %v3705_v19  ;;  %vm1112_vm5 = vcmask 785408  }
  0x17   :  { %v1012_v25 = vcombine.high %v1008_v23, %v6808_v5  ;;  %v3874_v38 = vrot.slane %v1027_v35, %v3705_v19  ;;  %v1043_v41 = vcombine.high %v1027_v35, %v6808_v5 }
  0x18   :  { %3237 = vmatmul.mubr.msk.f32.gmra.mrb[8].mxu0 %vm39_vm0, %v30_v44  ;;  %v1059_v40 = vcombine.high %v1042_v37, %v6808_v5 }
  0x19   :  { %3239 = vmatprep.mubr.msk.f32.mxu0 %vm39_vm0, %v31_v45  ;;  %1064 = vrot.lane.b32.xlu0 %v895_v47, %s3633_s15  ;;  %7003 = vst [vmem:[#allocation8_spill] sm:$0xff] %v3874_v38  ;;  %v1060_v39 = vcombine.high %v3874_v38, %v6808_v5  ;;  %v1057_v42 = vrot.slane %v1043_v41, %v3705_v19 }
  0x1a   :  { %1072 = vrot.lane.b32.xlu1 %v914_v48, %s3634_s1 }
  0x1b   :  { %v1061_v43 = vcombine.high %v1057_v42, %v6808_v5 }
  0x1c   :  { %3240 = vmatmul.mubr.msk.f32.gmra.mrb[10].mxu0 %vm39_vm0, %v32_v50 }
  0x1d   :  { %3242 = vmatprep.mubr.msk.f32.mxu0 %vm39_vm0, %v33_v51  ;;  %1188 = vrot.lane.b32.xlu0 %v1166_v53, %s3633_s15 }
  0x1e   :  { %1196 = vrot.lane.b32.xlu1 %v1185_v54, %s3634_s1 }
  0x20   :  { %3243 = vmatmul.mubr.msk.f32.gmra.mrb[12].mxu0 %vm39_vm0, %v34_v56 }
  0x21   :  { %3245 = vmatprep.mubr.msk.f32.mxu0 %vm39_vm0, %v35_v57  ;;  %1066 = vrot.lane.b32.xlu0 %v912_v60, %s3634_s1 }
  0x22   :  { %1190 = vrot.lane.b32.xlu1 %v1183_v61, %s3634_s1 }
  0x24   :  { %3246 = vmatmul.mubr.msk.f32.gmra.mrb[14].mxu0 %vm39_vm0, %v36_v63 }
  0x25   :  { %1080 = vrot.lane.b32.xlu0 %v962_v2, %s3632_s10 }
  0x26   :  { %1074 = vrot.lane.b32.xlu1 %v960_v3, %s3632_s10 }
  0x29   :  { %1082 = vrot.lane.b32.xlu0 %v959_v7, %s3633_s15 }
  0x2a   :  { %1076 = vrot.lane.b32.xlu1 %v944_v9, %s3633_s15 }
  0x2d   :  { %1084 = vrot.lane.b32.xlu0 %v963_v13, %s3634_s1 }
  0x2e   :  { %1078 = vrot.lane.b32.xlu1 %v961_v14, %s3634_s1 }
  0x31   :  { %1092 = vrot.lane.b32.xlu0 %v1011_v20, %s3632_s10 }
  0x32   :  { %1086 = vrot.lane.b32.xlu1 %v1009_v21, %s3632_s10 }
  0x35   :  { %1094 = vrot.lane.b32.xlu0 %v1008_v23, %s3633_s15 }
  0x36   :  { %1096 = vrot.lane.b32.xlu1 %v1012_v25, %s3634_s1 }
  0x39   :  { %1088 = vrot.lane.b32.xlu0 %v993_v31, %s3633_s15 }
  0x3a   :  { %1098 = vrot.lane.b32.xlu1 %v1058_v32, %s3632_s10 }
  0x3d   :  { %1090 = vrot.lane.b32.xlu0 %v1010_v36, %s3634_s1 }
  0x3e   :  { %1100 = vrot.lane.b32.xlu1 %v1042_v37, %s3633_s15 }
  0x41   :  { %1104 = vrot.lane.b32.xlu0 %v1060_v39, %s3632_s10 }
  0x42   :  { %1102 = vrot.lane.b32.xlu1 %v1059_v40, %s3634_s1 }
  0x45   :  { %1106 = vrot.lane.b32.xlu0 %v1057_v42, %s3633_s15 }
  0x49   :  { %1108 = vrot.lane.b32.xlu0 %v1061_v43, %s3634_s1 }
  0xdb   :  { %v3226_v44 = vpop.f32.mrb[0].mxu0 }
  0xdc   :  { %v251_v45 = vrot.slane %v3226_v44, 7  ;;  %v300_v46 = vrot.slane %v3226_v44, 1  ;;  %v154_v47 = vpop.f32.mrb[1].mxu0  ;;  %v364_v51 = vmul.f32 0.75, %v3226_v44 }
  0xdd   :  { %v250_v48 = vrot.slane %v154_v47, 7  ;;  %v299_v49 = vrot.slane %v154_v47, 1  ;;  %v363_v52 = vmul.f32 0.75, %v154_v47 }
  0xde   :  { %v339_v50 = vsel %vm298_vm1, %v300_v46, %v3226_v44 }
  0xdf   :  { %v290_v53 = vsel %vm249_vm2, %v154_v47, %v250_v48  ;;  %v3229_v54 = vpop.f32.mrb[2].mxu0  ;;  %v396_v55 = vmul.f32 0.25, %v339_v50  ;;  %v301_v56 = vsel %vm298_vm1, %v299_v49, %v300_v46  ;;  %v252_v57 = vsel %vm249_vm2, %v250_v48, %v251_v45 }
  0xe0   :  { %v347_v59 = vmul.f32 0.25, %v290_v53  ;;  %v254_v60 = vrot.slane %v3229_v54, 7  ;;  %v303_v61 = vrot.slane %v3229_v54, 1  ;;  %v366_v63 = vmul.f32 0.75, %v3229_v54  ;;  %v164_v0 = vpop.f32.mrb[3].mxu0 }
  0xe1   :  { %v253_v1 = vrot.slane %v164_v0, 7  ;;  %v302_v2 = vrot.slane %v164_v0, 1  ;;  %v365_v3 = vmul.f32 0.75, %v164_v0  ;;  %v412_v4 = vadd.f32 %v396_v55, %v364_v51 }
  0xe2   :  { %v340_v6 = vsel %vm298_vm1, %v303_v61, %v3229_v54  ;;  %v395_v7 = vmul.f32 0.25, %v301_v56  ;;  %v348_v9 = vmul.f32 0.25, %v252_v57  ;;  %v3893_v10 = vadd.f32 %v363_v52, %v347_v59 }
  0xe3   :  { %v291_v13 = vsel %vm249_vm2, %v164_v0, %v253_v1  ;;  %445 = vrot.lane.b32.xlu0 %v412_v4, %s3632_s10  ;;  %v3897_v14 = vpop.f32.mrb[4].mxu0  ;;  %v398_v16 = vmul.f32 0.25, %v340_v6  ;;  %v304_v17 = vsel %vm298_vm1, %v302_v2, %v303_v61  ;;  %v255_v20 = vsel %vm249_vm2, %v253_v1, %v254_v60 }
  0xe4   :  { %v349_v21 = vmul.f32 0.25, %v291_v13  ;;  %v257_v22 = vrot.slane %v3897_v14, 7  ;;  %v306_v23 = vrot.slane %v3897_v14, 1  ;;  %v3904_v24 = vmul.f32 0.75, %v3897_v14  ;;  %v174_v25 = vpop.f32.mrb[5].mxu0 }
  0xe5   :  { %v256_v30 = vrot.slane %v174_v25, 7  ;;  %v305_v31 = vrot.slane %v174_v25, 1  ;;  %v367_v32 = vmul.f32 0.75, %v174_v25  ;;  %v411_v33 = vadd.f32 %v395_v7, %v363_v52 }
  0xe6   :  { %v341_v35 = vsel %vm298_vm1, %v306_v23, %v3897_v14  ;;  %v414_v36 = vadd.f32 %v398_v16, %v366_v63  ;;  %v397_v37 = vmul.f32 0.25, %v304_v17  ;;  %v3908_v39 = vadd.f32 %v364_v51, %v348_v9 }
  0xe7   :  { %v292_v40 = vsel %vm249_vm2, %v174_v25, %v256_v30  ;;  %443 = vrot.lane.b32.xlu0 %v411_v33, %s3632_s10  ;;  %v3912_v41 = vpop.f32.mrb[6].mxu0  ;;  %v307_v42 = vsel %vm298_vm1, %v305_v31, %v306_v23  ;;  %v400_v43 = vmul.f32 0.25, %v341_v35  ;;  %v350_v44 = vmul.f32 0.25, %v255_v20 }
  0xe8   :  { %v351_v45 = vmul.f32 0.25, %v292_v40  ;;  %449 = vrot.lane.b32.xlu1 %v414_v36, %s3632_s10  ;;  %v260_v46 = vrot.slane %v3912_v41, 7  ;;  %v309_v47 = vrot.slane %v3912_v41, 1  ;;  %v3919_v48 = vmul.f32 0.75, %v3912_v41  ;;  %v184_v49 = vpop.f32.mrb[7].mxu0 }
  0xe9   :  { %v259_v50 = vrot.slane %v184_v49, 7  ;;  %v308_v51 = vrot.slane %v184_v49, 1  ;;  %v3921_v52 = vmul.f32 0.75, %v184_v49  ;;  %v413_v53 = vadd.f32 %v397_v37, %v365_v3 }
  0xea   :  { %v342_v54 = vsel %vm298_vm1, %v309_v47, %v3912_v41  ;;  %v399_v55 = vmul.f32 0.25, %v307_v42  ;;  %v416_v56 = vadd.f32 %v400_v43, %v3904_v24  ;;  %v3926_v57 = vadd.f32 %v366_v63, %v350_v44 }
  0xeb   :  { %v293_v59 = vsel %vm249_vm2, %v184_v49, %v259_v50  ;;  %447 = vrot.lane.b32.xlu0 %v413_v53, %s3632_s10  ;;  %v3930_v60 = vpop.f32.mrb[8].mxu0  ;;  %v402_v61 = vmul.f32 0.25, %v342_v54  ;;  %v310_v0 = vsel %vm298_vm1, %v308_v51, %v309_v47  ;;  %v3933_v1 = vadd.f32 %v365_v3, %v349_v21 }
  0xec   :  { %v3935_v2 = vmul.f32 0.25, %v293_v59  ;;  %v263_v4 = vrot.slane %v3930_v60, 7  ;;  %v312_v6 = vrot.slane %v3930_v60, 1  ;;  %v3940_v63 = vmul.f32 0.75, %v3930_v60  ;;  %v3942_v7 = vpop.f32.mrb[9].mxu0 }
  0xed   :  { %v415_v9 = vadd.f32 %v399_v55, %v367_v32  ;;  %v262_v13 = vrot.slane %v3942_v7, 7  ;;  %v311_v14 = vrot.slane %v3942_v7, 1  ;;  %v3947_v16 = vmul.f32 0.75, %v3942_v7 }
  0xee   :  { %v343_v3 = vsel %vm298_vm1, %v312_v6, %v3930_v60  ;;  %v418_v17 = vadd.f32 %v402_v61, %v3919_v48  ;;  %v401_v20 = vmul.f32 0.25, %v310_v0  ;;  %v3952_v21 = vadd.f32 %v367_v32, %v351_v45 }
  0xef   :  { %451 = vrot.lane.b32.xlu1 %v415_v9, %s3632_s10  ;;  %453 = vrot.lane.b32.xlu0 %v416_v56, %s3632_s10  ;;  %v294_v23 = vsel %vm249_vm2, %v3942_v7, %v262_v13  ;;  %v3960_v25 = vpop.f32.mrb[10].mxu0  ;;  %v404_v31 = vmul.f32 0.25, %v343_v3  ;;  %v313_v33 = vsel %vm298_vm1, %v311_v14, %v312_v6  ;;  %v258_v35 = vsel %vm249_vm2, %v256_v30, %v257_v22 }
  0xf0   :  { %v3964_v36 = vmul.f32 0.25, %v294_v23  ;;  %v315_v37 = vrot.slane %v3960_v25, 1  ;;  %v3969_v40 = vmul.f32 0.75, %v3960_v25  ;;  %v3971_v41 = vpop.f32.mrb[11].mxu0  ;;  %v417_v45 = vadd.f32 %v401_v20, %v3921_v52 }
  0xf1   :  { %v6810_v42 = vrot.slane %v3971_v41, 7  ;;  %v314_v43 = vrot.slane %v3971_v41, 1  ;;  %v3976_v44 = vmul.f32 0.75, %v3971_v41  ;;  %v420_v22 = vadd.f32 %v404_v31, %v3940_v63 }
  0xf2   :  { %v344_v30 = vsel %vm298_vm1, %v315_v37, %v3960_v25  ;;  %v403_v47 = vmul.f32 0.25, %v313_v33  ;;  %v352_v49 = vmul.f32 0.25, %v258_v35  ;;  %v261_v56 = vsel %vm249_vm2, %v259_v50, %v260_v46 }
  0xf3   :  { %457 = vrot.lane.b32.xlu1 %v418_v17, %s3632_s10  ;;  %v295_v51 = vsel %vm249_vm2, %v3971_v41, %v6810_v42  ;;  %461 = vrot.lane.b32.xlu0 %v420_v22, %s3632_s10  ;;  %v3244_v53 = vpop.f32.mrb[12].mxu0  ;;  %v406_v54 = vmul.f32 0.25, %v344_v30  ;;  %v316_v55 = vsel %vm298_vm1, %v314_v43, %v315_v37  ;;  %v3996_v37 = vpop.permute.xlu0 %1068  ;;  %v354_v30 = vmul.f32 0.25, %v261_v56 }
  0xf4   :  { %v357_v59 = vmul.f32 0.25, %v295_v51  ;;  %v269_v61 = vrot.slane %v3244_v53, 7  ;;  %v318_v0 = vrot.slane %v3244_v53, 1  ;;  %v376_v6 = vmul.f32 0.75, %v3244_v53  ;;  %v214_v9 = vpop.f32.mrb[13].mxu0 }
  0xf5   :  { %v419_v14 = vadd.f32 %v403_v47, %v3947_v16  ;;  %v268_v3 = vrot.slane %v214_v9, 7  ;;  %v317_v17 = vrot.slane %v214_v9, 1  ;;  %v375_v20 = vmul.f32 0.75, %v214_v9 }
  0xf6   :  { %v345_v23 = vsel %vm298_vm1, %v318_v0, %v3244_v53  ;;  %v422_v31 = vadd.f32 %v406_v54, %v3969_v40  ;;  %v405_v33 = vmul.f32 0.25, %v316_v55  ;;  %v3994_v35 = vadd.f32 %v3904_v24, %v352_v49 }
  0xf7   :  { %455 = vrot.lane.b32.xlu1 %v417_v45, %s3632_s10  ;;  %459 = vrot.lane.b32.xlu0 %v419_v14, %s3632_s10  ;;  %v296_v46 = vsel %vm249_vm2, %v214_v9, %v268_v3  ;;  %v3247_v50 = vpop.f32.mrb[14].mxu0  ;;  %v408_v43 = vmul.f32 0.25, %v345_v23  ;;  %v319_v22 = vsel %vm298_vm1, %v317_v17, %v318_v0  ;;  %v4005_v9 = vadd.f32 %v3919_v48, %v354_v30 }
  0xf8   :  { %v359_v47 = vmul.f32 0.25, %v296_v46  ;;  %v272_v51 = vrot.slane %v3247_v50, 7  ;;  %v321_v53 = vrot.slane %v3247_v50, 1  ;;  %v378_v54 = vmul.f32 0.75, %v3247_v50  ;;  %v224_v55 = vpop.f32.mrb[15].mxu0 }
  0xf9   :  { %v424_v24 = vadd.f32 %v408_v43, %v376_v6  ;;  %v421_v49 = vadd.f32 %v405_v33, %v3976_v44  ;;  %v271_v5 = vrot.slane %v224_v55, 7  ;;  %v320_v42 = vrot.slane %v224_v55, 1  ;;  %v4016_v43 = vpop.permute.xlu0 %1062 }
  0xfa   :  { %v346_v45 = vsel %vm298_vm1, %v321_v53, %v3247_v50  ;;  %v377_v14 = vmul.f32 0.75, %v224_v55  ;;  %v407_v32 = vmul.f32 0.25, %v319_v22  ;;  %v264_v23 = vsel %vm249_vm2, %v262_v13, %v263_v4 }
  0xfb   :  { %465 = vrot.lane.b32.xlu1 %v422_v31, %s3632_s10  ;;  %469 = vrot.lane.b32.xlu0 %v424_v24, %s3632_s10  ;;  %v297_v56 = vsel %vm249_vm2, %v224_v55, %v271_v5  ;;  %v410_v0 = vmul.f32 0.25, %v346_v45  ;;  %v322_v17 = vsel %vm298_vm1, %v320_v42, %v321_v53  ;;  %v356_v48 = vmul.f32 0.25, %v264_v23 }
  0xfc   :  { %v361_v33 = vmul.f32 0.25, %v297_v56  ;;  %v423_v46 = vadd.f32 %v407_v32, %v375_v20  ;;  %v409_v50 = vmul.f32 0.25, %v322_v17  ;;  %v4020_v22 = vadd.f32 %v3921_v52, %v3935_v2 }
  0xfd   :  { %v426_v31 = vadd.f32 %v410_v0, %v378_v54  ;;  %v4024_v42 = vadd.f32 %v3947_v16, %v3964_v36  ;;  %v7004_v60 = vrot.slane %v3960_v25, 7  ;;  %v7005_v7 = vrot.slane %v3971_v41, 7  ;;  %v4052_v55 = vpop.permute.xlu0 %1186 }
  0xfe   :  { %v425_v13 = vadd.f32 %v409_v50, %v377_v14  ;;  %v4032_v32 = vadd.f32 %v3940_v63, %v356_v48  ;;  %v270_v53 = vsel %vm249_vm2, %v268_v3, %v269_v61  ;;  %v4038_v2 = vadd.f32 %v3976_v44, %v357_v59 }
  0xff   :  { %v267_v4 = vsel %vm249_vm2, %v7005_v7, %v7004_v60  ;;  %463 = vrot.lane.b32.xlu1 %v421_v49, %s3632_s10  ;;  %467 = vrot.lane.b32.xlu0 %v423_v46, %s3632_s10  ;;  %v360_v52 = vmul.f32 0.25, %v270_v53  ;;  %v4040_v16 = vadd.f32 %v375_v20, %v359_v47  ;;  %v273_v36 = vsel %vm249_vm2, %v271_v5, %v272_v51 }
 0x100   :  { %v358_v30 = vmul.f32 0.25, %v267_v4  ;;  %v4046_v63 = vadd.f32 %v377_v14, %v361_v33  ;;  %v6811_v41 = vmov 0.0   ;;  %v362_v3 = vmul.f32 0.25, %v273_v36 }
 0x101   :  { %2054 = vmatprep.mubr.f32.mxu1 %v6811_v41  ;;  %2267 = vmatprep.mubr.f32.mxu0 %v6811_v41  ;;  %v4050_v61 = vadd.f32 %v376_v6, %v360_v52  ;;  %v4060_v5 = vpop.permute.xlu0 %1064 }
 0x102   :  { %v4043_v25 = vadd.f32 %v3969_v40, %v358_v30  ;;  %v4055_v44 = vadd.f32 %v378_v54, %v362_v3  ;;  %v4058_v40 = vpop.permute.xlu1 %1192 }
 0x103   :  { %473 = vrot.lane.b32.xlu1 %v426_v31, %s3632_s10 }
 0x105   :  { %v4064_v20 = vpop.permute.xlu0 %1188 }
 0x106   :  { %v4062_v59 = vpop.permute.xlu1 %1070 }
 0x107   :  { %471 = vrot.lane.b32.xlu1 %v425_v13, %s3632_s10 }
 0x109   :  { %v4068_v6 = vpop.permute.xlu0 %1066 }
 0x10a   :  { %v4066_v47 = vpop.permute.xlu1 %1194 }
 0x10d   :  { %v4072_v24 = vpop.permute.xlu0 %1080 }
 0x10e   :  { %v4070_v51 = vpop.permute.xlu1 %1072 }
 0x111   :  { %v4076_v49 = vpop.permute.xlu0 %1082 }
 0x112   :  { %v4074_v54 = vpop.permute.xlu1 %1196 }
 0x115   :  { %v4080_v14 = vpop.permute.xlu0 %1084 }
 0x116   :  { %v4078_v45 = vpop.permute.xlu1 %1190 }
 0x119   :  { %v4084_v0 = vpop.permute.xlu0 %1092 }
 0x11a   :  { %v4082_v56 = vpop.permute.xlu1 %1074 }
 0x11d   :  { %v4088_v23 = vpop.permute.xlu0 %1094 }
 0x11e   :  { %v4086_v17 = vpop.permute.xlu1 %1076 }
 0x121   :  { %v4092_v46 = vpop.permute.xlu0 %1088 }
 0x122   :  { %v4090_v33 = vpop.permute.xlu1 %1078  ;;  %7006 = vst [vmem:[#allocation9_spill] sm:$0xff] %v4092_v46 }
 0x125   :  { %v4096_v48 = vpop.permute.xlu0 %1090 }
 0x126   :  { %v4094_v50 = vpop.permute.xlu1 %1086  ;;  %7007 = vst [vmem:[#allocation10_spill] sm:$0xff] %v4096_v48 }
 0x129   :  { %v4100_v60 = vpop.permute.xlu0 %1104 }
 0x12a   :  { %v4098_v31 = vpop.permute.xlu1 %1096  ;;  %7009 = vst [vmem:[#allocation12_spill] sm:$0xff] %v4100_v60 }
 0x12b   :  { %7008 = vst [vmem:[#allocation11_spill] sm:$0xff] %v4098_v31 }
 0x12d   :  { %v4104_v4 = vpop.permute.xlu0 %1106 }
 0x12e   :  { %v4102_v7 = vpop.permute.xlu1 %1098  ;;  %7011 = vst [vmem:[#allocation14_spill] sm:$0xff] %v4104_v4 }
 0x12f   :  { %7010 = vst [vmem:[#allocation13_spill] sm:$0xff] %v4102_v7 }
 0x131   :  { %v4108_v30 = vpop.permute.xlu0 %1108 }
 0x132   :  { %v4106_v13 = vpop.permute.xlu1 %1100  ;;  %7013 = vst [vmem:[#allocation16_spill] sm:$0xff] %v4108_v30 }
 0x133   :  { %7012 = vst [vmem:[#allocation15_spill] sm:$0xff] %v4106_v13 }
 0x136   :  { %v4110_v52 = vpop.permute.xlu1 %1102 }
 0x137   :  { %7014 = vst [vmem:[#allocation17_spill] sm:$0xff] %v4110_v52 }
 0x155   :  { %v446_v53 = vpop.permute.xlu0 %445 }
 0x156   :  { %v493_v60 = vsel %vm491_vm3, %v3908_v39, %v446_v53 }
 0x159   :  { %v444_v36 = vpop.permute.xlu0 %443 }
 0x15a   :  { %v450_v3 = vpop.permute.xlu1 %449  ;;  %v492_v29 = vsel %vm491_vm3, %v3893_v10, %v444_v36 }
 0x15b   :  { %v495_v15 = vsel %vm491_vm3, %v3926_v57, %v450_v3 }
 0x15d   :  { %v448_v41 = vpop.permute.xlu0 %447 }
 0x161   :  { %v452_v11 = vpop.permute.xlu1 %451  ;;  %v454_v38 = vpop.permute.xlu0 %453 }
 0x162   :  { %v496_v4 = vsel %vm491_vm3, %v3952_v21, %v452_v11  ;;  %v497_v30 = vsel %vm491_vm3, %v3994_v35, %v454_v38 }
 0x163   :  { %v508_v13 = vcombine.low %v492_v29, %v496_v4  ;;  %v509_v52 = vcombine.high %v492_v29, %v496_v4  ;;  %v576_v7 = vcombine.low %v493_v60, %v497_v30  ;;  %v577_v48 = vcombine.high %v493_v60, %v497_v30 }
 0x164   :  { %v494_v4 = vsel %vm491_vm3, %v3933_v1, %v448_v41 }
 0x165   :  { %v458_v46 = vpop.permute.xlu1 %457  ;;  %v462_v31 = vpop.permute.xlu0 %461  ;;  %v584_v10 = vrot.slane %v576_v7, %v3701_v18  ;;  %v591_v53 = vrot.slane %v577_v48, %v3701_v18  ;;  %v516_v48 = vrot.slane %v508_v13, %v3701_v18 }
 0x166   :  { %v499_v39 = vsel %vm491_vm3, %v4005_v9, %v458_v46 }
 0x167   :  { %v592_v11 = vcombine.low %v495_v15, %v499_v39  ;;  %v593_v21 = vcombine.high %v495_v15, %v499_v39  ;;  %v523_v15 = vrot.slane %v509_v52, %v3701_v18  ;;  %v501_v39 = vsel %vm491_vm3, %v4032_v32, %v462_v31 }
 0x169   :  { %v600_v38 = vrot.slane %v592_v11, %v3701_v18  ;;  %v607_v29 = vrot.slane %v593_v21, %v3701_v18  ;;  %v456_v35 = vpop.permute.xlu1 %455  ;;  %v460_v60 = vpop.permute.xlu0 %459 }
 0x16a   :  { %v498_v57 = vsel %vm491_vm3, %v4020_v22, %v456_v35 }
 0x16b   :  { %v608_v30 = vcombine.low %v584_v10, %v600_v38  ;;  %v609_v9 = vcombine.high %v584_v10, %v600_v38  ;;  %v624_v46 = vcombine.low %v591_v53, %v607_v29  ;;  %v625_v7 = vcombine.high %v591_v53, %v607_v29 }
 0x16c   :  { %v524_v36 = vcombine.low %v494_v4, %v498_v57  ;;  %v525_v3 = vcombine.high %v494_v4, %v498_v57  ;;  %v7015_v38 = vmov 0.0  }
 0x16d   :  { %v466_v11 = vpop.permute.xlu1 %465  ;;  %v470_v21 = vpop.permute.xlu0 %469  ;;  %v4137_v1 = vrot.slane %v625_v7, %v3705_v19  ;;  %v4140_v22 = vrot.slane %v608_v30, %v3705_v19  ;;  %v4143_v41 = vrot.slane %v609_v9, %v3705_v19  ;;  %v4150_v32 = vrot.slane %v624_v46, %v3705_v19 }
 0x16e   :  { %v532_v13 = vrot.slane %v524_v36, %v3701_v18  ;;  %v539_v52 = vrot.slane %v525_v3, %v3701_v18  ;;  %v505_v10 = vsel %vm491_vm3, %v4050_v61, %v470_v21  ;;  %v500_v46 = vsel %vm491_vm3, %v4024_v42, %v460_v60 }
 0x16f   :  { %v712_v31 = vcombine.low %v501_v39, %v505_v10  ;;  %v713_v53 = vcombine.high %v501_v39, %v505_v10  ;;  %v643_v29 = vcombine.high %v4137_v1, %v7015_v38  ;;  %v640_v35 = vcombine.high %v4140_v22, %v7015_v38 }
 0x170   :  { %v540_v4 = vcombine.low %v516_v48, %v532_v13  ;;  %v541_v57 = vcombine.high %v516_v48, %v532_v13  ;;  %v556_v30 = vcombine.low %v523_v15, %v539_v52  ;;  %v557_v9 = vcombine.high %v523_v15, %v539_v52 }
 0x171   :  { %v464_v7 = vpop.permute.xlu1 %463  ;;  %838 = vrot.lane.b32.xlu0 %v643_v29, %s3633_s15  ;;  %814 = vrot.lane.b32.xlu1 %v640_v35, %s3633_s15  ;;  %v468_v61 = vpop.permute.xlu0 %467  ;;  %v641_v3 = vcombine.high %v4143_v41, %v7015_v38  ;;  %v642_v48 = vcombine.high %v4150_v32, %v7015_v38 }
 0x172   :  { %v504_v36 = vsel %vm491_vm3, %v4040_v16, %v468_v61  ;;  %v4167_v21 = vrot.slane %v540_v4, %v3705_v19  ;;  %v4170_v13 = vrot.slane %v541_v57, %v3705_v19  ;;  %v503_v16 = vsel %vm491_vm3, %v4043_v25, %v466_v11 }
 0x173   :  { %v644_v39 = vcombine.low %v500_v46, %v504_v36  ;;  %v645_v15 = vcombine.high %v500_v46, %v504_v36  ;;  %v4179_v52 = vrot.slane %v557_v9, %v3705_v19  ;;  %v4182_v10 = vrot.slane %v556_v30, %v3705_v19 }
 0x174   :  { %v572_v4 = vcombine.high %v4167_v21, %v7015_v38  ;;  %v573_v57 = vcombine.high %v4170_v13, %v7015_v38  ;;  %v720_v61 = vrot.slane %v712_v31, %v3701_v18  ;;  %v727_v25 = vrot.slane %v713_v53, %v3701_v18 }
 0x175   :  { %822 = vrot.lane.b32.xlu0 %v641_v3, %s3633_s15  ;;  %v474_v42 = vpop.permute.xlu1 %473  ;;  %830 = vrot.lane.b32.xlu1 %v642_v48, %s3633_s15  ;;  %v502_v9 = vsel %vm491_vm3, %v4038_v2, %v464_v7  ;;  %v575_v31 = vcombine.high %v4179_v52, %v7015_v38  ;;  %v574_v53 = vcombine.high %v4182_v10, %v7015_v38 }
 0x176   :  { %v507_v60 = vsel %vm491_vm3, %v4055_v44, %v474_v42  ;;  %v652_v7 = vrot.slane %v644_v39, %v3701_v18 }
 0x177   :  { %v728_v29 = vcombine.low %v503_v16, %v507_v60  ;;  %v729_v35 = vcombine.high %v503_v16, %v507_v60 }
 0x179   :  { %v736_v44 = vrot.slane %v728_v29, %v3701_v18  ;;  %v743_v11 = vrot.slane %v729_v35, %v3701_v18  ;;  %782 = vrot.lane.b32.xlu0 %v572_v4, %s3633_s15  ;;  %790 = vrot.lane.b32.xlu1 %v573_v57, %s3633_s15  ;;  %v472_v30 = vpop.permute.xlu1 %471  ;;  %v659_v29 = vrot.slane %v645_v15, %v3701_v18 }
 0x17a   :  { %v506_v46 = vsel %vm491_vm3, %v4046_v63, %v472_v30 }
 0x17b   :  { %v744_v36 = vcombine.low %v720_v61, %v736_v44  ;;  %v745_v3 = vcombine.high %v720_v61, %v736_v44  ;;  %v760_v48 = vcombine.low %v727_v25, %v743_v11  ;;  %v761_v42 = vcombine.high %v727_v25, %v743_v11 }
 0x17c   :  { %v660_v16 = vcombine.low %v502_v9, %v506_v46  ;;  %v661_v60 = vcombine.high %v502_v9, %v506_v46 }
 0x17d   :  { %806 = vrot.lane.b32.xlu0 %v575_v31, %s3633_s15  ;;  %798 = vrot.lane.b32.xlu1 %v574_v53, %s3633_s15  ;;  %v4205_v2 = vrot.slane %v761_v42, %v3705_v19  ;;  %v4208_v63 = vrot.slane %v744_v36, %v3705_v19  ;;  %v4219_v25 = vrot.slane %v745_v3, %v3705_v19 }
 0x17e   :  { %v668_v35 = vrot.slane %v660_v16, %v3701_v18  ;;  %v675_v4 = vrot.slane %v661_v60, %v3701_v18  ;;  %v4222_v44 = vrot.slane %v760_v48, %v3705_v19 }
 0x17f   :  { %v779_v57 = vcombine.high %v4205_v2, %v7015_v38  ;;  %v776_v61 = vcombine.high %v4208_v63, %v7015_v38  ;;  %v777_v18 = vcombine.high %v4219_v25, %v7015_v38 }
 0x180   :  { %v676_v11 = vcombine.low %v652_v7, %v668_v35  ;;  %v677_v39 = vcombine.high %v652_v7, %v668_v35  ;;  %v692_v30 = vcombine.low %v659_v29, %v675_v4  ;;  %v693_v15 = vcombine.high %v659_v29, %v675_v4 }
 0x181   :  { %840 = vrot.lane.b32.xlu0 %v779_v57, %s3633_s15  ;;  %816 = vrot.lane.b32.xlu1 %v776_v61, %s3633_s15  ;;  %v778_v9 = vcombine.high %v4222_v44, %v7015_v38 }
 0x182   :  { %v4231_v46 = vrot.slane %v676_v11, %v3705_v19  ;;  %v4234_v31 = vrot.slane %v677_v39, %v3705_v19  ;;  %v4243_v3 = vrot.slane %v693_v15, %v3705_v19  ;;  %v4246_v48 = vrot.slane %v692_v30, %v3705_v19 }
 0x184   :  { %v708_v53 = vcombine.high %v4231_v46, %v7015_v38  ;;  %v709_v36 = vcombine.high %v4234_v31, %v7015_v38  ;;  %v711_v42 = vcombine.high %v4243_v3, %v7015_v38  ;;  %v710_v16 = vcombine.high %v4246_v48, %v7015_v38  ;;  %v7072_v38 = vld [vmem:[#allocation14_spill] sm:$0xff] }
 0x185   :  { %824 = vrot.lane.b32.xlu0 %v777_v18, %s3633_s15  ;;  %832 = vrot.lane.b32.xlu1 %v778_v9, %s3633_s15 }
 0x189   :  { %784 = vrot.lane.b32.xlu0 %v708_v53, %s3633_s15  ;;  %792 = vrot.lane.b32.xlu1 %v709_v36, %s3633_s15 }
 0x18d   :  { %808 = vrot.lane.b32.xlu0 %v711_v42, %s3633_s15  ;;  %800 = vrot.lane.b32.xlu1 %v710_v16, %s3633_s15 }
 0x1e3   :  { %v839_v60 = vpop.permute.xlu0 %838  ;;  %v815_v7 = vpop.permute.xlu1 %814 }
 0x1e4   :  { %v4258_v35 = vsel %vm844_vm4, %v4140_v22, %v815_v7 }
 0x1e7   :  { %v823_v29 = vpop.permute.xlu0 %822  ;;  %v831_v19 = vpop.permute.xlu1 %830 }
 0x1e8   :  { %v4262_v4 = vsel %vm844_vm4, %v4143_v41, %v823_v29  ;;  %v4268_v61 = vsel %vm844_vm4, %v4150_v32, %v831_v19  ;;  %v4280_v41 = vsel %vm844_vm4, %v4137_v1, %v839_v60 }
 0x1e9   :  { %v3336_v57 = vpack.i.bf16 %v4262_v4, %v4258_v35  ;;  %v3346_v22 = vpack.i.bf16 %v4268_v61, %v4262_v4  ;;  %7016 = vst [vmem:[#allocation18_spill] sm:$0xff] %v4280_v41  ;;  %v3366_v32 = vpack.i.bf16 %v4280_v41, %v4268_v61 }
 0x1eb   :  { %3337 = vrot.lane.b32.xlu0 %v3336_v57, %s3634_s1  ;;  %3332 = vrot.lane.b32.xlu1 %v3336_v57, %s3636_s0  ;;  %v791_v11 = vpop.permute.xlu1 %790  ;;  %v783_v39 = vpop.permute.xlu0 %782 }
 0x1ec   :  { %v4294_v1 = vsel %vm844_vm4, %v4167_v21, %v783_v39  ;;  %v4298_v30 = vsel %vm844_vm4, %v4170_v13, %v791_v11 }
 0x1ed   :  { %7017 = vst [vmem:[#allocation19_spill] sm:$0xff] %v4294_v1  ;;  %7018 = vst [vmem:[#allocation20_spill] sm:$0xff] %v4298_v30  ;;  %v3381_v18 = vpack.i.bf16 %v4298_v30, %v4294_v1 }
 0x1ef   :  { %3347 = vrot.lane.b32.xlu0 %v3346_v22, %s3632_s10  ;;  %3342 = vrot.lane.b32.xlu1 %v3336_v57, %s3637_s30  ;;  %v799_v15 = vpop.permute.xlu1 %798  ;;  %v807_v13 = vpop.permute.xlu0 %806 }
 0x1f0   :  { %v4308_v9 = vsel %vm844_vm4, %v4182_v10, %v799_v15  ;;  %v4324_v53 = vsel %vm844_vm4, %v4179_v52, %v807_v13  ;;  %v1110_v15 = vsel %vm491_vm3, %v3727_v28, %v4016_v43  ;;  %v1117_v43 = vsel %vm491_vm3, %v3811_v62, %v4082_v56 }
 0x1f1   :  { %7019 = vst [vmem:[#allocation21_spill] sm:$0xff] %v4308_v9  ;;  %v3391_v21 = vpack.i.bf16 %v4308_v9, %v4280_v41  ;;  %v3426_v10 = vpack.i.bf16 %v4308_v9, %v4298_v30  ;;  %7020 = vst [vmem:[#allocation22_spill] sm:$0xff] %v4324_v53  ;;  %v3436_v36 = vpack.i.bf16 %v4324_v53, %v4294_v1 }
 0x1f2   :  { %v3451_v42 = vpack.i.bf16 %v4258_v35, %v4324_v53  ;;  %v1118_v56 = vsel %vm844_vm4, %v1117_v43, %v4086_v17  ;;  %v7066_v17 = vld [vmem:[#allocation12_spill] sm:$0xff] }
 0x1f3   :  { %3357 = vrot.lane.b32.xlu0 %v3346_v22, %s3638_s6  ;;  %3352 = vrot.lane.b32.xlu1 %v3346_v22, %s3639_s7  ;;  %v841_v52 = vpop.permute.xlu0 %840  ;;  %v817_v16 = vpop.permute.xlu1 %816 }
 0x1f4   :  { %v4354_v19 = vsel %vm844_vm4, %v4208_v63, %v817_v16  ;;  %v4377_v39 = vsel %vm844_vm4, %v4205_v2, %v841_v52  ;;  %v1120_v2 = vsel %vm491_vm3, %v3803_v58, %v4072_v24  ;;  %v1111_v58 = vsel %vm844_vm4, %v1110_v15, %v4060_v5  ;;  %v7067_v15 = vld [vmem:[#allocation8_spill] sm:$0xff] }
 0x1f5   :  { %7022 = vst [vmem:[#allocation24_spill] sm:$0xff] %v4354_v19  ;;  %7024 = vst [vmem:[#allocation26_spill] sm:$0xff] %v4377_v39 }
 0x1f7   :  { %3367 = vrot.lane.b32.xlu0 %v3366_v32, %s3636_s0  ;;  %3362 = vrot.lane.b32.xlu1 %v3346_v22, %s3640_s8  ;;  %v825_v60 = vpop.permute.xlu0 %824  ;;  %v833_v29 = vpop.permute.xlu1 %832 }
 0x1f8   :  { %v4346_v7 = vsel %vm844_vm4, %v4219_v25, %v825_v60  ;;  %v4360_v22 = vsel %vm844_vm4, %v4222_v44, %v833_v29 }
 0x1f9   :  { %7021 = vst [vmem:[#allocation23_spill] sm:$0xff] %v4346_v7  ;;  %v3476_v57 = vpack.i.bf16 %v4346_v7, %v4354_v19  ;;  %7023 = vst [vmem:[#allocation25_spill] sm:$0xff] %v4360_v22  ;;  %v3486_v25 = vpack.i.bf16 %v4360_v22, %v4346_v7 }
 0x1fb   :  { %3377 = vrot.lane.b32.xlu0 %v3366_v32, %s3637_s30  ;;  %1759 = vrot.lane.b32.xlu1 %v4258_v35, %s3641_s9  ;;  %v793_v63 = vpop.permute.xlu1 %792  ;;  %v785_v11 = vpop.permute.xlu0 %784 }
 0x1ff   :  { %1763 = vrot.lane.b32.xlu0 %v4268_v61, %s3641_s9  ;;  %3372 = vrot.lane.b32.xlu1 %v3366_v32, %s3634_s1  ;;  %v1114_v32 = vsel %vm491_vm3, %v3721_v26, %v3996_v37  ;;  %v1201_v26 = vsel %vm491_vm3, %v3724_v27, %v4058_v40  ;;  %v4400_v27 = vsel %vm844_vm4, %v4234_v31, %v793_v63  ;;  %v809_v29 = vpop.permute.xlu0 %808 }
 0x200   :  { %v1115_v44 = vsel %vm844_vm4, %v1114_v32, %v4062_v59  ;;  %v3506_v59 = vpack.i.bf16 %v4377_v39, %v4360_v22  ;;  %7026 = vst [vmem:[#allocation28_spill] sm:$0xff] %v4400_v27  ;;  %v1198_v40 = vsel %vm491_vm3, %v3743_v34, %v4052_v55  ;;  %v1202_v28 = vsel %vm844_vm4, %v1201_v26, %v4066_v47 }
 0x201   :  { %v4384_v37 = vsel %vm1112_vm5, %v1115_v44, %v4070_v51  ;;  %v801_v51 = vpop.permute.xlu1 %800  ;;  %v1121_v34 = vsel %vm844_vm4, %v1120_v2, %v4076_v49  ;;  %v4423_v47 = vsub.s32 0, %v3685_v8  ;;  %v1199_v24 = vsel %vm844_vm4, %v1198_v40, %v4064_v20  ;;  %v7039_v44 = vld [vmem:[#allocation9_spill] sm:$0xff] }
 0x202   :  { %vm1205_vm6 = vcmp.eq.s32.totalorder %v4384_v37, 0  ;;  %vm6819_vm7 = vcmp.eq.s32.totalorder %v4384_v37, 31  ;;  %v4429_v5 = vsel %vm844_vm4, %v4246_v48, %v801_v51  ;;  %v4443_v8 = vsel %vm1112_vm5, %v1202_v28, %v4074_v54 }
 0x203   :  { %1765 = vrot.lane.b32.xlu0 %v4280_v41, %s3641_s9  ;;  %1761 = vrot.lane.b32.xlu1 %v4262_v4, %s3641_s9  ;;  %7027 = vst [vmem:[#allocation29_spill] sm:$0xff] %v4429_v5  ;;  %v4451_v20 = vsel %vm1112_vm5, %v1111_v58, %v4068_v6  ;;  %v4457_v31 = vsel %vm1112_vm5, %v1121_v34, %v4080_v14  ;;  %vm6822_vm8 = vcmp.eq.s32.totalorder %v4443_v8, 0  ;;  %vm6840_vm9 = vcmp.eq.s32.totalorder %v4443_v8, 31  ;;  %v7068_v6 = vld [vmem:[#allocation17_spill] sm:$0xff] }
 0x204   :  { %v1126_v54 = vsel %vm491_vm3, %v3835_v12, %v4084_v0  ;;  %v4464_v48 = vsel %vm1112_vm5, %v1199_v24, %v4078_v45  ;;  %vm1204_vm10 = vcmp.eq.s32.totalorder %v4451_v20, 0  ;;  %vm1207_vm11 = vcmp.eq.s32.totalorder %v4457_v31, 0  ;;  %v7047_v24 = vld [vmem:[#allocation10_spill] sm:$0xff] }
 0x205   :  { %v4480_v12 = vsel %vm1112_vm5, %v1118_v56, %v4090_v33  ;;  %v1127_v45 = vsel %vm844_vm4, %v1126_v54, %v4088_v23  ;;  %vm6818_vm12 = vcmp.eq.s32.totalorder %v4451_v20, 31  ;;  %vm6844_vm13 = vcmp.eq.s32.totalorder %v4464_v48, 0  ;;  %v7029_v23 = vld [vmem:[#allocation6_spill] sm:$0xff]  ;;  %vm4514_vm0 = vmor %vm1207_vm11, %vm6822_vm8 }
 0x206   :  { %vm6820_vm14 = vcmp.eq.s32.totalorder %v4457_v31, 31  ;;  %v1123_v33 = vsel %vm491_vm3, %v7029_v23, %v4094_v50  ;;  %vm6867_vm15 = vcmp.eq.s32.totalorder %v4464_v48, 31  ;;  %vm1206_vm1 = vcmp.eq.s32.totalorder %v4480_v12, 0  ;;  %vm4537_vm2 = vmor %vm1207_vm11, %vm6840_vm9  ;;  %v7063_v23 = vld [vmem:[#allocation15_spill] sm:$0xff] }
 0x207   :  { %3382 = vrot.lane.b32.xlu0 %v3381_v18, %s3632_s10  ;;  %3387 = vrot.lane.b32.xlu1 %v3381_v18, %s3639_s7  ;;  %v4609_v28 = vsel %vm844_vm4, %v4243_v3, %v809_v29  ;;  %v7077_v41 = vmov 0 }
 0x208   :  { %7045 = vst [vmem:[#allocation30_spill] sm:$0xff] %v4609_v28 }
 0x20b   :  { %3392 = vrot.lane.b32.xlu0 %v3391_v21, %s3632_s10  ;;  %3397 = vrot.lane.b32.xlu1 %v3391_v21, %s3639_s7 }
 0x20f   :  { %3402 = vrot.lane.b32.xlu0 %v3381_v18, %s3638_s6  ;;  %3407 = vrot.lane.b32.xlu1 %v3381_v18, %s3640_s8  ;;  %v4396_v18 = vsel %vm844_vm4, %v4231_v46, %v785_v11  ;;  %v7028_v46 = vmov 0   ;;  %v1124_v11 = vsel %vm844_vm4, %v1123_v33, %v7039_v44 }
 0x210   :  { %7025 = vst [vmem:[#allocation27_spill] sm:$0xff] %v4396_v18  ;;  %v4420_v55 = vpack.i.bf16 %v4400_v27, %v4396_v18  ;;  %v4434_v62 = vsel %vm1205_vm6, 1, %v7028_v46  ;;  %v4439_v49 = vsel %vm6819_vm7, 1, %v7028_v46  ;;  %v4491_v14 = vsel %vm6822_vm8, 1, %v7028_v46  ;;  %vm4555_vm7 = vmor %vm6820_vm14, %vm6822_vm8 }
 0x211   :  { %v4496_v0 = vsel %vm6840_vm9, 1, %v7028_v46  ;;  %v4507_v13 = vsel %vm1204_vm10, 1, %v7028_v46  ;;  %v4531_v52 = vsel %vm6844_vm13, 1, %v7028_v46  ;;  %v4544_v60 = vsel %vm1207_vm11, 1, %v7028_v46  ;;  %vm4585_vm11 = vmor %vm1206_vm1, %vm6844_vm13 }
 0x212   :  { %7035 = vst [vmem:[#allocation6_spill] sm:$0xff] %v4544_v60  ;;  %v4567_v32 = vsel %vm1206_vm1, 1, %v7028_v46  ;;  %v4579_v26 = vsel %vm4514_vm0, 1, %v7028_v46  ;;  %v4597_v40 = vsel %vm6867_vm15, 1, %v7028_v46  ;;  %vm4603_vm0 = vmor %vm1206_vm1, %vm6867_vm15  ;;  %v4616_v43 = vsel %vm4537_vm2, 1, %v7028_v46 }
 0x213   :  { %3417 = vrot.lane.b32.xlu0 %v3391_v21, %s3640_s8  ;;  %3412 = vrot.lane.b32.xlu1 %v3391_v21, %s3638_s6  ;;  %v4468_v21 = vpack.i.bf16 %v4429_v5, %v4377_v39  ;;  %7040 = vst [vmem:[#allocation9_spill] sm:$0xff] %v4579_v26  ;;  %7046 = vst [vmem:[#allocation31_spill] sm:$0xff] %v4616_v43  ;;  %v4626_v3 = vsel %vm1112_vm5, %v1124_v11, %v7047_v24  ;;  %v4637_v54 = vsel %vm4555_vm7, 1, %v7028_v46  ;;  %v7058_v24 = vld [vmem:[#allocation7_spill] sm:$0xff] }
 0x214   :  { %7048 = vst [vmem:[#allocation10_spill] sm:$0xff] %v4637_v54  ;;  %v4654_v33 = vsel %vm4585_vm11, 1, %v7028_v46  ;;  %v4674_v29 = vsel %vm4603_vm0, 1, %v7028_v46  ;;  %vm1208_vm11 = vcmp.eq.s32.totalorder %v4626_v3, 0  ;;  %vm1216_vm0 = vcmp.eq.s32.totalorder %v4626_v3, 31 }
 0x215   :  { %7051 = vst [vmem:[#allocation32_spill] sm:$0xff] %v4654_v33  ;;  %7054 = vst [vmem:[#allocation33_spill] sm:$0xff] %v4674_v29  ;;  %v4772_v2 = vsel %vm1208_vm11, 1, %v7028_v46  ;;  %v7123_v29 = vmov 0 }
 0x216   :  { %7065 = vst [vmem:[#allocation36_spill] sm:$0xff] %v4772_v2 }
 0x217   :  { %3427 = vrot.lane.b32.xlu0 %v3426_v10, %s3634_s1  ;;  %3422 = vrot.lane.b32.xlu1 %v3426_v10, %s3636_s0 }
 0x21b   :  { %3437 = vrot.lane.b32.xlu0 %v3436_v36, %s3634_s1  ;;  %3432 = vrot.lane.b32.xlu1 %v3436_v36, %s3636_s0 }
 0x21f   :  { %3442 = vrot.lane.b32.xlu0 %v3426_v10, %s3637_s30  ;;  %3447 = vrot.lane.b32.xlu1 %v3436_v36, %s3637_s30  ;;  %v7032_v36 = vld [vmem:[#allocation11_spill] sm:$0xff]  ;;  %v1699_v10 = vsel %vm1216_vm0, 1, %v7028_v46 }
 0x220   :  { %v4521_v50 = vsel %vm1112_vm5, %v1127_v45, %v7032_v36  ;;  %v4667_v36 = vpack.i.bf16 %v4354_v19, %v4609_v28 }
 0x221   :  { %vm1217_vm7 = vcmp.eq.s32.totalorder %v4521_v50, 31 }
 0x222   :  { %v4688_v11 = vsel %vm1217_vm7, 1, %v7028_v46 }
 0x223   :  { %3452 = vrot.lane.b32.xlu0 %v3451_v42, %s3632_s10  ;;  %3457 = vrot.lane.b32.xlu1 %v3451_v42, %s3639_s7 }
 0x227   :  { %3462 = vrot.lane.b32.xlu0 %v3451_v42, %s3638_s6  ;;  %3467 = vrot.lane.b32.xlu1 %v3451_v42, %s3640_s8  ;;  %v4526_v42 = vsel %vm6818_vm12, 1, %v7028_v46  ;;  %vm6821_vm12 = vcmp.eq.s32.totalorder %v4480_v12, 31 }
 0x228   :  { %v4572_v63 = vsel %vm6821_vm12, 1, %v7028_v46  ;;  %vm1242_vm1 = vmor %vm6821_vm12, %vm6844_vm13 }
 0x229   :  { %7038 = vst [vmem:[#allocation11_spill] sm:$0xff] %v4572_v63 }
 0x22b   :  { %1755 = vrot.lane.b32.xlu0 %v4308_v9, %s3641_s9  ;;  %1753 = vrot.lane.b32.xlu1 %v4298_v30, %s3641_s9  ;;  %v4791_v9 = vpack.i.bf16 %v4609_v28, %v4396_v18 }
 0x22f   :  { %1757 = vrot.lane.b32.xlu0 %v4324_v53, %s3641_s9  ;;  %1751 = vrot.lane.b32.xlu1 %v4294_v1, %s3641_s9 }
 0x233   :  { %3477 = vrot.lane.b32.xlu1 %v3476_v57, %s3634_s1  ;;  %3472 = vrot.lane.b32.xlu0 %v3476_v57, %s3636_s0 }
 0x237   :  { %3487 = vrot.lane.b32.xlu1 %v3486_v25, %s3639_s7  ;;  %3482 = vrot.lane.b32.xlu0 %v3486_v25, %s3632_s10 }
 0x23b   :  { %3497 = vrot.lane.b32.xlu1 %v3486_v25, %s3638_s6  ;;  %3492 = vrot.lane.b32.xlu0 %v3476_v57, %s3637_s30  ;;  %v4677_v57 = vsel %vm1242_vm1, 1, %v7028_v46  ;;  %vm1245_vm1 = vmor %vm1217_vm7, %vm6822_vm8 }
 0x23c   :  { %7055 = vst [vmem:[#allocation34_spill] sm:$0xff] %v4677_v57  ;;  %v4754_v34 = vsel %vm1245_vm1, 1, %v7028_v46  ;;  %vm4831_vm1 = vmor %vm1217_vm7, %vm6840_vm9  ;;  %v7093_v57 = vmov 0 }
 0x23f   :  { %3507 = vrot.lane.b32.xlu1 %v3506_v59, %s3636_s0  ;;  %3502 = vrot.lane.b32.xlu0 %v3486_v25, %s3640_s8  ;;  %v4562_v25 = vsel %vm6820_vm14, 1, %v7028_v46  ;;  %vm1209_vm14 = vcmp.eq.s32.totalorder %v4521_v50, 0  ;;  %v7057_v59 = vld [vmem:[#allocation13_spill] sm:$0xff] }
 0x240   :  { %vm4647_vm2 = vmor %vm1209_vm14, %vm6822_vm8  ;;  %v4683_v44 = vsel %vm1209_vm14, 1, %v7028_v46  ;;  %v1129_v51 = vsel %vm491_vm3, %v7058_v24, %v7057_v59 }
 0x241   :  { %vm4661_vm12 = vmor %vm1209_vm14, %vm6840_vm9  ;;  %7056 = vst [vmem:[#allocation35_spill] sm:$0xff] %v4683_v44  ;;  %v1130_v56 = vsel %vm844_vm4, %v1129_v51, %v7063_v23  ;;  %v1574_v23 = vrot.slane %v4597_v40, %v4423_v47  ;;  %v1132_v40 = vsel %vm491_vm3, %v7067_v15, %v7066_v17  ;;  %v7069_v17 = vmov 0 }
 0x242   :  { %vm1225_vm14 = vmor %vm1205_vm6, %vm6822_vm8  ;;  %v4718_v59 = vsel %vm4661_vm12, 1, %v7028_v46  ;;  %v1131_v58 = vsel %vm1112_vm5, %v1130_v56, %v7068_v6  ;;  %v1722_v56 = vrot.slane %v1699_v10, %v4423_v47  ;;  %v1133_v6 = vsel %vm844_vm4, %v1132_v40, %v7072_v38  ;;  %v7073_v10 = vld [vmem:[#allocation5_spill] sm:$0xff]  ;;  %v7082_v38 = vld [vmem:[#allocation16_spill] sm:$0xff] }
 0x243   :  { %2514 = vrot.lane.b32.xlu0 %v4360_v22, %s3634_s1  ;;  %3512 = vrot.lane.b32.xlu1 %v4420_v55, %s3632_s10  ;;  %7060 = vst [vmem:[#allocation7_spill] sm:$0xff] %v4718_v59  ;;  %vm1228_vm8 = vmor %vm1208_vm11, %vm6844_vm13  ;;  %v4747_v24 = vsel %vm1225_vm14, 1, %v7028_v46  ;;  %vm4811_vm3 = vcmp.eq.s32.totalorder %v1574_v23, 1  ;;  %vm6839_vm14 = vcmp.lt.s32.totalorder %v7073_v10, 127  ;;  %v4854_v40 = vsel %vm1112_vm5, %v1133_v6, %v7082_v38 }
 0x244   :  { %vm4740_vm12 = vmor %vm1216_vm0, %vm6844_vm13  ;;  %v4767_v51 = vsel %vm1228_vm8, 1, %v7028_v46  ;;  %v7070_v17 = vsel %vm4811_vm3, 4294967295, %v7069_v17  ;;  %vm1210_vm8 = vcmp.eq.s32.totalorder %v1131_v58, 0  ;;  %vm4841_vm4 = vcmp.eq.s32.totalorder %v1722_v56, 1 }
 0x245   :  { %7064 = vst [vmem:[#allocation15_spill] sm:$0xff] %v4767_v51  ;;  %v1618_v45 = vsel %vm4740_vm12, 1, %v7028_v46  ;;  %v7078_v41 = vsel %vm4841_vm4, 4294967295, %v7077_v41  ;;  %vm1218_vm12 = vcmp.eq.s32.totalorder %v1131_v58, 31  ;;  %vm4848_vm7 = vmor %vm1210_vm8, %vm6844_vm13  ;;  %v4862_v56 = vsel %vm1210_vm8, 1, %v7028_v46 }
 0x246   :  { %v1641_v16 = vrot.slane %v1618_v45, %v4423_v47  ;;  %7079 = vst [vmem:[#allocation17_spill] sm:$0xff] %v7078_v41  ;;  %v4866_v51 = vsel %vm1218_vm12, 1, %v7028_v46  ;;  %vm4884_vm5 = vmor %vm1204_vm10, %vm6844_vm13  ;;  %v1578_v44 = vrot.slane %v4496_v0, %v4423_v47 }
 0x247   :  { %3517 = vrot.lane.b32.xlu0 %v4420_v55, %s3639_s7  ;;  %3522 = vrot.lane.b32.xlu1 %v4468_v21, %s3632_s10 }
 0x24b   :  { %3527 = vrot.lane.b32.xlu0 %v4468_v21, %s3639_s7  ;;  %3532 = vrot.lane.b32.xlu1 %v4420_v55, %s3638_s6 }
 0x24f   :  { %3537 = vrot.lane.b32.xlu0 %v4420_v55, %s3640_s8  ;;  %3542 = vrot.lane.b32.xlu1 %v4468_v21, %s3638_s6  ;;  %v4730_v55 = vpack.i.bf16 %v4429_v5, %v4400_v27 }
 0x253   :  { %3547 = vrot.lane.b32.xlu0 %v4468_v21, %s3640_s8  ;;  %3552 = vrot.lane.b32.xlu1 %v4667_v36, %s3632_s10  ;;  %v4713_v21 = vsel %vm4647_vm2, 1, %v7028_v46  ;;  %vm1233_vm2 = vmor %vm1205_vm6, %vm6840_vm9 }
 0x254   :  { %7059 = vst [vmem:[#allocation13_spill] sm:$0xff] %v4713_v21  ;;  %vm1236_vm6 = vmor %vm1208_vm11, %vm6867_vm15  ;;  %v4800_v53 = vsel %vm1233_vm2, 1, %v7028_v46  ;;  %vm6838_vm11 = vcmp.lt.s32.totalorder %v7073_v10, 96 }
 0x255   :  { %v4816_v15 = vsel %vm1236_vm6, 1, %v7028_v46  ;;  %vm4891_vm2 = vmor %vm1210_vm8, %vm6867_vm15  ;;  %vm4911_vm8 = vcmp.eq.s32.totalorder %v1641_v16, 1  ;;  %v1781_v16 = vsel %vm4831_vm1, 1, %v7028_v46  ;;  %vm7116_vm1 = vcmp.eq.s32.totalorder %v4384_v37, 31 }
 0x256   :  { %7071 = vst [vmem:[#allocation12_spill] sm:$0xff] %v4816_v15  ;;  %vm4907_vm6 = vmor %vm1204_vm10, %vm6867_vm15  ;;  %v7094_v57 = vsel %vm4911_vm8, 4294967295, %v7093_v57  ;;  %vm1211_vm10 = vcmp.eq.s32.totalorder %v4854_v40, 0  ;;  %v1807_v58 = vrot.slane %v1781_v16, %v4423_v47 }
 0x257   :  { %3557 = vrot.lane.b32.xlu0 %v4667_v36, %s3639_s7  ;;  %3562 = vrot.lane.b32.xlu1 %v4730_v55, %s3636_s0  ;;  %7095 = vst [vmem:[#allocation5_spill] sm:$0xff] %v7094_v57  ;;  %vm4932_vm9 = vmor %vm1218_vm12, %vm6867_vm15  ;;  %v5029_v57 = vsel %vm1211_vm10, 1, %v7028_v46 }
 0x258   :  { %v5000_v0 = vsel %vm4932_vm9, 1, %v7028_v46 }
 0x25b   :  { %3567 = vrot.lane.b32.xlu0 %v4730_v55, %s3634_s1  ;;  %3572 = vrot.lane.b32.xlu1 %v4791_v9, %s3636_s0 }
 0x25d   :  { %v4822_v59 = vpop.permute.xlu0 %3337  ;;  %v4825_v21 = vpop.permute.xlu1 %3332 }
 0x25e   :  { %7074 = vst [vmem:[#allocation8_spill] sm:$0xff] %v4825_v21  ;;  %v6834_v45 = vunpack.i.h.bf16 %v4822_v59  ;;  %v7083_v1 = vunpack.i.l.bf16 %v4822_v59  ;;  %v7084_v38 = vunpack.i.h.bf16 %v4825_v21  ;;  %v7085_v15 = vunpack.i.l.bf16 %v4825_v21 }
 0x25f   :  { %3577 = vrot.lane.b32.xlu0 %v4791_v9, %s3634_s1  ;;  %3582 = vrot.lane.b32.xlu1 %v4667_v36, %s3638_s6 }
 0x260   :  { %v1689_v6 = vsel %vm6838_vm11, %v7083_v1, %v6834_v45  ;;  %v1563_v30 = vsel %vm6839_vm14, %v7085_v15, %v7084_v38  ;;  %vm4918_vm11 = vmor %vm1218_vm12, %vm6844_vm13  ;;  %vm6861_vm13 = vcmask 1043456   ;;  %vm7102_vm14 = vcmp.eq.s32.totalorder %v4443_v8, 0 }
 0x261   :  { %v1747_v45 = vsel %vm4841_vm4, 0.0, %v1689_v6  ;;  %v1585_v15 = vsel %vm4811_vm3, 0.0, %v1563_v30  ;;  %v4899_v38 = vpop.permute.xlu0 %3347  ;;  %v4901_v43 = vpop.permute.xlu1 %3342  ;;  %v4925_v6 = vsel %vm4848_vm7, 1, %v7028_v46  ;;  %vm4948_vm12 = vmor %vm1216_vm0, %vm6867_vm15  ;;  %vm6866_vm7 = vcmp.eq.s32.totalorder %v4854_v40, 31 }
 0x262   :  { %7090 = vst [vmem:[#allocation14_spill] sm:$0xff] %v4901_v43  ;;  %v1892_v60 = vrot.slane %v1585_v15, 4  ;;  %v6849_v2 = vunpack.i.h.bf16 %v4901_v43  ;;  %v6848_v50 = vunpack.i.l.bf16 %v4901_v43  ;;  %v4955_v15 = vsel %vm4891_vm2, 1, %v7028_v46  ;;  %vm4964_vm4 = vmor %vm1211_vm10, %vm7102_vm14 }
 0x263   :  { %3587 = vrot.lane.b32.xlu0 %v4667_v36, %s3640_s8  ;;  %3592 = vrot.lane.b32.xlu1 %v4730_v55, %s3637_s30  ;;  %v1916_v36 = vrot.slane %v1747_v45, 4  ;;  %vm7105_vm0 = vcmp.lt.s32.totalorder %v7073_v10, 97  ;;  %v4985_v45 = vsel %vm4918_vm11, 1, %v7028_v46  ;;  %vm7106_vm14 = vcmp.eq.s32.totalorder %v4443_v8, 31 }
 0x264   :  { %v1608_v55 = vsel %vm7105_vm0, %v6848_v50, %v6849_v2  ;;  %vm4991_vm2 = vmor %vm1211_vm10, %vm7106_vm14  ;;  %vm7109_vm11 = vcmp.eq.s32.totalorder %v4443_v8, 0  ;;  %v1780_v23 = vsel %vm4948_vm12, 1, %v7028_v46  ;;  %v5061_v33 = vsel %vm4964_vm4, 1, %v7028_v46 }
 0x265   :  { %v4974_v1 = vpop.permute.xlu0 %3357  ;;  %v4976_v41 = vpop.permute.xlu1 %3352  ;;  %v1666_v2 = vsel %vm4911_vm8, 0.0, %v1608_v55  ;;  %vm5008_vm0 = vmor %vm6866_vm7, %vm7109_vm11  ;;  %v5021_v55 = vsel %vm6861_vm13, %v4258_v35, %v1892_v60  ;;  %vm5063_vm12 = vcmp.eq.s32.totalorder %v1578_v44, 1  ;;  %v5084_v44 = vsel %vm4991_vm2, 1, %v7028_v46 }
 0x266   :  { %7112 = vst [vmem:[#allocation16_spill] sm:$0xff] %v5021_v55  ;;  %v5024_v30 = vsel %vm6861_vm13, %v1666_v2, %v1916_v36  ;;  %vm7115_vm9 = vmmov %vm7109_vm11  ;;  %v7119_v2 = vrot.slane %v4754_v34, %v4423_v47  ;;  %v7120_v36 = vmov 0  ;;  %v7124_v29 = vsel %vm5063_vm12, 4294967295, %v7123_v29 }
 0x267   :  { %2482 = vrot.lane.b32.xlu0 %v4360_v22, %s3637_s30  ;;  %3597 = vrot.lane.b32.xlu1 %v4791_v9, %s3637_s30  ;;  %7113 = vst [vmem:[#allocation37_spill] sm:$0xff] %v5024_v30  ;;  %v5034_v9 = vsel %vm6866_vm7, 1, %v7028_v46  ;;  %vm5043_vm14 = vmor %vm7116_vm1, %vm7115_vm9  ;;  %vm7127_vm11 = vcmp.eq.s32.totalorder %v4464_v48, 0  ;;  %vm7128_vm9 = vcmp.eq.s32.totalorder %v4451_v20, 31  ;;  %v5089_v3 = vsel %vm5008_vm0, 1, %v7028_v46 }
 0x268   :  { %7114 = vst [vmem:[#allocation38_spill] sm:$0xff] %v5034_v9  ;;  %vm5052_vm10 = vcmp.eq.s32.totalorder %v7119_v2, 1  ;;  %7125 = vst [vmem:[#allocation40_spill] sm:$0xff] %v7124_v29  ;;  %vm7132_vm4 = vcmp.eq.s32.totalorder %v4443_v8, 31  ;;  %v1803_v16 = vrot.slane %v1780_v23, %v4423_v47  ;;  %v7136_v34 = vrot.slane %v4688_v11, %v4423_v47 }
 0x269   :  { %v7121_v36 = vsel %vm5052_vm10, 4294967295, %v7120_v36  ;;  %v5067_v60 = vpop.permute.xlu0 %3367  ;;  %v5069_v55 = vpop.permute.xlu1 %3362  ;;  %vm5077_vm1 = vmor %vm7128_vm9, %vm7127_vm11  ;;  %7131 = vst [vmem:[#allocation42_spill] sm:$0xff] %v5089_v3  ;;  %vm7133_vm11 = vcmp.eq.s32.totalorder %v4384_v37, 31  ;;  %v5113_v37 = vsel %vm4884_vm5, 1, %v7028_v46  ;;  %v7137_v50 = vmov 0 }
 0x26a   :  { %7122 = vst [vmem:[#allocation39_spill] sm:$0xff] %v7121_v36  ;;  %7126 = vst [vmem:[#allocation41_spill] sm:$0xff] %v5069_v55  ;;  %vm5118_vm2 = vcmp.eq.s32.totalorder %v7136_v34, 1  ;;  %v5132_v54 = vsel %vm5043_vm14, 1, %v7028_v46  ;;  %v5137_v11 = vsel %vm5077_vm1, 1, %v7028_v46  ;;  %vm7142_vm5 = vcmp.eq.s32.totalorder %v4480_v12, 31 }
 0x26b   :  { %vm5097_vm9 = vmor %vm7133_vm11, %vm7132_vm4  ;;  %2538 = vrot.lane.b32.xlu0 %v4429_v5, %s3641_s9  ;;  %2536 = vrot.lane.b32.xlu1 %v4400_v27, %s3641_s9  ;;  %v7138_v50 = vsel %vm5118_vm2, 4294967295, %v7137_v50  ;;  %v5127_v5 = vsel %vm4907_vm6, 1, %v7028_v46  ;;  %7140 = vst [vmem:[#allocation44_spill] sm:$0xff] %v5132_v54  ;;  %v7146_v27 = vunpack.i.l.bf16 %v5067_v60  ;;  %v7147_v9 = vunpack.i.h.bf16 %v4825_v21 }
 0x26c   :  { %7139 = vst [vmem:[#allocation43_spill] sm:$0xff] %v7138_v50  ;;  %7141 = vst [vmem:[#allocation45_spill] sm:$0xff] %v5137_v11  ;;  %v5160_v12 = vsel %vm5097_vm9, 1, %v7028_v46  ;;  %vm7148_vm6 = vcmp.lt.s32.totalorder %v7073_v10, 127  ;;  %vm5168_vm14 = vcmp.eq.s32.totalorder %v1807_v58, 1  ;;  %v7149_v35 = vmov 0 }
 0x26d   :  { %vm5143_vm0 = vmor %vm7142_vm5, %vm6867_vm15  ;;  %v5151_v34 = vpop.permute.xlu0 %3377  ;;  %v5153_v63 = vpop.permute.xlu1 %1759  ;;  %7145 = vst [vmem:[#allocation46_spill] sm:$0xff] %v5160_v12  ;;  %v1562_v26 = vsel %vm7148_vm6, %v7147_v9, %v7146_v27  ;;  %v7150_v35 = vsel %vm5168_vm14, 4294967295, %v7149_v35  ;;  %vm5181_vm1 = vcmp.eq.s32.totalorder %v1803_v16, 1  ;;  %v7152_v27 = vmov 0 }
 0x26e   :  { %7151 = vst [vmem:[#allocation47_spill] sm:$0xff] %v7150_v35  ;;  %v7153_v27 = vsel %vm5181_vm1, 4294967295, %v7152_v27  ;;  %v5198_v16 = vsel %vm5143_vm0, 1, %v7028_v46  ;;  %v7156_v9 = vrot.slane %v4862_v56, %v4423_v47  ;;  %v7157_v58 = vmov 0 }
 0x26f   :  { %2542 = vrot.lane.b32.xlu0 %v4354_v19, %s3641_s9  ;;  %2534 = vrot.lane.b32.xlu1 %v4396_v18, %s3641_s9  ;;  %7154 = vst [vmem:[#allocation48_spill] sm:$0xff] %v7153_v27  ;;  %7155 = vst [vmem:[#allocation49_spill] sm:$0xff] %v5198_v16  ;;  %v7160_v18 = vrot.slane %v4531_v52, %v4423_v47  ;;  %v7161_v3 = vmov 0  ;;  %v1586_v23 = vsel %vm5063_vm12, 0.0, %v1562_v26  ;;  %v7163_v56 = vunpack.i.l.bf16 %v5151_v34 }
 0x270   :  { %vm5203_vm9 = vcmp.eq.s32.totalorder %v7156_v9, 1  ;;  %v7164_v9 = vunpack.i.h.bf16 %v4901_v43  ;;  %vm7165_vm0 = vcmp.lt.s32.totalorder %v7073_v10, 97  ;;  %v7167_v52 = vmov 0 }
 0x271   :  { %v7158_v58 = vsel %vm5203_vm9, 4294967295, %v7157_v58  ;;  %vm5212_vm5 = vcmp.eq.s32.totalorder %v7160_v18, 1  ;;  %v5224_v2 = vpop.permute.xlu0 %1763  ;;  %v5226_v30 = vpop.permute.xlu1 %3372  ;;  %v7166_v18 = vrot.slane %v4955_v15, %v4423_v47  ;;  %v7170_v26 = vrot.slane %v4866_v51, %v4423_v47 }
 0x272   :  { %7159 = vst [vmem:[#allocation50_spill] sm:$0xff] %v7158_v58  ;;  %v7162_v3 = vsel %vm5212_vm5, 4294967295, %v7161_v3  ;;  %v1607_v19 = vsel %vm7165_vm0, %v7164_v9, %v7163_v56  ;;  %v7171_v12 = vmov 0  ;;  %v3374_v43 = vunpack.i.l.bf16 %v5226_v30 }
 0x273   :  { %vm5231_vm6 = vcmp.eq.s32.totalorder %v7166_v18, 1  ;;  %vm5238_vm13 = vcmp.eq.s32.totalorder %v7170_v26, 1  ;;  %v1667_v15 = vsel %vm5052_vm10, 0.0, %v1607_v19  ;;  %2484 = vrot.lane.b32.xlu0 %v4377_v39, %s3637_s30  ;;  %2540 = vrot.lane.b32.xlu1 %v4609_v28, %s3641_s9  ;;  %v7174_v51 = vrot.slane %v4925_v6, %v4423_v47 }
 0x274   :  { %v7168_v52 = vsel %vm5231_vm6, 4294967295, %v7167_v52  ;;  %v7172_v12 = vsel %vm5238_vm13, 4294967295, %v7171_v12  ;;  %v7175_v26 = vmov 0  ;;  %v1893_v19 = vrot.slane %v1586_v23, 4 }
 0x275   :  { %7169 = vst [vmem:[#allocation51_spill] sm:$0xff] %v7168_v52  ;;  %7173 = vst [vmem:[#allocation52_spill] sm:$0xff] %v7172_v12  ;;  %vm5258_vm7 = vcmp.eq.s32.totalorder %v7174_v51, 1  ;;  %v7178_v11 = vunpack.i.h.bf16 %v4822_v59  ;;  %vm7179_vm11 = vcmp.lt.s32.totalorder %v7073_v10, 96  ;;  %vm7180_vm0 = vcmp.eq.s32.totalorder %v4457_v31, 31  ;;  %v5286_v56 = vpop.permute.xlu0 %1765  ;;  %v1762_v31 = vpop.permute.xlu1 %1761 }
 0x276   :  { %v7176_v26 = vsel %vm5258_vm7, 4294967295, %v7175_v26  ;;  %vm5272_vm10 = vmor %vm7180_vm0, %vm7132_vm4  ;;  %v7183_v51 = vunpack.i.h.bf16 %v4899_v38  ;;  %v7184_v23 = vunpack.i.l.bf16 %v4899_v38  ;;  %vm7185_vm15 = vcmp.lt.s32.totalorder %v7073_v10, 32 }
 0x277   :  { %7177 = vst [vmem:[#allocation53_spill] sm:$0xff] %v7176_v26  ;;  %v1688_v18 = vsel %vm7179_vm11, %v7178_v11, %v3374_v43  ;;  %v7186_v36 = vunpack.i.h.bf16 %v4976_v41  ;;  %v7187_v21 = vunpack.i.l.bf16 %v4976_v41  ;;  %vm7188_vm4 = vcmp.lt.s32.totalorder %v7073_v10, 1  ;;  %2546 = vrot.lane.b32.xlu0 %v4360_v22, %s3641_s9  ;;  %2516 = vrot.lane.b32.xlu1 %v4377_v39, %s3634_s1 }
 0x278   :  { %v1355_v54 = vsel %vm7185_vm15, %v7184_v23, %v7183_v51  ;;  %v1748_v11 = vsel %vm5118_vm2, 0.0, %v1688_v18  ;;  %vm7189_vm15 = vcmp.lt.s32.totalorder %v7073_v10, 95  ;;  %vm7191_vm11 = vcmp.eq.s32.totalorder %v4464_v48, 31 }
 0x279   :  { %v1517_v29 = vsel %vm7188_vm4, %v7187_v21, %v7186_v36  ;;  %v1917_v51 = vrot.slane %v1748_v11, 4  ;;  %v5298_v23 = vsel %vm7189_vm15, %v1762_v31, %v5224_v2  ;;  %vm7192_vm0 = vcmp.eq.s32.totalorder %v4451_v20, 31  ;;  %v5364_v22 = vpop.permute.xlu1 %3387 }
 0x27a   :  { %7190 = vst [vmem:[#allocation54_spill] sm:$0xff] %v5298_v23  ;;  %vm5304_vm8 = vmor %vm7192_vm0, %vm7191_vm11  ;;  %v7195_v28 = vrot.slane %v4985_v45, %v4423_v47  ;;  %v7196_v9 = vmov 0  ;;  %v7199_v21 = vunpack.i.h.bf16 %v5067_v60  ;;  %v7200_v36 = vunpack.i.l.bf16 %v5067_v60  ;;  %v5362_v45 = vpop.permute.xlu0 %3382 }
 0x27b   :  { %vm7201_vm4 = vcmp.lt.s32.totalorder %v7073_v10, 127  ;;  %v7202_v20 = vunpack.i.h.bf16 %v5069_v55  ;;  %v7203_v11 = vunpack.i.l.bf16 %v5069_v55  ;;  %vm7204_vm15 = vcmp.lt.s32.totalorder %v7073_v10, 31  ;;  %2544 = vrot.lane.b32.xlu1 %v4346_v7, %s3641_s9 }
 0x27c   :  { %vm5311_vm2 = vcmp.eq.s32.totalorder %v7195_v28, 1  ;;  %v1561_v48 = vsel %vm7201_vm4, %v7200_v36, %v7199_v21  ;;  %vm7205_vm11 = vcmp.lt.s32.totalorder %v7073_v10, 95  ;;  %vm7207_vm0 = vcmp.eq.s32.totalorder %v4443_v8, 31 }
 0x27d   :  { %v7197_v9 = vsel %vm5311_vm2, 4294967295, %v7196_v9  ;;  %v1436_v50 = vsel %vm7204_vm15, %v7203_v11, %v7202_v20  ;;  %v5330_v28 = vsel %vm7205_vm11, %v5153_v63, %v1762_v31  ;;  %vm7208_vm4 = vcmp.eq.s32.totalorder %v4854_v40, 31  ;;  %v5452_v7 = vpop.permute.xlu1 %3397 }
 0x27e   :  { %7198 = vst [vmem:[#allocation55_spill] sm:$0xff] %v7197_v9  ;;  %7206 = vst [vmem:[#allocation56_spill] sm:$0xff] %v5330_v28  ;;  %v7211_v31 = vunpack.i.h.bf16 %v5226_v30  ;;  %vm7212_vm11 = vcmp.lt.s32.totalorder %v7073_v10, 96  ;;  %vm7213_vm14 = vcmask 1043456   ;;  %v1416_v6 = vsel %vm5203_vm9, 0.0, %v1355_v54  ;;  %v5450_v27 = vpop.permute.xlu0 %3392 }
 0x27f   :  { %vm5343_vm15 = vmor %vm7208_vm4, %vm7207_vm0  ;;  %v5356_v11 = vsel %vm7213_vm14, %v4262_v4, %v1893_v19  ;;  %v7218_v19 = vmov 0  ;;  %v7222_v20 = vunpack.i.l.bf16 %v4974_v1  ;;  %v1542_v4 = vsel %vm5212_vm5, 0.0, %v1517_v29  ;;  %2548 = vrot.lane.b32.xlu1 %v4377_v39, %s3641_s9 }
 0x280   :  { %v1687_v36 = vsel %vm7212_vm11, %v3374_v43, %v7211_v31  ;;  %7214 = vst [vmem:[#allocation57_spill] sm:$0xff] %v5356_v11  ;;  %vm7215_vm12 = vmmov %vm7213_vm14  ;;  %v5369_v43 = vsel %vm5272_vm10, 1, %v7028_v46  ;;  %v5374_v31 = vsel %vm5304_vm8, 1, %v7028_v46  ;;  %vm7223_vm8 = vcmp.lt.s32.totalorder %v7073_v10, 33 }
 0x281   :  { %v5359_v8 = vsel %vm7215_vm12, %v1667_v15, %v1917_v51  ;;  %v7217_v15 = vrot.slane %v4434_v62, %v4423_v47  ;;  %v7221_v51 = vunpack.i.h.bf16 %v4974_v1  ;;  %v7224_v62 = vrot.slane %v4491_v14, %v4423_v47  ;;  %v5511_v9 = vpop.permute.xlu1 %3407 }
 0x282   :  { %7216 = vst [vmem:[#allocation58_spill] sm:$0xff] %v5359_v8  ;;  %v7227_v40 = vrot.slane %v4567_v32, %v4423_v47  ;;  %v7228_v28 = vmov 0  ;;  %v1587_v29 = vsel %vm4811_vm3, 0.0, %v1561_v48  ;;  %v1497_v14 = vsel %vm5231_vm6, 0.0, %v1436_v50  ;;  %v5509_v39 = vpop.permute.xlu0 %3402 }
 0x283   :  { %vm5381_vm12 = vcmp.eq.s32.totalorder %v7217_v15, 1  ;;  %v1274_v18 = vsel %vm7223_vm8, %v7222_v20, %v7221_v51  ;;  %vm5398_vm10 = vcmp.eq.s32.totalorder %v7224_v62, 1  ;;  %v7225_v15 = vmov 0 }
 0x284   :  { %v7219_v19 = vsel %vm5381_vm12, 4294967295, %v7218_v19  ;;  %v7226_v15 = vsel %vm5398_vm10, 4294967295, %v7225_v15  ;;  %vm5407_vm14 = vcmp.eq.s32.totalorder %v7227_v40, 1  ;;  %v1749_v20 = vsel %vm5238_vm13, 0.0, %v1687_v36 }
 0x285   :  { %7220 = vst [vmem:[#allocation59_spill] sm:$0xff] %v7219_v19  ;;  %v7229_v28 = vsel %vm5407_vm14, 4294967295, %v7228_v28  ;;  %v7231_v51 = vrot.slane %v5000_v0, %v4423_v47  ;;  %v7232_v62 = vmov 0  ;;  %v5429_v32 = vsel %vm5343_vm15, 1, %v7028_v46 }
 0x286   :  { %7230 = vst [vmem:[#allocation60_spill] sm:$0xff] %v7229_v28  ;;  %v7235_v50 = vrot.slane %v5029_v57, %v4423_v47  ;;  %v7236_v48 = vmov 0  ;;  %v3385_v0 = vunpack.i.h.bf16 %v5362_v45  ;;  %v3384_v36 = vunpack.i.l.bf16 %v5362_v45  ;;  %v5549_v26 = vpop.permute.xlu0 %3417 }
 0x287   :  { %vm5420_vm0 = vcmp.eq.s32.totalorder %v7231_v51, 1  ;;  %v3390_v40 = vunpack.i.h.bf16 %v5364_v22  ;;  %v3389_v51 = vunpack.i.l.bf16 %v5364_v22  ;;  %v1846_v54 = vrot.slane %v1416_v6, 4 }
 0x288   :  { %v7233_v62 = vsel %vm5420_vm0, 4294967295, %v7232_v62  ;;  %vm5434_vm4 = vcmp.eq.s32.totalorder %v7235_v50, 1  ;;  %v1335_v46 = vsel %vm5258_vm7, 0.0, %v1274_v18  ;;  %v1870_v21 = vrot.slane %v1542_v4, 4 }
 0x289   :  { %7234 = vst [vmem:[#allocation61_spill] sm:$0xff] %v7233_v62  ;;  %v7237_v48 = vsel %vm5434_vm4, 4294967295, %v7236_v48  ;;  %v7239_v12 = vunpack.i.h.bf16 %v5151_v34  ;;  %v7240_v57 = vunpack.i.l.bf16 %v5151_v34  ;;  %vm7241_vm15 = vcmp.lt.s32.totalorder %v7073_v10, 97 }
 0x28a   :  { %7238 = vst [vmem:[#allocation62_spill] sm:$0xff] %v7237_v48  ;;  %v1894_v45 = vrot.slane %v1587_v29, 4  ;;  %v1918_v52 = vrot.slane %v1749_v20, 4  ;;  %v6896_v22 = vunpack.i.h.bf16 %v5450_v27  ;;  %v3394_v6 = vunpack.i.l.bf16 %v5450_v27 }
 0x28b   :  { %v1606_v50 = vsel %vm7241_vm15, %v7240_v57, %v7239_v12  ;;  %v7242_v4 = vrot.slane %v4747_v24, %v4423_v47  ;;  %v7243_v18 = vmov 0  ;;  %vm7246_vm8 = vcmask 1043456  }
 0x28c   :  { %v5466_v12 = vsel %vm7246_vm8, %v1497_v14, %v1870_v21  ;;  %v7247_v24 = vrot.slane %v4507_v13, %v4423_v47  ;;  %v1668_v14 = vsel %vm5311_vm2, 0.0, %v1606_v50  ;;  %vm7251_vm8 = vcmp.lt.s32.totalorder %v7073_v10, 32 }
 0x28d   :  { %vm5459_vm11 = vcmp.eq.s32.totalorder %v7242_v4, 1  ;;  %v7248_v4 = vmov 0  ;;  %v1360_v21 = vsel %vm7251_vm8, %v3384_v36, %v3385_v0  ;;  %vm7252_vm13 = vcmp.lt.s32.totalorder %v7073_v10, 1 }
 0x28e   :  { %v7244_v18 = vsel %vm5459_vm11, 4294967295, %v7243_v18  ;;  %vm5477_vm15 = vcmp.eq.s32.totalorder %v7247_v24, 1  ;;  %v1522_v29 = vsel %vm7252_vm13, %v3389_v51, %v3390_v40  ;;  %v7253_v20 = vrot.slane %v4800_v53, %v4423_v47  ;;  %vm7260_vm13 = vmmov %vm7251_vm8 }
 0x28f   :  { %7245 = vst [vmem:[#allocation63_spill] sm:$0xff] %v7244_v18  ;;  %v7249_v4 = vsel %vm5477_vm15, 4294967295, %v7248_v4  ;;  %v7254_v57 = vmov 0  ;;  %vm7257_vm6 = vcmask 1043456   ;;  %vm7258_vm2 = vcmp.lt.s32.totalorder %v7073_v10, 95 }
 0x290   :  { %7250 = vst [vmem:[#allocation64_spill] sm:$0xff] %v7249_v4  ;;  %vm5490_vm1 = vcmp.eq.s32.totalorder %v7253_v20, 1  ;;  %v5495_v13 = vsel %vm7257_vm6, %v1335_v46, %v1846_v54  ;;  %v5501_v50 = vsel %vm7258_vm2, %v5224_v2, %v5286_v56  ;;  %v1359_v24 = vsel %vm7260_vm13, %v3385_v0, %v6896_v22  ;;  %vm7262_vm6 = vmmov %vm7251_vm8  ;;  %v7312_v4 = vld [vmem:[#allocation11_spill] sm:$0xff] }
 0x291   :  { %v7255_v57 = vsel %vm5490_vm1, 4294967295, %v7254_v57  ;;  %7259 = vst [vmem:[#allocation66_spill] sm:$0xff] %v5501_v50  ;;  %v3399_v20 = vunpack.i.l.bf16 %v5452_v7  ;;  %v7261_v54 = vunpack.i.h.bf16 %v4899_v38  ;;  %vm7263_vm2 = vcmask 1043456  }
 0x292   :  { %7256 = vst [vmem:[#allocation65_spill] sm:$0xff] %v7255_v57  ;;  %v5521_v23 = vsel %vm7263_vm2, %v4268_v61, %v1894_v45  ;;  %vm7265_vm8 = vmmov %vm7263_vm2  ;;  %v3404_v53 = vunpack.i.l.bf16 %v5509_v39  ;;  %v1411_v35 = vsel %vm5381_vm12, 0.0, %v1360_v21  ;;  %v1412_v61 = vsel %vm5407_vm14, 0.0, %v1359_v24  ;;  %v5551_v24 = vpop.permute.xlu1 %3412  ;;  %v7308_v57 = vld [vmem:[#allocation32_spill] sm:$0xff] }
 0x293   :  { %v1354_v46 = vsel %vm7262_vm6, %v7261_v54, %v3394_v6  ;;  %7264 = vst [vmem:[#allocation67_spill] sm:$0xff] %v5521_v23  ;;  %v5524_v0 = vsel %vm7265_vm8, %v1668_v14, %v1918_v52  ;;  %v1537_v54 = vsel %vm5398_vm10, 0.0, %v1522_v29  ;;  %v3410_v52 = vunpack.i.h.bf16 %v5511_v9 }
 0x294   :  { %v3409_v45 = vunpack.i.l.bf16 %v5511_v9  ;;  %v1417_v14 = vsel %vm5434_vm4, 0.0, %v1354_v46  ;;  %v7266_v22 = vunpack.i.h.bf16 %v4976_v41  ;;  %vm7267_vm13 = vcmp.lt.s32.totalorder %v7073_v10, 1 }
 0x295   :  { %v7268_v29 = vunpack.i.h.bf16 %v5452_v7  ;;  %vm7269_vm6 = vmmov %vm7267_vm13  ;;  %v7270_v28 = vunpack.i.h.bf16 %v5509_v39  ;;  %vm7271_vm2 = vcmp.lt.s32.totalorder %v7073_v10, 33  ;;  %vm7272_vm8 = vcmp.lt.s32.totalorder %v7073_v10, 32 }
 0x296   :  { %v1516_v21 = vsel %vm7267_vm13, %v7266_v22, %v3399_v20  ;;  %v1361_v46 = vsel %vm7272_vm8, %v3394_v6, %v3384_v36  ;;  %v1841_v48 = vrot.slane %v1411_v35, 4  ;;  %v1865_v19 = vrot.slane %v1537_v54, 4 }
 0x297   :  { %v1521_v2 = vsel %vm7269_vm6, %v3390_v40, %v7268_v29  ;;  %v1279_v9 = vsel %vm7271_vm2, %v3404_v53, %v7270_v28  ;;  %v7273_v22 = vrot.slane %v5113_v37, %v4423_v47  ;;  %v7274_v11 = vmov 0  ;;  %v3428_v40 = vpop.permute.xlu0 %3427 }
 0x298   :  { %v5568_v29 = vrot.slane %v1412_v61, 4  ;;  %v1523_v28 = vsel %vm7269_vm6, %v3399_v20, %v3389_v51  ;;  %v1330_v36 = vsel %vm5459_vm11, 0.0, %v1279_v9  ;;  %vm7278_vm2 = vcmp.lt.s32.totalorder %v7073_v10, 31 }
 0x299   :  { %vm5562_vm13 = vcmp.eq.s32.totalorder %v7273_v22, 1  ;;  %v1441_v35 = vsel %vm7278_vm2, %v3409_v45, %v3410_v52  ;;  %v7279_v37 = vrot.slane %v5127_v5, %v4423_v47  ;;  %v7280_v6 = vmov 0 }
 0x29a   :  { %v7275_v11 = vsel %vm5562_vm13, 4294967295, %v7274_v11  ;;  %7277 = vst [vmem:[#allocation69_spill] sm:$0xff] %v5568_v29  ;;  %v7283_v54 = vrot.slane %v4439_v49, %v4423_v47  ;;  %v7284_v61 = vmov 0  ;;  %v7287_v51 = vrot.slane %v4562_v25, %v4423_v47  ;;  %v7295_v25 = vld [vmem:[#allocation33_spill] sm:$0xff] }
 0x29b   :  { %7276 = vst [vmem:[#allocation68_spill] sm:$0xff] %v7275_v11  ;;  %vm5579_vm8 = vcmp.eq.s32.totalorder %v7279_v37, 1  ;;  %v7288_v20 = vmov 0  ;;  %v5597_v9 = vrot.slane %v1417_v14, 4  ;;  %v1538_v5 = vsel %vm5212_vm5, 0.0, %v1521_v2 }
 0x29c   :  { %v7281_v6 = vsel %vm5579_vm8, 4294967295, %v7280_v6  ;;  %vm5586_vm4 = vcmp.eq.s32.totalorder %v7283_v54, 1  ;;  %vm5593_vm6 = vcmp.eq.s32.totalorder %v7287_v51, 1  ;;  %v1543_v22 = vsel %vm5398_vm10, 0.0, %v1516_v21  ;;  %v5619_v21 = vpop.permute.xlu1 %3422 }
 0x29d   :  { %7282 = vst [vmem:[#allocation70_spill] sm:$0xff] %v7281_v6  ;;  %v7285_v61 = vsel %vm5586_vm4, 4294967295, %v7284_v61  ;;  %v7289_v20 = vsel %vm5593_vm6, 4294967295, %v7288_v20  ;;  %v3414_v49 = vunpack.i.l.bf16 %v5551_v24  ;;  %v7291_v37 = vrot.slane %v4526_v42, %v4423_v47  ;;  %v7339_v6 = vld [vmem:[#allocation40_spill] sm:$0xff] }
 0x29e   :  { %7286 = vst [vmem:[#allocation71_spill] sm:$0xff] %v7285_v61  ;;  %7290 = vst [vmem:[#allocation72_spill] sm:$0xff] %v7289_v20  ;;  %v7292_v54 = vmov 0  ;;  %v7296_v51 = vrot.slane %v7295_v25, %v4423_v47  ;;  %v3419_v2 = vunpack.i.l.bf16 %v5549_v26  ;;  %v1492_v18 = vsel %vm5490_vm1, 0.0, %v1441_v35  ;;  %v7345_v61 = vld [vmem:[#allocation35_spill] sm:$0xff] }
 0x29f   :  { %vm5607_vm2 = vcmp.eq.s32.totalorder %v7291_v37, 1  ;;  %vm7299_vm14 = vcmask 1043456   ;;  %v1410_v37 = vsel %vm5477_vm15, 0.0, %v1361_v46  ;;  %v7300_v25 = vrot.slane %v5061_v33, %v4423_v47 }
 0x2a0   :  { %v7293_v54 = vsel %vm5607_vm2, 4294967295, %v7292_v54  ;;  %vm5614_vm11 = vcmp.eq.s32.totalorder %v7296_v51, 1  ;;  %v1930_v42 = vsel %vm7299_vm14, %v1330_v36, %v1841_v48  ;;  %v7301_v51 = vmov 0 }
 0x2a1   :  { %7294 = vst [vmem:[#allocation73_spill] sm:$0xff] %v7293_v54  ;;  %vm5629_vm7 = vcmp.eq.s32.totalorder %v7300_v25, 1  ;;  %v7304_v8 = vrot.slane %v5084_v44, %v4423_v47  ;;  %v7305_v58 = vmov 0  ;;  %v3430_v48 = vunpack.i.h.bf16 %v3428_v40 }
 0x2a2   :  { %v7302_v51 = vsel %vm5629_vm7, 4294967295, %v7301_v51  ;;  %v3429_v36 = vunpack.i.l.bf16 %v3428_v40  ;;  %v1536_v46 = vsel %vm5212_vm5, 0.0, %v1523_v28  ;;  %v7309_v33 = vrot.slane %v7308_v57, %v4423_v47  ;;  %v7318_v57 = vld [vmem:[#allocation38_spill] sm:$0xff] }
 0x2a3   :  { %7303 = vst [vmem:[#allocation33_spill] sm:$0xff] %v7302_v51  ;;  %vm5636_vm12 = vcmp.eq.s32.totalorder %v7304_v8, 1  ;;  %v7310_v25 = vmov 0  ;;  %v7313_v44 = vrot.slane %v7312_v4, %v4423_v47  ;;  %v7314_v8 = vmov 0 }
 0x2a4   :  { %v7306_v58 = vsel %vm5636_vm12, 4294967295, %v7305_v58  ;;  %vm5646_vm14 = vcmp.eq.s32.totalorder %v7309_v33, 1  ;;  %v3425_v40 = vunpack.i.h.bf16 %v5619_v21  ;;  %v3424_v28 = vunpack.i.l.bf16 %v5619_v21 }
 0x2a5   :  { %7307 = vst [vmem:[#allocation74_spill] sm:$0xff] %v7306_v58  ;;  %v7311_v25 = vsel %vm5646_vm14, 4294967295, %v7310_v25  ;;  %vm5653_vm1 = vcmp.eq.s32.totalorder %v7313_v44, 1  ;;  %vm7317_vm15 = vcmask 1043456   ;;  %v7319_v33 = vrot.slane %v7318_v57, %v4423_v47 }
 0x2a6   :  { %v7315_v8 = vsel %vm5653_vm1, 4294967295, %v7314_v8  ;;  %v1938_v50 = vsel %vm7317_vm15, %v1492_v18, %v1865_v19  ;;  %v7320_v62 = vmov 0  ;;  %v5668_v4 = vrot.slane %v1538_v5, 4  ;;  %v3438_v19 = vpop.permute.xlu0 %3437  ;;  %v3433_v18 = vpop.permute.xlu1 %3432 }
 0x2a7   :  { %7316 = vst [vmem:[#allocation32_spill] sm:$0xff] %v7315_v8  ;;  %vm5664_vm9 = vcmp.eq.s32.totalorder %v7319_v33, 1  ;;  %v1871_v44 = vrot.slane %v1543_v22, 4  ;;  %v3252_v29 = vpack.c.bf16 %v1938_v50, %v1930_v42  ;;  %vm7323_vm0 = vcmp.lt.s32.totalorder %v7073_v10, 33 }
 0x2a8   :  { %v7321_v62 = vsel %vm5664_vm9, 4294967295, %v7320_v62  ;;  %v1280_v35 = vsel %vm7323_vm0, %v3414_v49, %v3404_v53  ;;  %v7324_v16 = vunpack.i.h.bf16 %v5069_v55  ;;  %vm7325_vm5 = vcmp.lt.s32.totalorder %v7073_v10, 31 }
 0x2a9   :  { %7322 = vst [vmem:[#allocation11_spill] sm:$0xff] %v7321_v62  ;;  %vm7326_vm15 = vmmov %vm7325_vm5  ;;  %v1840_v33 = vrot.slane %v1410_v37, 4  ;;  %v1864_v23 = vrot.slane %v1536_v46, 4  ;;  %v7327_v5 = vunpack.i.h.bf16 %v5549_v26  ;;  %vm7329_vm0 = vcmp.lt.s32.totalorder %v7073_v10, 96  ;;  %3253 = vmatprep.subr.bf16.mxu1 %v3252_v29 }
 0x2aa   :  { %v1435_v21 = vsel %vm7325_vm5, %v7324_v16, %v3419_v2  ;;  %v1442_v57 = vsel %vm7326_vm15, %v3419_v2, %v3409_v45  ;;  %vm7328_vm10 = vmmov %vm7325_vm5  ;;  %v1692_v53 = vsel %vm7329_vm0, %v3429_v36, %v3430_v48  ;;  %v3440_v22 = vunpack.i.h.bf16 %v3438_v19 }
 0x2ab   :  { %v5682_v50 = vsel %vm7328_vm10, %v3410_v52, %v7327_v5  ;;  %v3439_v42 = vunpack.i.l.bf16 %v3438_v19  ;;  %v7330_v16 = vunpack.i.h.bf16 %v5551_v24  ;;  %v7331_v55 = vunpack.i.h.bf16 %v5509_v39  ;;  %vm7337_vm3 = vmmov %vm7329_vm0 }
 0x2ac   :  { %vm7332_vm5 = vcmp.lt.s32.totalorder %v7073_v10, 33  ;;  %v7333_v2 = vunpack.i.h.bf16 %v4974_v1  ;;  %vm7335_vm10 = vcmp.lt.s32.totalorder %v7073_v10, 127  ;;  %v1329_v29 = vsel %vm5562_vm13, 0.0, %v1280_v35 }
 0x2ad   :  { %v5692_v45 = vsel %vm7332_vm5, %v7331_v55, %v7330_v16  ;;  %vm7334_vm15 = vmmov %vm7332_vm5  ;;  %v1566_v37 = vsel %vm7335_vm10, %v3424_v28, %v3425_v40  ;;  %v7336_v46 = vunpack.i.l.bf16 %v4822_v59  ;;  %v1693_v55 = vsel %vm7337_vm3, %v3439_v42, %v3429_v36 }
 0x2ae   :  { %v1273_v52 = vsel %vm7334_vm15, %v7333_v2, %v3414_v49  ;;  %v3434_v19 = vunpack.i.l.bf16 %v3433_v18  ;;  %v1491_v5 = vsel %vm5579_vm8, 0.0, %v1442_v57  ;;  %v1744_v49 = vsel %vm5586_vm4, 0.0, %v1692_v53  ;;  %vm7338_vm5 = vmmov %vm7329_vm0  ;;  %v5716_v2 = vpop.permute.xlu0 %3442 }
 0x2af   :  { %v1690_v39 = vsel %vm7329_vm0, %v3440_v22, %v7336_v46  ;;  %v1691_v16 = vsel %vm7338_vm5, %v3430_v48, %v3440_v22  ;;  %v3435_v59 = vunpack.i.h.bf16 %v3433_v18  ;;  %v5718_v46 = vpop.permute.xlu1 %3447  ;;  %vm7340_vm3 = vnez %v7339_v6  ;;  %vm7342_vm15 = vmmov %vm7329_vm0 }
 0x2b0   :  { %v1746_v35 = vsel %vm5593_vm6, 0.0, %v1690_v39  ;;  %v1582_v57 = vsel %vm7340_vm3, 0.0, %v1566_v37  ;;  %v7341_v53 = vunpack.i.h.bf16 %v5226_v30  ;;  %v1743_v22 = vsel %vm5607_vm2, 0.0, %v1693_v55 }
 0x2b1   :  { %vm7343_vm10 = vcmask 1043456   ;;  %v1336_v20 = vsel %vm5629_vm7, 0.0, %v1273_v52  ;;  %v1498_v36 = vsel %vm5636_vm12, 0.0, %v1435_v21  ;;  %v7346_v37 = vrot.slane %v7345_v61, %v4423_v47 }
 0x2b2   :  { %v1694_v48 = vsel %vm7342_vm15, %v7341_v53, %v3439_v42  ;;  %v1929_v18 = vsel %vm7343_vm10, %v1329_v29, %v1840_v33  ;;  %vm7344_vm0 = vmmov %vm7343_vm10  ;;  %v7347_v30 = vmov 0  ;;  %v7350_v42 = vld [vmem:[#allocation36_spill] sm:$0xff]  ;;  %v7352_v33 = vmov 0  ;;  %v7356_v29 = vld [vmem:[#allocation6_spill] sm:$0xff] }
 0x2b3   :  { %v1937_v39 = vsel %vm7344_vm0, %v1491_v5, %v1864_v23  ;;  %vm5740_vm5 = vcmp.eq.s32.totalorder %v7346_v37, 1  ;;  %v7351_v55 = vrot.slane %v7350_v42, %v4423_v47  ;;  %v5754_v52 = vrot.slane %v1744_v49, 4  ;;  %v5777_v58 = vpop.permute.xlu1 %3457 }
 0x2b4   :  { %v7348_v30 = vsel %vm5740_vm5, 4294967295, %v7347_v30  ;;  %v1745_v61 = vsel %vm5653_vm1, 0.0, %v1691_v16  ;;  %vm7355_vm10 = vcmp.lt.s32.totalorder %v7073_v10, 127  ;;  %v7357_v5 = vrot.slane %v7356_v29, %v4423_v47  ;;  %v7364_v29 = vld [vmem:[#allocation34_spill] sm:$0xff] }
 0x2b5   :  { %7349 = vst [vmem:[#allocation38_spill] sm:$0xff] %v7348_v30  ;;  %vm5747_vm15 = vcmp.eq.s32.totalorder %v7351_v55, 1  ;;  %v1567_v21 = vsel %vm7355_vm10, %v3434_v19, %v3424_v28  ;;  %v7358_v53 = vmov 0  ;;  %v5767_v37 = vrot.slane %v1582_v57, 4  ;;  %v7361_v55 = vld [vmem:[#allocation8_spill] sm:$0xff]  ;;  %vm7363_vm12 = vmmov %vm7355_vm10  ;;  %v3453_v28 = vpop.permute.xlu0 %3452  ;;  %v7428_v30 = vld [vmem:[#allocation10_spill] sm:$0xff] }
 0x2b6   :  { %v7353_v33 = vsel %vm5747_vm15, 4294967295, %v7352_v33  ;;  %vm5763_vm0 = vcmp.eq.s32.totalorder %v7357_v5, 1  ;;  %v1750_v42 = vsel %vm5664_vm9, 0.0, %v1694_v48  ;;  %v5771_v49 = vrot.slane %v1743_v22, 4  ;;  %vm7368_vm7 = vmmov %vm7363_vm12 }
 0x2b7   :  { %7354 = vst [vmem:[#allocation35_spill] sm:$0xff] %v7353_v33  ;;  %v7359_v53 = vsel %vm5763_vm0, 4294967295, %v7358_v53  ;;  %v7362_v23 = vunpack.i.l.bf16 %v7361_v55  ;;  %v7365_v5 = vrot.slane %v7364_v29, %v4423_v47  ;;  %v7366_v51 = vmov 0  ;;  %vm7377_vm1 = vmmov %vm7368_vm7 }
 0x2b8   :  { %7360 = vst [vmem:[#allocation36_spill] sm:$0xff] %v7359_v53  ;;  %v1565_v57 = vsel %vm7368_vm7, %v3425_v40, %v3435_v59  ;;  %v3254_v48 = vpack.c.bf16 %v1937_v39, %v1929_v18  ;;  %vm7369_vm9 = vcmask 1043456   ;;  %v7373_v8 = vmov 0 }
 0x2b9   :  { %v1564_v16 = vsel %vm7363_vm12, %v3435_v59, %v7362_v23  ;;  %vm5782_vm10 = vcmp.eq.s32.totalorder %v7365_v5, 1  ;;  %v1936_v22 = vsel %vm7369_vm9, %v1336_v20, %v5597_v9  ;;  %vm7370_vm6 = vmmov %vm7369_vm9  ;;  %v7371_v23 = vld [vmem:[#allocation42_spill] sm:$0xff]  ;;  %v5798_v29 = vrot.slane %v1745_v61, 4  ;;  %v7379_v9 = vld [vmem:[#allocation44_spill] sm:$0xff] }
 0x2ba   :  { %v7367_v51 = vsel %vm5782_vm10, 4294967295, %v7366_v51  ;;  %v1944_v55 = vsel %vm7370_vm6, %v1498_v36, %v1871_v44  ;;  %v7372_v62 = vrot.slane %v7371_v23, %v4423_v47  ;;  %v7376_v5 = vunpack.i.h.bf16 %v5067_v60  ;;  %3255 = vmatpush1.bf16.msra.mxu1 %v3254_v48  ;;  %v5823_v48 = vpop.permute.xlu1 %3467 }
 0x2bb   :  { %vm7378_vm7 = vnez %v7070_v17  ;;  %v3276_v20 = vpack.c.bf16 %v1944_v55, %v1936_v22  ;;  %v7380_v44 = vrot.slane %v7379_v9, %v4423_v47  ;;  %v7381_v36 = vmov 0  ;;  %v5821_v55 = vpop.permute.xlu0 %3462 }
 0x2bc   :  { %vm5794_vm12 = vcmp.eq.s32.totalorder %v7372_v62, 1  ;;  %v1568_v40 = vsel %vm7377_vm1, %v7376_v5, %v3434_v19  ;;  %v1581_v59 = vsel %vm7378_vm7, 0.0, %v1567_v21  ;;  %v3445_v62 = vunpack.i.h.bf16 %v5716_v2  ;;  %v7388_v5 = vld [vmem:[#allocation45_spill] sm:$0xff] }
 0x2bd   :  { %v7374_v8 = vsel %vm5794_vm12, 4294967295, %v7373_v8  ;;  %vm5809_vm9 = vcmp.eq.s32.totalorder %v7380_v44, 1  ;;  %v3450_v18 = vunpack.i.h.bf16 %v5718_v46  ;;  %v3455_v60 = vunpack.i.h.bf16 %v3453_v28  ;;  %3277 = vmatprep.subr.bf16.mxu0 %v3276_v20 }
 0x2be   :  { %7375 = vst [vmem:[#allocation6_spill] sm:$0xff] %v7374_v8  ;;  %v7382_v36 = vsel %vm5809_vm9, 4294967295, %v7381_v36  ;;  %v3454_v39 = vunpack.i.l.bf16 %v3453_v28  ;;  %v1583_v19 = vsel %vm7378_vm7, 0.0, %v1565_v57  ;;  %v1584_v61 = vsel %vm7340_vm3, 0.0, %v1564_v16 }
 0x2bf   :  { %7383 = vst [vmem:[#allocation8_spill] sm:$0xff] %v7382_v36  ;;  %v3444_v21 = vunpack.i.l.bf16 %v5716_v2  ;;  %v3449_v22 = vunpack.i.l.bf16 %v5718_v46  ;;  %v5825_v23 = vrot.slane %v1746_v35, 4  ;;  %v7384_v28 = vpack.c.bf16 %v5466_v12, %v5495_v13 }
 0x2c0   :  { %v7385_v57 = vunpack.i.l.bf16 %v4899_v38  ;;  %vm7386_vm1 = vcmp.lt.s32.totalorder %v7073_v10, 32  ;;  %v3459_v46 = vunpack.i.l.bf16 %v5777_v58  ;;  %v7389_v20 = vrot.slane %v7388_v5, %v4423_v47 }
 0x2c1   :  { %3279 = vmatpush1.bf16.msra.mxu0 %v7384_v28  ;;  %vm7387_vm6 = vmmov %vm7386_vm1  ;;  %v7390_v35 = vmov 0  ;;  %v1919_v9 = vrot.slane %v1750_v42, 4  ;;  %v1588_v12 = vsel %vm7340_vm3, 0.0, %v1568_v40  ;;  %v7392_v38 = vunpack.i.h.bf16 %v5450_v27  ;;  %v7394_v42 = vld [vmem:[#allocation46_spill] sm:$0xff] }
 0x2c2   :  { %v1356_v16 = vsel %vm7386_vm1, %v3455_v60, %v7385_v57  ;;  %v1357_v2 = vsel %vm7387_vm6, %v3454_v39, %v3455_v60  ;;  %vm5840_vm2 = vcmp.eq.s32.totalorder %v7389_v20, 1  ;;  %v3460_v44 = vunpack.i.h.bf16 %v5777_v58 }
 0x2c3   :  { %v7391_v35 = vsel %vm5840_vm2, 4294967295, %v7390_v35  ;;  %v1358_v13 = vsel %vm7386_vm1, %v7392_v38, %v3454_v39  ;;  %v1888_v60 = vrot.slane %v1581_v59, 4  ;;  %v5851_v28 = vrot.slane %v1583_v19, 4  ;;  %v1754_v38 = vpop.permute.xlu1 %1753 }
 0x2c4   :  { %v5853_v57 = vrot.slane %v1584_v61, 4  ;;  %vm7393_vm6 = vcmp.lt.s32.totalorder %v7073_v10, 97  ;;  %v7395_v20 = vrot.slane %v7394_v42, %v4423_v47  ;;  %v7396_v40 = vmov 0  ;;  %v5876_v61 = vpop.permute.xlu0 %1755 }
 0x2c5   :  { %v5857_v5 = vsel %vm7393_vm6, %v3445_v62, %v3450_v18  ;;  %vm7398_vm1 = vmmov %vm7393_vm6  ;;  %v7399_v58 = vunpack.i.h.bf16 %v5151_v34  ;;  %v1414_v39 = vsel %vm5747_vm15, 0.0, %v1357_v2  ;;  %v1415_v19 = vsel %vm5740_vm5, 0.0, %v1356_v16 }
 0x2c6   :  { %vm5862_vm4 = vcmp.eq.s32.totalorder %v7395_v20, 1  ;;  %v1611_v27 = vsel %vm7398_vm1, %v3444_v21, %v3445_v62  ;;  %vm7400_vm8 = vmmov %vm7398_vm1  ;;  %v7401_v42 = vrot.slane %v5369_v43, %v4423_v47  ;;  %v7402_v20 = vmov 0  ;;  %v7404_v62 = vld [vmem:[#allocation14_spill] sm:$0xff] }
 0x2c7   :  { %v7397_v40 = vsel %vm5862_vm4, 4294967295, %v7396_v40  ;;  %v1613_v59 = vsel %vm7400_vm8, %v7399_v58, %v3449_v22  ;;  %v1895_v34 = vrot.slane %v1588_v12, 4  ;;  %v7405_v54 = vunpack.i.l.bf16 %v7404_v62  ;;  %vm7406_vm8 = vmmov %vm7398_vm1  ;;  %v7413_v12 = vld [vmem:[#allocation9_spill] sm:$0xff] }
 0x2c8   :  { %vm5881_vm6 = vcmp.eq.s32.totalorder %v7401_v42, 1  ;;  %v1413_v16 = vsel %vm5763_vm0, 0.0, %v1358_v13  ;;  %v7407_v2 = vunpack.i.h.bf16 %v5452_v7  ;;  %vm7408_vm1 = vcmp.lt.s32.totalorder %v7073_v10, 1 }
 0x2c9   :  { %v7403_v20 = vsel %vm5881_vm6, 4294967295, %v7402_v20  ;;  %v5889_v58 = vsel %vm7406_vm8, %v3450_v18, %v7405_v54  ;;  %v7409_v43 = vrot.slane %v5429_v32, %v4423_v47  ;;  %v7410_v42 = vmov 0  ;;  %v7417_v18 = vld [vmem:[#allocation31_spill] sm:$0xff] }
 0x2ca   :  { %v1520_v33 = vsel %vm7408_vm1, %v7407_v2, %v3459_v46  ;;  %v7414_v62 = vrot.slane %v7413_v12, %v4423_v47  ;;  %v7415_v54 = vmov 0  ;;  %v7418_v7 = vrot.slane %v7417_v18, %v4423_v47 }
 0x2cb   :  { %vm5900_vm15 = vcmp.eq.s32.totalorder %v7409_v43, 1  ;;  %v7419_v13 = vmov 0  ;;  %vm7421_vm1 = vcmp.lt.s32.totalorder %v7073_v10, 97  ;;  %v7422_v43 = vunpack.i.l.bf16 %v4976_v41 }
 0x2cc   :  { %v7411_v42 = vsel %vm5900_vm15, 4294967295, %v7410_v42  ;;  %vm5907_vm8 = vcmp.eq.s32.totalorder %v7414_v62, 1  ;;  %vm5914_vm0 = vcmp.eq.s32.totalorder %v7418_v7, 1  ;;  %v1612_v2 = vsel %vm7421_vm1, %v3449_v22, %v3444_v21 }
 0x2cd   :  { %7412 = vst [vmem:[#allocation34_spill] sm:$0xff] %v7411_v42  ;;  %v7416_v54 = vsel %vm5907_vm8, 4294967295, %v7415_v54  ;;  %v7420_v13 = vsel %vm5914_vm0, 4294967295, %v7419_v13  ;;  %vm7423_vm5 = vcmp.lt.s32.totalorder %v7073_v10, 1  ;;  %v3464_v62 = vunpack.i.l.bf16 %v5821_v55 }
 0x2ce   :  { %v5927_v12 = vsel %vm7423_vm5, %v3460_v44, %v7422_v43  ;;  %v7424_v18 = vrot.slane %v5374_v31, %v4423_v47  ;;  %v7425_v7 = vmov 0  ;;  %v5937_v53 = vrot.slane %v1414_v39, 4  ;;  %v5952_v39 = vpop.permute.xlu0 %1757 }
 0x2cf   :  { %v5939_v32 = vrot.slane %v1415_v19, 4  ;;  %v1663_v41 = vsel %vm5809_vm9, 0.0, %v1611_v27  ;;  %v1669_v21 = vsel %vm5794_vm12, 0.0, %v1613_v59  ;;  %v1843_v22 = vrot.slane %v1413_v16, 4  ;;  %v1752_v19 = vpop.permute.xlu1 %1751 }
 0x2d0   :  { %vm5933_vm13 = vcmp.eq.s32.totalorder %v7424_v18, 1  ;;  %v5947_v43 = vsel %vm7423_vm5, %v3459_v46, %v3460_v44  ;;  %vm7427_vm1 = vnez %v7226_v15  ;;  %v7429_v27 = vrot.slane %v7428_v30, %v4423_v47  ;;  %v7434_v44 = vld [vmem:[#allocation20_spill] sm:$0xff]  ;;  %v7437_v30 = vld [vmem:[#allocation18_spill] sm:$0xff] }
 0x2d1   :  { %v7426_v7 = vsel %vm5933_vm13, 4294967295, %v7425_v7  ;;  %v1539_v31 = vsel %vm7427_vm1, 0.0, %v1520_v33  ;;  %v3465_v59 = vunpack.i.h.bf16 %v5821_v55  ;;  %v7432_v46 = vunpack.i.h.bf16 %v5551_v24  ;;  %v7440_v24 = vld [vmem:[#allocation15_spill] sm:$0xff] }
 0x2d2   :  { %vm5957_vm9 = vcmp.eq.s32.totalorder %v7429_v27, 1  ;;  %vm7433_vm5 = vcmp.lt.s32.totalorder %v7073_v10, 33  ;;  %vm7435_vm12 = vcmask 1043456   ;;  %v1662_v55 = vsel %vm5840_vm2, 0.0, %v1612_v2 }
 0x2d3   :  { %v1277_v33 = vsel %vm7433_vm5, %v7432_v46, %v3464_v62  ;;  %v1946_v16 = vsel %vm7435_vm12, %v7434_v44, %v5767_v37  ;;  %vm7436_vm3 = vmmov %vm7435_vm12  ;;  %v7441_v6 = vrot.slane %v7440_v24, %v4423_v47  ;;  %v7444_v44 = vld [vmem:[#allocation19_spill] sm:$0xff]  ;;  %v7448_v2 = vunpack.i.h.bf16 %v5549_v26 }
 0x2d4   :  { %v1954_v18 = vsel %vm7436_vm3, %v1663_v41, %v5754_v52  ;;  %vm7438_vm7 = vmmov %vm7436_vm3  ;;  %v1953_v41 = vsel %vm7436_vm3, %v1662_v55, %v5771_v49 }
 0x2d5   :  { %v3256_v36 = vpack.c.bf16 %v1954_v18, %v1946_v16  ;;  %v1952_v27 = vsel %vm7438_vm7, %v7437_v30, %v1895_v34  ;;  %vm7439_vm10 = vmmov %vm7436_vm3  ;;  %vm5979_vm5 = vcmp.eq.s32.totalorder %v7441_v6, 1  ;;  %v7447_v34 = vunpack.i.l.bf16 %v5823_v48  ;;  %v6006_v18 = vpop.permute.xlu1 %3477  ;;  %v7453_v30 = vld [vmem:[#allocation12_spill] sm:$0xff] }
 0x2d6   :  { %v1960_v11 = vsel %vm7439_vm10, %v1669_v21, %v1919_v9  ;;  %vm7445_vm12 = vmmov %vm7436_vm3  ;;  %vm7446_vm10 = vcmp.lt.s32.totalorder %v7073_v10, 95  ;;  %vm7449_vm7 = vcmp.lt.s32.totalorder %v7073_v10, 31  ;;  %vm7451_vm3 = vnez %v7162_v3 }
 0x2d7   :  { %v3280_v37 = vpack.c.bf16 %v1960_v11, %v1952_v27  ;;  %v1945_v52 = vsel %vm7445_vm12, %v7444_v44, %v1888_v60  ;;  %v1773_v9 = vsel %vm7446_vm10, %v1754_v38, %v5876_v61  ;;  %v1439_v6 = vsel %vm7449_vm7, %v7448_v2, %v7447_v34  ;;  %3257 = vmatprep.subr.bf16.mxu1 %v3256_v36  ;;  %vm7450_vm12 = vmmov %vm7446_vm10  ;;  %v6004_v60 = vpop.permute.xlu0 %3472 }
 0x2d8   :  { %v3258_v21 = vpack.c.bf16 %v1953_v41, %v1945_v52  ;;  %v1825_v11 = vsel %vm5862_vm4, 0.0, %v1773_v9  ;;  %v6002_v49 = vsel %vm7450_vm12, %v5952_v39, %v5153_v63  ;;  %v1540_v26 = vsel %vm7451_vm3, 0.0, %v5947_v43  ;;  %vm7452_vm7 = vmmov %vm7446_vm10  ;;  %v7464_v41 = vld [vmem:[#allocation13_spill] sm:$0xff] }
 0x2d9   :  { %3281 = vmatprep.subr.bf16.mxu0 %v3280_v37  ;;  %v1827_v36 = vsel %vm5881_vm6, 0.0, %v6002_v49  ;;  %v1774_v16 = vsel %vm7446_vm10, %v1752_v19, %v1754_v38  ;;  %v1775_v63 = vsel %vm7452_vm7, %v5286_v56, %v1752_v19  ;;  %v7454_v27 = vrot.slane %v7453_v30, %v4423_v47  ;;  %v7458_v38 = vld [vmem:[#allocation67_spill] sm:$0xff]  ;;  %v7460_v56 = vld [vmem:[#allocation49_spill] sm:$0xff] }
 0x2da   :  { %v1867_v43 = vrot.slane %v1539_v31, 4  ;;  %vm7457_vm4 = vcmp.lt.s32.totalorder %v7073_v10, 33  ;;  %v3470_v37 = vunpack.i.h.bf16 %v5823_v48  ;;  %3259 = vmatpush1.bf16.msra.mxu1 %v3258_v21  ;;  %v7459_v44 = vpack.c.bf16 %v5524_v0, %v7458_v38 }
 0x2db   :  { %vm6022_vm12 = vcmp.eq.s32.totalorder %v7454_v27, 1  ;;  %v6028_v24 = vsel %vm7457_vm4, %v3464_v62, %v3465_v59  ;;  %v7461_v19 = vrot.slane %v7460_v56, %v4423_v47  ;;  %v7462_v52 = vmov 0  ;;  %v6080_v56 = vpop.permute.xlu0 %3482 }
 0x2dc   :  { %3283 = vmatpush1.bf16.msra.mxu0 %v7459_v44  ;;  %v1831_v31 = vsel %vm5900_vm15, 0.0, %v1775_v63  ;;  %v7465_v62 = vrot.slane %v7464_v41, %v4423_v47  ;;  %v7466_v9 = vmov 0  ;;  %vm7468_vm7 = vcmask 1043456   ;;  %v7470_v63 = vld [vmem:[#allocation7_spill] sm:$0xff]  ;;  %v7476_v44 = vld [vmem:[#allocation69_spill] sm:$0xff] }
 0x2dd   :  { %vm6037_vm10 = vcmp.eq.s32.totalorder %v7461_v19, 1  ;;  %3178 = vmatprep.subr.msk.mxu1 %vm7468_vm7, %v1825_v11  ;;  %v1824_v0 = vsel %vm5933_vm13, 0.0, %v1774_v16  ;;  %vm7469_vm2 = vmmov %vm7468_vm7  ;;  %v3475_v34 = vunpack.i.h.bf16 %v6004_v60  ;;  %v1332_v2 = vsel %vm5907_vm8, 0.0, %v1277_v33  ;;  %v6072_v33 = vld [vmem:[%s6804_s2] sm:$0xff]  ;;  %v6082_v19 = vpop.permute.xlu1 %3487 }
 0x2de   :  { %v7463_v52 = vsel %vm6037_vm10, 4294967295, %v7462_v52  ;;  %vm6046_vm4 = vcmp.eq.s32.totalorder %v7465_v62, 1  ;;  %3187 = vmatprep.subr.msk.mxu0 %vm7469_vm2, %v1831_v31  ;;  %v1494_v21 = vsel %vm5914_vm0, 0.0, %v1439_v6  ;;  %v7471_v30 = vrot.slane %v7470_v63, %v4423_v47  ;;  %vm7474_vm7 = vmmov %vm7469_vm2  ;;  %7475 = vst [vmem:[#allocation42_spill] sm:$0xff] %v6072_v33 }
 0x2df   :  { %v7467_v9 = vsel %vm6046_vm4, 4294967295, %v7466_v9  ;;  %v7472_v27 = vmov 0  ;;  %v6980_v11 = vunpack.i.l.bf16 %v6004_v60  ;;  %v1932_v16 = vsel %vm7474_vm7, %v1332_v2, %v1843_v22  ;;  %vm7478_vm13 = vmmov %vm7469_vm2 }
 0x2e0   :  { %vm6062_vm15 = vcmp.eq.s32.totalorder %v7471_v30, 1  ;;  %v1940_v38 = vsel %vm7469_vm2, %v1494_v21, %v1867_v43  ;;  %v7477_v47 = vsel %vm5646_vm14, 0.0, %v5692_v45  ;;  %v3480_v22 = vunpack.i.h.bf16 %v6006_v18  ;;  %vm7480_vm7 = vmmov %vm7469_vm2  ;;  %v7483_v21 = vld [vmem:[#allocation41_spill] sm:$0xff] }
 0x2e1   :  { %v7473_v27 = vsel %vm6062_vm15, 4294967295, %v7472_v27  ;;  %v1931_v6 = vsel %vm7478_vm13, %v7477_v47, %v7476_v44  ;;  %v6977_v43 = vunpack.i.l.bf16 %v6006_v18  ;;  %v3260_v31 = vpack.c.bf16 %v1940_v38, %v1932_v16  ;;  %vm7486_vm0 = vmmov %vm7480_vm7  ;;  %v7487_v16 = vld [vmem:[#allocation61_spill] sm:$0xff]  ;;  %v7489_v38 = vld [vmem:[#allocation66_spill] sm:$0xff] }
 0x2e2   :  { %v7479_v41 = vsel %vm5614_vm11, 0.0, %v5682_v50  ;;  %v7481_v45 = vunpack.i.l.bf16 %v4974_v1  ;;  %vm7482_vm13 = vcmp.lt.s32.totalorder %v7073_v10, 33  ;;  %v7484_v63 = vunpack.i.l.bf16 %v7483_v21  ;;  %3179 = vmatpush1.msk.msra.mxu1 %vm7486_vm0, %v1824_v0  ;;  %vm7491_vm14 = vmmov %vm7486_vm0  ;;  %v7495_v47 = vld [vmem:[#allocation22_spill] sm:$0xff] }
 0x2e3   :  { %v1939_v62 = vsel %vm7480_vm7, %v7479_v41, %v5668_v4  ;;  %vm7485_vm2 = vcmp.lt.s32.totalorder %v7073_v10, 31  ;;  %vm7488_vm8 = vnez %v7487_v16  ;;  %v1665_v1 = vsel %vm5957_vm9, 0.0, %v5889_v58  ;;  %3261 = vmatprep.subr.bf16.mxu1 %v3260_v31  ;;  %v6136_v31 = vpop.permute.xlu0 %3492  ;;  %v7563_v16 = vld [vmem:[#allocation56_spill] sm:$0xff] }
 0x2e4   :  { %v1275_v2 = vsel %vm7482_vm13, %v3465_v59, %v7481_v45  ;;  %v1437_v30 = vsel %vm7485_vm2, %v3470_v37, %v7484_v63  ;;  %v7490_v44 = vsel %vm7488_vm8, 0.0, %v7489_v38  ;;  %v3262_v50 = vpack.c.bf16 %v1939_v62, %v1931_v6  ;;  %vm7493_vm7 = vmmov %vm7485_vm2 }
 0x2e5   :  { %3188 = vmatpush1.msk.msra.mxu0 %vm7491_vm14, %v7490_v44  ;;  %v1541_v4 = vsel %vm7427_vm1, 0.0, %v5927_v12  ;;  %v7492_v59 = vunpack.i.l.bf16 %v5823_v48  ;;  %vm7494_vm0 = vcmask 293888   ;;  %v1948_v6 = vsel %vm7491_vm14, %v7495_v47, %v5853_v57  ;;  %vm7496_vm13 = vmmov %vm7491_vm14  ;;  %v7508_v47 = vld [vmem:[#allocation17_spill] sm:$0xff] }
 0x2e6   :  { %3180 = vmatmul.mubr.msk.f32.vlgmr.msra.gmra.mrb[0].mxu1 %vm7494_vm0, %v6072_v33  ;;  %v1956_v58 = vsel %vm7496_vm13, %v1665_v1, %v5825_v23  ;;  %v1333_v12 = vsel %vm5979_vm5, 0.0, %v6028_v24  ;;  %vm7497_vm2 = vcmp.lt.s32.totalorder %v7073_v10, 95  ;;  %v6138_v23 = vpop.permute.xlu1 %3497  ;;  %v7499_v41 = vmov 0.0   ;;  %v7501_v24 = vld [vmem:[#allocation21_spill] sm:$0xff]  ;;  %vm7502_vm14 = vmmov %vm7496_vm13 }
 0x2e7   :  { %v1438_v0 = vsel %vm7493_vm7, %v7492_v59, %v3470_v37  ;;  %v1772_v48 = vsel %vm7497_vm2, %v5876_v61, %v5952_v39  ;;  %vm7498_vm7 = vcmp.lt.s32.totalorder %v7073_v10, 127  ;;  %3263 = vmatpush1.bf16.msra.mxu1 %v3262_v50  ;;  %v3264_v57 = vpack.c.bf16 %v1956_v58, %v1948_v6  ;;  %2125 = vmatprep.mubr.f32.mxu1 %v7499_v41  ;;  %vm7505_vm2 = vmmov %vm7502_vm14 }
 0x2e8   :  { %v2456_v37 = vsel %vm7498_vm7, %v6980_v11, %v3475_v34  ;;  %vm7500_vm0 = vcmp.lt.s32.totalorder %v7073_v10, 96  ;;  %v6989_v39 = vunpack.i.h.bf16 %v6080_v56  ;;  %v1947_v62 = vsel %vm7502_vm14, %v7501_v24, %v5851_v28  ;;  %v7538_v11 = vld [vmem:[#allocation37_spill] sm:$0xff] }
 0x2e9   :  { %v2520_v61 = vsel %vm7500_vm0, %v6977_v43, %v3480_v22  ;;  %vm7503_vm13 = vnez %v7367_v51  ;;  %vm7506_vm7 = vcmask 293888   ;;  %3265 = vmatprep.subr.bf16.mxu1 %v3264_v57  ;;  %v6982_v63 = vunpack.i.l.bf16 %v6080_v56 }
 0x2ea   :  { %v7504_v45 = vsel %vm7503_vm13, 0.0, %v5857_v5  ;;  %3189 = vmatmul.mubr.msk.f32.vlgmr.msra.gmra.mrb[16].mxu0 %vm7506_vm7, %v6072_v33  ;;  %v6986_v38 = vunpack.i.h.bf16 %v6082_v19  ;;  %v6981_v44 = vunpack.i.l.bf16 %v6082_v19  ;;  %v1868_v28 = vrot.slane %v1540_v26, 4  ;;  %v6174_v26 = vpop.permute.xlu0 %3502  ;;  %vm7510_vm7 = vmmov %vm7505_vm2 }
 0x2eb   :  { %v1955_v21 = vsel %vm7505_vm2, %v7504_v45, %v5798_v29  ;;  %2857 = vmatprep.mubr.f32.mxu0 %v7499_v41  ;;  %v1869_v1 = vrot.slane %v1541_v4, 4  ;;  %v1495_v5 = vsel %vm6022_vm12, 0.0, %v1438_v0  ;;  %v1826_v29 = vsel %vm6037_vm10, 0.0, %v1772_v48  ;;  %v6176_v4 = vpop.permute.xlu1 %3507  ;;  %vm7514_vm6 = vmmov %vm7510_vm7 }
 0x2ec   :  { %v3266_v50 = vpack.c.bf16 %v1955_v21, %v1947_v62  ;;  %vm7507_vm0 = vnez %v7070_v17  ;;  %vm7509_vm14 = vnez %v7508_v47  ;;  %v6976_v58 = vunpack.i.h.bf16 %v6136_v31 }
 0x2ed   :  { %v2466_v59 = vsel %vm7507_vm0, 0.0, %v2456_v37  ;;  %v2530_v6 = vsel %vm7509_vm14, 0.0, %v2520_v61  ;;  %v1334_v57 = vsel %vm6046_vm4, 0.0, %v1275_v2  ;;  %v6975_v0 = vunpack.i.l.bf16 %v6136_v31  ;;  %vm7511_vm14 = vmmov %vm7505_vm2 }
 0x2ee   :  { %3267 = vmatpush1.bf16.msra.mxu1 %v3266_v50  ;;  %v1496_v48 = vsel %vm6062_vm15, 0.0, %v1437_v30  ;;  %v1934_v37 = vsel %vm7510_vm7, %v1334_v57, %v5939_v32  ;;  %v1933_v2 = vsel %vm7511_vm14, %v1333_v12, %v5937_v53  ;;  %vm7512_vm8 = vcmp.lt.s32.totalorder %v7073_v10, 32  ;;  %vm7515_vm7 = vmmov %vm7514_vm6  ;;  %v6211_v47 = vpop.permute.xlu0 %2514 }
 0x2ef   :  { %3181 = vmatprep.subr.msk.mxu1 %vm7505_vm2, %v1827_v36  ;;  %v2359_v49 = vsel %vm7512_vm8, %v6982_v63, %v6989_v39  ;;  %vm7513_vm2 = vcmp.lt.s32.totalorder %v7073_v10, 1  ;;  %v1942_v30 = vsel %vm7514_vm6, %v1496_v48, %v1869_v1  ;;  %v1941_v32 = vsel %vm7515_vm7, %v1495_v5, %v1868_v28  ;;  %vm7516_vm14 = vmmov %vm7514_vm6  ;;  %v3513_v1 = vpop.permute.xlu1 %3512 }
 0x2f0   :  { %v2423_v36 = vsel %vm7513_vm2, %v6981_v44, %v6986_v38  ;;  %v6985_v53 = vunpack.i.h.bf16 %v6138_v23  ;;  %v6978_v12 = vunpack.i.l.bf16 %v6138_v23  ;;  %v3268_v61 = vpack.c.bf16 %v1942_v30, %v1934_v37  ;;  %v7539_v44 = vld [vmem:[#allocation16_spill] sm:$0xff] }
 0x2f1   :  { %v6979_v24 = vunpack.i.h.bf16 %v6176_v4  ;;  %v3270_v62 = vpack.c.bf16 %v1941_v32, %v1933_v2  ;;  %v6984_v45 = vunpack.i.h.bf16 %v6174_v26  ;;  %v6983_v21 = vunpack.i.l.bf16 %v6174_v26  ;;  %v7520_v2 = vld [vmem:[#allocation50_spill] sm:$0xff] }
 0x2f2   :  { %3182 = vmatpush1.msk.msra.mxu1 %vm7516_vm14, %v1826_v29  ;;  %v3509_v50 = vunpack.i.l.bf16 %v6176_v4  ;;  %vm7517_vm6 = vcmp.lt.s32.totalorder %v7073_v10, 97  ;;  %vm7518_vm8 = vcmask 293888   ;;  %vm7519_vm2 = vcmp.lt.s32.totalorder %v7073_v10, 96 }
 0x2f3   :  { %v2488_v28 = vsel %vm7517_vm6, %v6975_v0, %v6976_v58  ;;  %3269 = vmatprep.subr.bf16.mxu1 %v3268_v61  ;;  %3183 = vmatmul.mubr.msk.f32.vlgmr.msra.gmra.mrb[2].mxu1 %vm7518_vm8, %v6072_v33  ;;  %v2519_v5 = vsel %vm7519_vm2, %v3480_v22, %v6211_v47  ;;  %v3515_v29 = vunpack.i.h.bf16 %v3513_v1  ;;  %v3514_v57 = vunpack.i.l.bf16 %v3513_v1 }
 0x2f4   :  { %v2626_v48 = vrot.slane %v2466_v59, 4  ;;  %v2650_v37 = vrot.slane %v2530_v6, 4  ;;  %vm7521_vm7 = vnez %v7520_v2  ;;  %3271 = vmatpush1.bf16.msra.mxu1 %v3270_v62  ;;  %vm7522_vm14 = vcmp.lt.s32.totalorder %v7073_v10, 127  ;;  %2196 = vmatprep.mubr.f32.mxu1 %v7499_v41  ;;  %v7524_v59 = vld [vmem:[#allocation40_spill] sm:$0xff]  ;;  %v7527_v62 = vld [vmem:[#allocation57_spill] sm:$0xff] }
 0x2f5   :  { %v2372_v30 = vsel %vm7521_vm7, 0.0, %v2359_v49  ;;  %v2455_v32 = vsel %vm7522_vm14, %v3475_v34, %v3509_v50  ;;  %v2436_v61 = vsel %vm7451_vm3, 0.0, %v2423_v36  ;;  %vm7523_vm6 = vmmov %vm7522_vm14  ;;  %vm7525_vm8 = vnez %v7524_v59  ;;  %v7526_v49 = vld [vmem:[#allocation58_spill] sm:$0xff]  ;;  %v7530_v2 = vld [vmem:[#allocation5_spill] sm:$0xff] }
 0x2f6   :  { %v2454_v22 = vsel %vm7523_vm6, %v3509_v50, %v6979_v24  ;;  %v2467_v6 = vsel %vm7525_vm8, 0.0, %v2455_v32  ;;  %v7528_v1 = vpack.c.bf16 %v7526_v49, %v7527_v62  ;;  %vm7529_vm2 = vcmp.lt.s32.totalorder %v7073_v10, 32  ;;  %v7535_v32 = vld [vmem:[#allocation43_spill] sm:$0xff]  ;;  %v3518_v62 = vpop.permute.xlu0 %3517  ;;  %v7637_v59 = vld [vmem:[#allocation73_spill] sm:$0xff] }
 0x2f7   :  { %v2364_v34 = vsel %vm7529_vm2, %v3514_v57, %v3515_v29  ;;  %vm7531_vm7 = vnez %v7530_v2  ;;  %vm7532_vm14 = vcmp.lt.s32.totalorder %v7073_v10, 33  ;;  %vm7534_vm6 = vcmp.lt.s32.totalorder %v7073_v10, 31 }
 0x2f8   :  { %3273 = vmatprep.subr.bf16.mxu1 %v7528_v1  ;;  %v2498_v0 = vsel %vm7531_vm7, 0.0, %v2488_v28  ;;  %v6254_v36 = vsel %vm7532_vm14, %v6978_v12, %v6985_v53  ;;  %v2391_v50 = vsel %vm7534_vm6, %v6983_v21, %v6984_v45  ;;  %vm7536_vm2 = vnez %v7535_v32  ;;  %v6264_v28 = vpop.permute.xlu1 %3522  ;;  %v7541_v21 = vld [vmem:[#allocation59_spill] sm:$0xff] }
 0x2f9   :  { %7533 = vst [vmem:[#allocation44_spill] sm:$0xff] %v6254_v36  ;;  %v2531_v49 = vsel %vm7536_vm2, 0.0, %v2519_v5  ;;  %v2627_v1 = vrot.slane %v2467_v6, 4  ;;  %v3520_v2 = vunpack.i.h.bf16 %v3518_v62  ;;  %v3519_v58 = vunpack.i.l.bf16 %v3518_v62  ;;  %v7545_v53 = vld [vmem:[#allocation47_spill] sm:$0xff]  ;;  %v7591_v36 = vld [vmem:[#allocation65_spill] sm:$0xff] }
 0x2fa   :  { %v6990_v43 = vunpack.i.h.bf16 %v6264_v28  ;;  %v6267_v12 = vrot.slane %v2372_v30, 4  ;;  %v2468_v24 = vsel %vm7507_vm0, 0.0, %v2454_v22  ;;  %v7540_v63 = vpack.c.bf16 %v7538_v11, %v7539_v44  ;;  %v7547_v30 = vld [vmem:[#allocation54_spill] sm:$0xff] }
 0x2fb   :  { %vm7542_vm7 = vnez %v7541_v21  ;;  %v3524_v32 = vunpack.i.l.bf16 %v6264_v28  ;;  %v2604_v45 = vrot.slane %v2436_v61, 4  ;;  %vm7546_vm6 = vnez %v7545_v53  ;;  %v7554_v21 = vld [vmem:[#allocation51_spill] sm:$0xff] }
 0x2fc   :  { %7537 = vst [vmem:[#allocation45_spill] sm:$0xff] %v6267_v12  ;;  %3275 = vmatpush1.bf16.msra.mxu1 %v7540_v63  ;;  %v2367_v5 = vsel %vm7542_vm7, 0.0, %v2364_v34  ;;  %v7548_v38 = vsel %vm7546_vm6, 0.0, %v7547_v30  ;;  %vm7549_vm2 = vcmask 1043456   ;;  %vm7550_vm10 = vcmp.lt.s32.totalorder %v7073_v10, 1  ;;  %v7551_v63 = vld [vmem:[#allocation24_spill] sm:$0xff]  ;;  %v6299_v30 = vpop.permute.xlu0 %3527 }
 0x2fd   :  { %3184 = vmatprep.subr.msk.mxu1 %vm7549_vm2, %v7548_v38  ;;  %v2428_v11 = vsel %vm7550_vm10, %v3519_v58, %v3520_v2  ;;  %vm7552_vm15 = vmmov %vm7549_vm2  ;;  %vm7555_vm7 = vnez %v7554_v21  ;;  %v6293_v22 = vrot.slane %v2531_v49, 4  ;;  %vm7556_vm14 = vcmp.lt.s32.totalorder %v7073_v10, 32  ;;  %v3533_v38 = vpop.permute.xlu1 %3532  ;;  %v7561_v21 = vld [vmem:[#allocation48_spill] sm:$0xff] }
 0x2fe   :  { %v6289_v44 = vsel %vm7552_vm15, %v7551_v63, %v2626_v48  ;;  %v2404_v61 = vsel %vm7555_vm7, 0.0, %v2391_v50  ;;  %v2363_v34 = vsel %vm7556_vm14, %v3515_v29, %v6990_v43  ;;  %v6302_v62 = vsel %vm7549_vm2, %v2498_v0, %v2650_v37  ;;  %v7559_v50 = vld [vmem:[#allocation23_spill] sm:$0xff]  ;;  %vm7560_vm15 = vmmov %vm7549_vm2 }
 0x2ff   :  { %7553 = vst [vmem:[#allocation46_spill] sm:$0xff] %v6289_v44  ;;  %7557 = vst [vmem:[#allocation14_spill] sm:$0xff] %v6302_v62  ;;  %v6304_v39 = vrot.slane %v2468_v24, 4  ;;  %v2575_v48 = vrot.slane %v2367_v5, 4  ;;  %v2431_v63 = vsel %vm7427_vm1, 0.0, %v2428_v11  ;;  %v6310_v49 = vsel %vm7560_vm15, %v7559_v50, %v2627_v1  ;;  %v7569_v1 = vld [vmem:[#allocation60_spill] sm:$0xff] }
 0x300   :  { %vm7562_vm10 = vnez %v7561_v21  ;;  %vm7565_vm14 = vmmov %vm7549_vm2  ;;  %v7566_v43 = vunpack.i.h.bf16 %v6080_v56  ;;  %vm7567_vm7 = vcmp.lt.s32.totalorder %v7073_v10, 32  ;;  %v6992_v37 = vunpack.i.h.bf16 %v6299_v30 }
 0x301   :  { %7558 = vst [vmem:[#allocation9_spill] sm:$0xff] %v6304_v39  ;;  %v7564_v29 = vsel %vm7562_vm10, 0.0, %v7563_v16  ;;  %vm7568_vm2 = vmmov %vm7567_vm7  ;;  %v3529_v5 = vunpack.i.l.bf16 %v6299_v30  ;;  %vm7570_vm15 = vnez %v7569_v1  ;;  %v3535_v50 = vunpack.i.h.bf16 %v3533_v38  ;;  %v6342_v1 = vpop.permute.xlu1 %3542 }
 0x302   :  { %3185 = vmatpush1.msk.msra.mxu1 %vm7565_vm14, %v7564_v29  ;;  %v2358_v0 = vsel %vm7567_vm7, %v7566_v43, %v3524_v32  ;;  %v2365_v24 = vsel %vm7568_vm2, %v3524_v32, %v3514_v57  ;;  %v2368_v11 = vsel %vm7570_vm15, 0.0, %v2363_v34  ;;  %v3534_v42 = vunpack.i.l.bf16 %v3533_v38  ;;  %v3538_v38 = vpop.permute.xlu0 %3537 }
 0x303   :  { %vm7571_vm10 = vcmask 293888   ;;  %v6330_v16 = vsel %vm7565_vm14, %v2404_v61, %v2604_v45  ;;  %v2599_v29 = vrot.slane %v2431_v63, 4  ;;  %vm7573_vm7 = vcmp.lt.s32.totalorder %v7073_v10, 1  ;;  %v7577_v45 = vld [vmem:[#allocation64_spill] sm:$0xff]  ;;  %v7579_v63 = vld [vmem:[#allocation62_spill] sm:$0xff] }
 0x304   :  { %3186 = vmatmul.mubr.msk.f32.vlgmr.msra.gmra.mrb[4].mxu1 %vm7571_vm10, %v6072_v33  ;;  %7572 = vst [vmem:[#allocation31_spill] sm:$0xff] %v6330_v16  ;;  %v2427_v43 = vsel %vm7573_vm7, %v3520_v2, %v6992_v37  ;;  %v7574_v57 = vunpack.i.h.bf16 %v6082_v19  ;;  %vm7575_vm2 = vmmov %vm7573_vm7  ;;  %vm7578_vm10 = vnez %v7577_v45  ;;  %vm7580_vm14 = vnez %v7579_v63  ;;  %v7582_v63 = vld [vmem:[#allocation63_spill] sm:$0xff] }
 0x305   :  { %vm7576_vm15 = vmmov %vm7575_vm2  ;;  %2786 = vmatprep.mubr.f32.mxu1 %v7499_v41  ;;  %v2366_v61 = vsel %vm7578_vm10, 0.0, %v2365_v24  ;;  %v2373_v21 = vsel %vm7580_vm14, 0.0, %v2358_v0  ;;  %v2432_v2 = vsel %vm7451_vm3, 0.0, %v2427_v43  ;;  %vm7581_vm7 = vcmp.lt.s32.totalorder %v7073_v10, 33 }
 0x306   :  { %v2422_v32 = vsel %vm7575_vm2, %v7574_v57, %v3529_v5  ;;  %v2429_v34 = vsel %vm7576_vm15, %v3529_v5, %v3519_v58  ;;  %v2332_v57 = vsel %vm7581_vm7, %v3534_v42, %v3535_v50  ;;  %v6353_v37 = vrot.slane %v2368_v11, 4  ;;  %v6367_v62 = vpop.permute.xlu0 %3547  ;;  %vm7587_vm14 = vmmov %vm7581_vm7 }
 0x307   :  { %v2430_v58 = vsel %vm7451_vm3, 0.0, %v2429_v34  ;;  %v2437_v5 = vsel %vm7427_vm1, 0.0, %v2422_v32  ;;  %v3540_v53 = vunpack.i.h.bf16 %v3538_v38  ;;  %v3539_v45 = vunpack.i.l.bf16 %v3538_v38  ;;  %v3553_v34 = vpop.permute.xlu1 %3552 }
 0x308   :  { %v6995_v24 = vunpack.i.h.bf16 %v6342_v1  ;;  %v3544_v0 = vunpack.i.l.bf16 %v6342_v1  ;;  %vm7583_vm2 = vnez %v7582_v63  ;;  %v2574_v39 = vrot.slane %v2366_v61, 4 }
 0x309   :  { %v2335_v43 = vsel %vm7583_vm2, 0.0, %v2332_v57  ;;  %v6363_v16 = vrot.slane %v2373_v21, 4  ;;  %v6365_v11 = vrot.slane %v2432_v2, 4  ;;  %vm7585_vm15 = vcmask 1043456   ;;  %v7589_v2 = vld [vmem:[#allocation68_spill] sm:$0xff] }
 0x30a   :  { %v2663_v44 = vsel %vm7585_vm15, %v2335_v43, %v2575_v48  ;;  %v2598_v32 = vrot.slane %v2430_v58, 4  ;;  %vm7586_vm10 = vcmp.lt.s32.totalorder %v7073_v10, 31  ;;  %v6376_v63 = vsel %vm7587_vm14, %v3535_v50, %v6995_v24  ;;  %vm7595_vm14 = vmmov %vm7581_vm7 }
 0x30b   :  { %7584 = vst [vmem:[#allocation10_spill] sm:$0xff] %v6363_v16  ;;  %v2396_v38 = vsel %vm7586_vm10, %v3539_v45, %v3540_v53  ;;  %v2333_v21 = vsel %vm7581_vm7, %v3544_v0, %v3534_v42  ;;  %v6380_v61 = vrot.slane %v2437_v5, 4  ;;  %vm7590_vm2 = vnez %v7589_v2  ;;  %v7606_v5 = vld [vmem:[#allocation70_spill] sm:$0xff] }
 0x30c   :  { %v2334_v57 = vsel %vm7590_vm2, 0.0, %v2333_v21  ;;  %v6996_v48 = vunpack.i.h.bf16 %v6367_v62  ;;  %v3549_v58 = vunpack.i.l.bf16 %v6367_v62  ;;  %v3555_v43 = vunpack.i.h.bf16 %v3553_v34 }
 0x30d   :  { %7588 = vst [vmem:[#allocation20_spill] sm:$0xff] %v6380_v61  ;;  %v3554_v41 = vunpack.i.l.bf16 %v3553_v34  ;;  %vm7592_vm15 = vnez %v7591_v36  ;;  %vm7593_vm10 = vcmask 1043456   ;;  %v7594_v24 = vunpack.i.h.bf16 %v6138_v23  ;;  %v3558_v36 = vpop.permute.xlu0 %3557 }
 0x30e   :  { %v2399_v6 = vsel %vm7592_vm15, 0.0, %v2396_v38  ;;  %v6389_v50 = vsel %vm7593_vm10, %v2334_v57, %v2574_v39  ;;  %vm7596_vm7 = vnez %v7311_v25  ;;  %vm7597_vm2 = vcmp.lt.s32.totalorder %v7073_v10, 31  ;;  %v3563_v38 = vpop.permute.xlu1 %3562 }
 0x30f   :  { %v6395_v42 = vsel %vm7595_vm14, %v7594_v24, %v3544_v0  ;;  %v6404_v34 = vsel %vm7597_vm2, %v3540_v53, %v6996_v48  ;;  %vm7598_vm15 = vmmov %vm7597_vm2  ;;  %v7599_v21 = vunpack.i.h.bf16 %v6174_v26  ;;  %v7602_v0 = vunpack.i.l.bf16 %v6080_v56  ;;  %v7608_v48 = vld [vmem:[#allocation38_spill] sm:$0xff] }
 0x310   :  { %v2397_v39 = vsel %vm7598_vm15, %v3549_v58, %v3539_v45  ;;  %vm7600_vm10 = vmmov %vm7597_vm2  ;;  %vm7603_vm14 = vcmp.lt.s32.totalorder %v7073_v10, 32  ;;  %vm7605_vm2 = vcmask 1043456   ;;  %vm7607_vm15 = vnez %v7606_v5  ;;  %v7614_v5 = vld [vmem:[#allocation36_spill] sm:$0xff] }
 0x311   :  { %v6412_v24 = vsel %vm7600_vm10, %v7599_v21, %v3549_v58  ;;  %v2360_v2 = vsel %vm7603_vm14, %v3555_v43, %v7602_v0  ;;  %vm7604_vm6 = vmmov %vm7603_vm14  ;;  %v2671_v57 = vsel %vm7605_vm2, %v2399_v6, %v2599_v29  ;;  %v2398_v45 = vsel %vm7607_vm15, 0.0, %v2397_v39 }
 0x312   :  { %7601 = vst [vmem:[#allocation18_spill] sm:$0xff] %v6412_v24  ;;  %v2361_v53 = vsel %vm7604_vm6, %v3554_v41, %v3555_v43  ;;  %vm7609_vm4 = vnez %v7608_v48  ;;  %v7610_v61 = vunpack.i.h.bf16 %v6264_v28  ;;  %vm7611_vm10 = vmmov %vm7604_vm6  ;;  %v3560_v56 = vunpack.i.h.bf16 %v3558_v36  ;;  %v7612_v43 = vld [vmem:[#allocation35_spill] sm:$0xff]  ;;  %v3573_v16 = vpop.permute.xlu1 %3572 }
 0x313   :  { %v2371_v12 = vsel %vm7609_vm4, 0.0, %v2360_v2  ;;  %vm7613_vm6 = vnez %v7612_v43  ;;  %v3559_v29 = vunpack.i.l.bf16 %v3558_v36  ;;  %vm7615_vm14 = vnez %v7614_v5  ;;  %v3568_v2 = vpop.permute.xlu0 %3567 }
 0x314   :  { %v2362_v58 = vsel %vm7611_vm10, %v7610_v61, %v3554_v41  ;;  %v6432_v0 = vrot.slane %v2371_v12, 4  ;;  %v2370_v6 = vsel %vm7613_vm6, 0.0, %v2361_v53  ;;  %v7616_v39 = vunpack.i.l.bf16 %v6082_v19 }
 0x315   :  { %v2369_v48 = vsel %vm7615_vm14, 0.0, %v2362_v58  ;;  %vm7617_vm4 = vcmp.lt.s32.totalorder %v7073_v10, 1  ;;  %v3565_v41 = vunpack.i.h.bf16 %v3563_v38  ;;  %v3564_v61 = vunpack.i.l.bf16 %v3563_v38 }
 0x316   :  { %v2424_v28 = vsel %vm7617_vm4, %v3560_v56, %v7616_v39  ;;  %vm7618_vm2 = vmmov %vm7617_vm4  ;;  %v7619_v21 = vunpack.i.h.bf16 %v6299_v30  ;;  %v3284_v58 = vpack.c.bf16 %v2671_v57, %v2663_v44  ;;  %v6450_v19 = vrot.slane %v2370_v6, 4  ;;  %v3583_v3 = vpop.permute.xlu1 %3582 }
 0x317   :  { %v2425_v12 = vsel %vm7618_vm2, %v3559_v29, %v3560_v56  ;;  %vm7620_vm15 = vmmov %vm7618_vm2  ;;  %v2435_v53 = vsel %vm7427_vm1, 0.0, %v2424_v28  ;;  %vm7621_vm10 = vcmp.lt.s32.totalorder %v7073_v10, 127  ;;  %v6458_v5 = vrot.slane %v2369_v48, 4  ;;  %v6466_v39 = vpop.permute.xlu0 %3577 }
 0x318   :  { %v2426_v36 = vsel %vm7620_vm15, %v7619_v21, %v3559_v29  ;;  %v2434_v38 = vsel %vm7451_vm3, 0.0, %v2425_v12  ;;  %v2459_v56 = vsel %vm7621_vm10, %v3564_v61, %v3565_v41  ;;  %v6462_v21 = vrot.slane %v2435_v53, 4  ;;  %3285 = vmatprep.subr.bf16.mxu1 %v3284_v58  ;;  %vm7625_vm6 = vmmov %vm7621_vm10 }
 0x319   :  { %v2433_v43 = vsel %vm7427_vm1, 0.0, %v2426_v36  ;;  %v3570_v29 = vunpack.i.h.bf16 %v3568_v2  ;;  %v6464_v44 = vrot.slane %v2434_v38, 4  ;;  %v3569_v57 = vunpack.i.l.bf16 %v3568_v2  ;;  %vm7626_vm14 = vmmov %vm7625_vm6  ;;  %v7628_v38 = vld [vmem:[#allocation71_spill] sm:$0xff] }
 0x31a   :  { %v6460_v30 = vrot.slane %v2433_v43, 4  ;;  %v3575_v6 = vunpack.i.h.bf16 %v3573_v16  ;;  %v3574_v15 = vunpack.i.l.bf16 %v3573_v16  ;;  %v2463_v28 = vsel %vm7525_vm8, 0.0, %v2459_v56  ;;  %vm7627_vm4 = vmmov %vm7625_vm6 }
 0x31b   :  { %vm7622_vm1 = vcmask 1043456   ;;  %v3580_v12 = vunpack.i.h.bf16 %v6466_v39  ;;  %vm7623_vm3 = vcmp.lt.s32.totalorder %v7073_v10, 96  ;;  %v7624_v58 = vunpack.i.l.bf16 %v6004_v60  ;;  %vm7631_vm15 = vmmov %vm7627_vm4 }
 0x31c   :  { %v2670_v48 = vsel %vm7622_vm1, %v2398_v45, %v2598_v32  ;;  %v2523_v53 = vsel %vm7623_vm3, %v3569_v57, %v3570_v29  ;;  %v2458_v2 = vsel %vm7626_vm14, %v3565_v41, %v3575_v6  ;;  %v2460_v43 = vsel %vm7627_vm4, %v3574_v15, %v3564_v61  ;;  %vm7633_vm10 = vmmov %vm7623_vm3 }
 0x31d   :  { %v2457_v16 = vsel %vm7625_vm6, %v3575_v6, %v7624_v58  ;;  %vm7629_vm2 = vnez %v7628_v38  ;;  %v7630_v56 = vunpack.i.h.bf16 %v6176_v4  ;;  %v2462_v58 = vsel %vm7507_vm0, 0.0, %v2460_v43  ;;  %v3588_v6 = vpop.permute.xlu0 %3587  ;;  %v3593_v38 = vpop.permute.xlu1 %3592  ;;  %vm7634_vm1 = vmmov %vm7623_vm3 }
 0x31e   :  { %v2527_v32 = vsel %vm7629_vm2, 0.0, %v2523_v53  ;;  %v2465_v45 = vsel %vm7525_vm8, 0.0, %v2457_v16  ;;  %v2623_v36 = vrot.slane %v2463_v28, 4  ;;  %v2464_v41 = vsel %vm7507_vm0, 0.0, %v2458_v2  ;;  %vm7636_vm0 = vmmov %vm7634_vm1 }
 0x31f   :  { %v2461_v60 = vsel %vm7631_vm15, %v7630_v56, %v3574_v15  ;;  %v2647_v33 = vrot.slane %v2527_v32, 4  ;;  %v3585_v61 = vunpack.i.h.bf16 %v3583_v3  ;;  %v6495_v53 = vrot.slane %v2465_v45, 4 }
 0x320   :  { %v2469_v16 = vsel %vm7525_vm8, 0.0, %v2461_v60  ;;  %v2622_v4 = vrot.slane %v2462_v58, 4  ;;  %v3286_v24 = vpack.c.bf16 %v2670_v48, %v6389_v50  ;;  %v7632_v15 = vunpack.i.l.bf16 %v6006_v18  ;;  %v7639_v50 = vld [vmem:[#allocation32_spill] sm:$0xff] }
 0x321   :  { %v2522_v17 = vsel %vm7634_vm1, %v3570_v29, %v3580_v12  ;;  %v7635_v2 = vunpack.i.l.bf16 %v6466_v39  ;;  %v3584_v32 = vunpack.i.l.bf16 %v3583_v3  ;;  %v2624_v45 = vrot.slane %v2464_v41, 4  ;;  %v7641_v48 = vld [vmem:[#allocation72_spill] sm:$0xff]  ;;  %v6528_v3 = vpop.permute.xlu0 %2482  ;;  %v6530_v41 = vpop.permute.xlu1 %3597 }
 0x322   :  { %v2521_v28 = vsel %vm7633_vm10, %v3580_v12, %v7632_v15  ;;  %3287 = vmatpush1.bf16.msra.mxu1 %v3286_v24  ;;  %vm7638_vm8 = vnez %v7637_v59  ;;  %vm7640_vm3 = vnez %v7639_v50  ;;  %vm7642_vm6 = vnez %v7641_v48 }
 0x323   :  { %v2524_v43 = vsel %vm7636_vm0, %v7635_v2, %v3569_v57  ;;  %v2528_v18 = vsel %vm7640_vm3, 0.0, %v2522_v17  ;;  %v2529_v60 = vsel %vm7642_vm6, 0.0, %v2521_v28  ;;  %v6516_v58 = vrot.slane %v2469_v16, 4 }
 0x324   :  { %v2526_v56 = vsel %vm7638_vm8, 0.0, %v2524_v43  ;;  %v7643_v12 = vunpack.i.l.bf16 %v6138_v23  ;;  %vm7644_vm14 = vcmp.lt.s32.totalorder %v7073_v10, 33  ;;  %v2648_v15 = vrot.slane %v2528_v18, 4 }
 0x325   :  { %v2646_v29 = vrot.slane %v2526_v56, 4  ;;  %vm7645_vm4 = vmmov %vm7644_vm14  ;;  %v2649_v17 = vrot.slane %v2529_v60, 4  ;;  %v3590_v28 = vunpack.i.h.bf16 %v3588_v6  ;;  %v3589_v16 = vunpack.i.l.bf16 %v3588_v6 }
 0x326   :  { %v6522_v57 = vsel %vm7644_vm14, %v3585_v61, %v7643_v12  ;;  %v6526_v24 = vsel %vm7645_vm4, %v3584_v32, %v3585_v61  ;;  %v3595_v2 = vunpack.i.h.bf16 %v3593_v38  ;;  %v3594_v43 = vunpack.i.l.bf16 %v3593_v38  ;;  %vm7649_vm15 = vmmov %vm7645_vm4  ;;  %v7656_v12 = vld [vmem:[#allocation39_spill] sm:$0xff] }
 0x327   :  { %v7646_v23 = vunpack.i.h.bf16 %v6136_v31  ;;  %vm7647_vm2 = vcmp.lt.s32.totalorder %v7073_v10, 97  ;;  %v3600_v61 = vunpack.i.h.bf16 %v6530_v41  ;;  %v7648_v56 = vunpack.i.h.bf16 %v6342_v1 }
 0x328   :  { %v2338_v6 = vsel %vm5979_vm5, 0.0, %v6526_v24  ;;  %v7650_v38 = vunpack.i.l.bf16 %v6174_v26  ;;  %vm7651_vm10 = vcmp.lt.s32.totalorder %v7073_v10, 31  ;;  %v7653_v60 = vunpack.i.h.bf16 %v6367_v62  ;;  %vm7655_vm8 = vmmov %vm7647_vm2  ;;  %v2539_v24 = vpop.permute.xlu0 %2538 }
 0x329   :  { %v6537_v59 = vsel %vm7647_vm2, %v7646_v23, %v6528_v3  ;;  %v2330_v50 = vsel %vm7649_vm15, %v7648_v56, %v3584_v32  ;;  %vm7652_vm1 = vmmov %vm7651_vm10  ;;  %v2491_v32 = vsel %vm7655_vm8, %v3594_v43, %v3595_v2  ;;  %vm7657_vm3 = vnez %v7656_v12  ;;  %v2537_v23 = vpop.permute.xlu1 %2536  ;;  %v7664_v12 = vld [vmem:[#allocation28_spill] sm:$0xff] }
 0x32a   :  { %v2392_v18 = vsel %vm7651_vm10, %v3590_v28, %v7650_v38  ;;  %v2393_v48 = vsel %vm7652_vm1, %v3589_v16, %v3590_v28  ;;  %vm7654_vm0 = vmmov %vm7652_vm1  ;;  %v2499_v46 = vsel %vm7657_vm3, 0.0, %v6537_v59  ;;  %v3599_v26 = vunpack.i.l.bf16 %v6530_v41  ;;  %v7661_v38 = vld [vmem:[#allocation8_spill] sm:$0xff] }
 0x32b   :  { %v2394_v1 = vsel %vm7654_vm0, %v7653_v60, %v3589_v16  ;;  %v2402_v56 = vsel %vm6022_vm12, 0.0, %v2393_v48  ;;  %v7658_v28 = vunpack.i.l.bf16 %v6136_v31  ;;  %vm7659_vm5 = vmmov %vm7647_vm2  ;;  %vm7662_vm14 = vnez %v7661_v38 }
 0x32c   :  { %vm7660_vm6 = vmmov %vm7647_vm2  ;;  %v2495_v60 = vsel %vm7662_vm14, 0.0, %v2491_v32  ;;  %vm7667_vm15 = vnez %v7391_v35  ;;  %vm7668_vm10 = vnez %v7416_v54  ;;  %vm7669_vm1 = vnez %v7420_v13 }
 0x32d   :  { %v2489_v62 = vsel %vm7659_vm5, %v3600_v61, %v7658_v28  ;;  %v2490_v16 = vsel %vm7660_vm6, %v3595_v2, %v3600_v61  ;;  %vm7663_vm4 = vmmov %vm7647_vm2  ;;  %vm7665_vm2 = vcmask 1043456   ;;  %v2337_v2 = vsel %vm7668_vm10, 0.0, %v2330_v50 }
 0x32e   :  { %v2492_v59 = vsel %vm7663_vm4, %v3599_v26, %v3594_v43  ;;  %v2496_v41 = vsel %vm7503_vm13, 0.0, %v2490_v16  ;;  %v2679_v55 = vsel %vm7665_vm2, %v7664_v12, %v2623_v36  ;;  %vm7666_vm12 = vmmov %vm7665_vm2  ;;  %v2401_v61 = vsel %vm7669_vm1, 0.0, %v2394_v1  ;;  %v6602_v36 = vpop.permute.xlu0 %2542  ;;  %v7681_v1 = vld [vmem:[#allocation30_spill] sm:$0xff] }
 0x32f   :  { %v2687_v31 = vsel %vm7666_vm12, %v2495_v60, %v2647_v33  ;;  %v2494_v48 = vsel %vm7667_vm15, 0.0, %v2492_v59  ;;  %vm7670_vm0 = vmmov %vm7665_vm2  ;;  %v7672_v33 = vsel %vm7596_vm7, 0.0, %v6376_v63  ;;  %v7674_v54 = vsel %vm5614_vm11, 0.0, %v6404_v34  ;;  %v7678_v63 = vld [vmem:[#allocation27_spill] sm:$0xff]  ;;  %v7684_v60 = vld [vmem:[#allocation29_spill] sm:$0xff] }
 0x330   :  { %v3288_v28 = vpack.c.bf16 %v2687_v31, %v2679_v55  ;;  %v2665_v43 = vsel %vm7670_vm0, %v2337_v2, %v6458_v5  ;;  %vm7671_vm13 = vmmov %vm7670_vm0  ;;  %v6604_v5 = vpop.permute.xlu1 %2534  ;;  %vm7676_vm5 = vcmp.lt.s32.totalorder %v7073_v10, 95  ;;  %vm7688_vm15 = vnez %v7473_v27  ;;  %v7702_v31 = vld [vmem:[#allocation33_spill] sm:$0xff] }
 0x331   :  { %v2673_v51 = vsel %vm7671_vm13, %v2401_v61, %v6460_v30  ;;  %vm7673_vm8 = vmmov %vm7670_vm0  ;;  %v2555_v30 = vsel %vm7676_vm5, %v2537_v23, %v2539_v24  ;;  %vm7689_vm10 = vnez %v7397_v40  ;;  %vm7690_vm1 = vnez %v7426_v7  ;;  %v7720_v61 = vld [vmem:[#allocation20_spill] sm:$0xff] }
 0x332   :  { %v2664_v35 = vsel %vm7673_vm8, %v7672_v33, %v6353_v37  ;;  %vm7675_vm3 = vmmov %vm7670_vm0  ;;  %3289 = vmatprep.subr.bf16.mxu1 %v3288_v28  ;;  %v3292_v25 = vpack.c.bf16 %v2673_v51, %v2665_v43  ;;  %v7716_v28 = vld [vmem:[#allocation11_spill] sm:$0xff] }
 0x333   :  { %v2672_v13 = vsel %vm7675_vm3, %v7674_v54, %v6365_v11  ;;  %vm7677_vm7 = vmmov %vm7676_vm5  ;;  %v2497_v11 = vsel %vm5957_vm9, 0.0, %v2489_v62  ;;  %vm7687_vm9 = vnez %v7467_v9  ;;  %vm7694_vm3 = vcmp.lt.s32.totalorder %v7073_v10, 97  ;;  %v7722_v54 = vld [vmem:[#allocation45_spill] sm:$0xff] }
 0x334   :  { %v3294_v50 = vpack.c.bf16 %v2672_v13, %v2664_v35  ;;  %v2556_v37 = vsel %vm7677_vm7, %v6604_v5, %v2537_v23  ;;  %vm7679_vm6 = vmmov %vm7670_vm0  ;;  %3293 = vmatprep.subr.bf16.mxu0 %v3292_v25  ;;  %v2541_v55 = vpop.permute.xlu1 %2540  ;;  %v2339_v8 = vsel %vm7687_vm9, 0.0, %v6522_v57  ;;  %vm7696_vm7 = vnez %v7463_v52  ;;  %v7723_v13 = vld [vmem:[#allocation53_spill] sm:$0xff] }
 0x335   :  { %v2678_v14 = vsel %vm7679_vm6, %v7678_v63, %v2622_v4  ;;  %vm7680_vm11 = vmmov %vm7670_vm0  ;;  %vm7697_vm6 = vnez %v7403_v20  ;;  %vm7703_vm9 = vnez %v7702_v31  ;;  %v7729_v63 = vld [vmem:[#allocation55_spill] sm:$0xff] }
 0x336   :  { %v2686_v34 = vsel %vm7680_vm11, %v2494_v48, %v2646_v29  ;;  %vm7682_vm14 = vmmov %vm7670_vm0  ;;  %3295 = vmatpush1.bf16.msra.mxu0 %v3294_v50  ;;  %v2485_v29 = vpop.permute.xlu0 %2484  ;;  %v7714_v48 = vld [vmem:[#allocation52_spill] sm:$0xff] }
 0x337   :  { %v2681_v32 = vsel %vm7682_vm14, %v7681_v1, %v6495_v53  ;;  %v3290_v16 = vpack.c.bf16 %v2686_v34, %v2678_v14  ;;  %vm7683_vm4 = vmmov %vm7670_vm0  ;;  %v2403_v53 = vsel %vm7688_vm15, 0.0, %v2392_v18  ;;  %v2486_v9 = vsel %vm7694_vm3, %v6528_v3, %v2485_v29  ;;  %v7732_v1 = vld [vmem:[#allocation14_spill] sm:$0xff] }
 0x338   :  { %v2689_v38 = vsel %vm7683_vm4, %v2497_v11, %v2649_v17  ;;  %vm7685_vm2 = vmmov %vm7670_vm0  ;;  %v2559_v17 = vsel %vm7689_vm10, 0.0, %v2555_v30  ;;  %v2517_v20 = vpop.permute.xlu1 %2516  ;;  %v7725_v30 = vld [vmem:[#allocation44_spill] sm:$0xff]  ;;  %v7731_v11 = vld [vmem:[#allocation46_spill] sm:$0xff] }
 0x339   :  { %v2680_v59 = vsel %vm7685_vm2, %v7684_v60, %v2624_v45  ;;  %vm7686_vm12 = vmmov %vm7670_vm0  ;;  %v3296_v4 = vpack.c.bf16 %v2689_v38, %v2681_v32  ;;  %v2558_v45 = vsel %vm7690_vm1, 0.0, %v2556_v37  ;;  %3291 = vmatpush1.bf16.msra.mxu1 %v3290_v16  ;;  %v2674_v3 = vsel %vm7685_vm2, %v2402_v56, %v6464_v44  ;;  %v7733_v16 = vld [vmem:[#allocation31_spill] sm:$0xff] }
 0x33a   :  { %v2688_v23 = vsel %vm7686_vm12, %v2496_v41, %v2648_v15  ;;  %vm7691_vm0 = vmmov %vm7676_vm5  ;;  %vm7706_vm1 = vcmp.lt.s32.totalorder %v7073_v10, 96  ;;  %v7707_v44 = vunpack.i.l.bf16 %v6466_v39  ;;  %v7728_v37 = vmov 0.0   ;;  %v2547_v34 = vpop.permute.xlu0 %2546 }
 0x33b   :  { %v3298_v12 = vpack.c.bf16 %v2688_v23, %v2680_v59  ;;  %v2553_v15 = vsel %vm7691_vm0, %v2541_v55, %v6602_v36  ;;  %vm7692_vm13 = vmmov %vm7691_vm0  ;;  %3297 = vmatprep.subr.bf16.mxu0 %v3296_v4  ;;  %v3306_v32 = vpack.c.bf16 %v7732_v1, %v7731_v11  ;;  %v7734_v59 = vld [vmem:[#allocation9_spill] sm:$0xff] }
 0x33c   :  { %v2554_v62 = vsel %vm7692_vm13, %v2539_v24, %v2541_v55  ;;  %vm7693_vm8 = vmmov %vm7685_vm2  ;;  %v2561_v27 = vsel %vm7697_vm6, 0.0, %v2553_v15  ;;  %v2545_v60 = vpop.permute.xlu1 %2544  ;;  %v7735_v23 = vld [vmem:[#allocation25_spill] sm:$0xff]  ;;  %v7745_v15 = vld [vmem:[#allocation26_spill] sm:$0xff] }
 0x33d   :  { %3190 = vmatprep.subr.msk.mxu1 %vm7693_vm8, %v2559_v17  ;;  %vm7695_vm5 = vmmov %vm7694_vm3  ;;  %v2560_v7 = vsel %vm7696_vm7, 0.0, %v2554_v62  ;;  %3299 = vmatpush1.bf16.msra.mxu0 %v3298_v12  ;;  %vm7713_vm8 = vcmask 293888   ;;  %vm7715_vm3 = vnez %v7714_v48  ;;  %v7737_v12 = vld [vmem:[#allocation6_spill] sm:$0xff]  ;;  %v7743_v17 = vld [vmem:[#allocation47_spill] sm:$0xff] }
 0x33e   :  { %v2493_v40 = vsel %vm7695_vm5, %v2485_v29, %v3599_v26  ;;  %vm7698_vm11 = vmmov %vm7685_vm2  ;;  %vm7717_vm5 = vnez %v7716_v28 }
 0x33f   :  { %v2667_v57 = vsel %vm7698_vm11, %v2339_v8, %v6432_v0  ;;  %vm7699_vm14 = vmmov %vm7685_vm2  ;;  %v2341_v0 = vsel %vm7703_vm9, 0.0, %v6395_v42  ;;  %v7712_v42 = vld [vmem:[#allocation42_spill] sm:$0xff]  ;;  %vm7724_vm11 = vnez %v7723_v13  ;;  %vm7738_vm9 = vnez %v7737_v12 }
 0x340   :  { %v2675_v18 = vsel %vm7699_vm14, %v2403_v53, %v6462_v21  ;;  %vm7700_vm4 = vmmov %vm7685_vm2  ;;  %v2518_v21 = vsel %vm7706_vm1, %v6211_v47, %v2517_v20  ;;  %v7718_v47 = vld [vmem:[#allocation10_spill] sm:$0xff]  ;;  %v7726_v25 = vsel %vm7724_vm11, 0.0, %v7725_v30  ;;  %v2501_v29 = vsel %vm7738_vm9, 0.0, %v2493_v40 }
 0x341   :  { %v2666_v24 = vsel %vm7700_vm4, %v2338_v6, %v6450_v19  ;;  %v3300_v26 = vpack.c.bf16 %v2675_v18, %v2667_v57  ;;  %vm7701_vm12 = vmmov %vm7685_vm2  ;;  %v7709_v6 = vld [vmem:[#allocation18_spill] sm:$0xff]  ;;  %vm7730_vm4 = vnez %v7729_v63 }
 0x342   :  { %v3302_v41 = vpack.c.bf16 %v2674_v3, %v2666_v24  ;;  %v2691_v52 = vsel %vm7701_vm12, %v2499_v46, %v6293_v22  ;;  %vm7704_vm15 = vmmov %vm7685_vm2  ;;  %v7710_v46 = vld [vmem:[#allocation74_spill] sm:$0xff]  ;;  %v2500_v14 = vsel %vm7730_vm4, 0.0, %v2486_v9 }
 0x343   :  { %3191 = vmatpush1.msk.msra.mxu1 %vm7704_vm15, %v2558_v45  ;;  %vm7705_vm10 = vmmov %vm7685_vm2  ;;  %v3304_v19 = vpack.c.bf16 %v2691_v52, %v6310_v49  ;;  %vm7711_vm13 = vnez %v7710_v46  ;;  %v2532_v49 = vsel %vm7715_vm3, 0.0, %v2518_v21  ;;  %v7753_v24 = vld [vmem:[#allocation34_spill] sm:$0xff] }
 0x344   :  { %3193 = vmatprep.subr.msk.mxu0 %vm7705_vm10, %v2561_v27  ;;  %vm7708_vm0 = vmmov %vm7706_vm1  ;;  %v2405_v56 = vsel %vm7711_vm13, 0.0, %v7709_v6  ;;  %3301 = vmatprep.subr.bf16.mxu1 %v3300_v26  ;;  %v2652_v51 = vrot.slane %v2532_v49, 4  ;;  %vm7741_vm1 = vcmp.lt.s32.totalorder %v7073_v10, 95  ;;  %vm7744_vm13 = vnez %v7743_v17  ;;  %v7748_v27 = vld [vmem:[#allocation48_spill] sm:$0xff]  ;;  %v7757_v26 = vld [vmem:[#allocation61_spill] sm:$0xff] }
 0x345   :  { %v2525_v22 = vsel %vm7708_vm0, %v2517_v20, %v7707_v44  ;;  %3192 = vmatmul.mubr.msk.f32.vlgmr.msra.gmra.mrb[6].mxu1 %vm7713_vm8, %v7712_v42  ;;  %vm7719_vm7 = vmmov %vm7685_vm2  ;;  %3194 = vmatpush1.msk.msra.mxu0 %vm7685_vm2, %v2560_v7  ;;  %v2551_v8 = vsel %vm7741_vm1, %v2545_v60, %v2547_v34  ;;  %vm7758_vm9 = vnez %v7757_v26 }
 0x346   :  { %v2533_v2 = vsel %vm7717_vm5, 0.0, %v2525_v22  ;;  %v2669_v39 = vsel %vm7719_vm7, %v2341_v0, %v7718_v47  ;;  %vm7721_vm6 = vmmov %vm7685_vm2  ;;  %3303 = vmatpush1.bf16.msra.mxu1 %v3302_v41  ;;  %2928 = vmatprep.mubr.f32.mxu1 %v7728_v37  ;;  %v2563_v45 = vsel %vm7744_vm13, 0.0, %v2551_v8  ;;  %vm7749_vm5 = vnez %v7748_v27 }
 0x347   :  { %v2677_v43 = vsel %vm7721_vm6, %v2405_v56, %v7720_v61  ;;  %v2653_v33 = vrot.slane %v2533_v2, 4  ;;  %vm7727_vm14 = vmmov %vm7685_vm2  ;;  %3305 = vmatprep.subr.bf16.mxu1 %v3304_v19 }
 0x348   :  { %v3308_v35 = vpack.c.bf16 %v2677_v43, %v2669_v39  ;;  %v2668_v50 = vsel %vm7727_vm14, %v7726_v25, %v7722_v54  ;;  %vm7736_vm12 = vmmov %vm7685_vm2  ;;  %vm7754_vm14 = vnez %v7753_v24 }
 0x349   :  { %v3310_v38 = vpack.c.bf16 %v7733_v16, %v2668_v50  ;;  %v2684_v4 = vsel %vm7736_vm12, %v7735_v23, %v7734_v59  ;;  %vm7739_vm15 = vmmov %vm7685_vm2 }
 0x34a   :  { %v2692_v55 = vsel %vm7739_vm15, %v2500_v14, %v2652_v51  ;;  %3309 = vmatprep.subr.bf16.mxu0 %v3308_v35  ;;  %vm7740_vm10 = vmmov %vm7713_vm8  ;;  %3307 = vmatpush1.bf16.msra.mxu1 %v3306_v32 }
 0x34b   :  { %3195 = vmatmul.mubr.msk.f32.vlgmr.msra.gmra.mrb[18].mxu0 %vm7740_vm10, %v7712_v42  ;;  %vm7742_vm0 = vmmov %vm7741_vm1  ;;  %v3314_v40 = vpack.c.bf16 %v2692_v55, %v2684_v4 }
 0x34c   :  { %v2552_v53 = vsel %vm7742_vm0, %v6602_v36, %v2545_v60  ;;  %3311 = vmatpush1.bf16.msra.mxu0 %v3310_v38  ;;  %vm7746_vm8 = vmmov %vm7685_vm2  ;;  %2999 = vmatprep.mubr.f32.mxu0 %v7728_v37  ;;  %v2549_v36 = vpop.permute.xlu1 %2548 }
 0x34d   :  { %v2685_v62 = vsel %vm7746_vm8, %v7745_v15, %v6516_v58  ;;  %vm7747_vm3 = vmmov %vm7685_vm2  ;;  %v2562_v57 = vsel %vm7749_vm5, 0.0, %v2552_v53 }
 0x34e   :  { %v2693_v9 = vsel %vm7747_vm3, %v2501_v29, %v2653_v33  ;;  %vm7750_vm7 = vmmov %vm7685_vm2 }
 0x34f   :  { %v3312_v7 = vpack.c.bf16 %v2693_v9, %v2685_v62  ;;  %3196 = vmatprep.subr.msk.mxu1 %vm7750_vm7, %v2563_v45  ;;  %vm7751_vm6 = vmmov %vm7742_vm0 }
 0x350   :  { %v2557_v18 = vsel %vm7751_vm6, %v2549_v36, %v6604_v5  ;;  %vm7752_vm11 = vmmov %vm7742_vm0 }
 0x351   :  { %3313 = vmatprep.subr.bf16.mxu0 %v3312_v7  ;;  %v2550_v58 = vsel %vm7752_vm11, %v2547_v34, %v2549_v36  ;;  %v2565_v3 = vsel %vm7754_vm14, 0.0, %v2557_v18  ;;  %vm7755_vm4 = vmmov %vm7685_vm2 }
 0x352   :  { %3315 = vmatpush1.bf16.msra.mxu0 %v3314_v40  ;;  %3197 = vmatpush1.msk.msra.mxu1 %vm7755_vm4, %v2562_v57  ;;  %vm7756_vm12 = vmmov %vm7740_vm10  ;;  %v2564_v41 = vsel %vm7758_vm9, 0.0, %v2550_v58 }
 0x353   :  { %3199 = vmatprep.subr.msk.mxu0 %vm7685_vm2, %v2565_v3  ;;  %3198 = vmatmul.mubr.msk.f32.vlgmr.msra.gmra.mrb[8].mxu1 %vm7756_vm12, %v7712_v42  ;;  %vm7759_vm15 = vmmov %vm7685_vm2 }
 0x356   :  { %3200 = vmatpush1.msk.msra.mxu0 %vm7759_vm15, %v2564_v41 }
 0x357   :  { %3201 = vmatmul.mubr.msk.f32.vlgmr.msra.gmra.mrb[20].mxu0 %vm7740_vm10, %v7712_v42 }
 0x3b9   :  { %v6735_v10 = vpop.f32.mrb[0].mxu1 }
 0x3ba   :  { %v2292_v5 = vmul.f32 %v6735_v10, %v6735_v10  ;;  %v6739_v52 = vpop.f32.mrb[1].mxu1 }
 0x3bb   :  { %v2282_v20 = vadd.f32 %v6739_v52, %v6735_v10  ;;  %v2293_v31 = vmul.f32 %v6739_v52, %v6739_v52 }
 0x3bd   :  { %v6745_v0 = vpop.f32.mrb[16].mxu0  ;;  %v2300_v21 = vadd.f32 %v2293_v31, %v2292_v5 }
 0x3be   :  { %v6747_v19 = vpop.f32.mrb[17].mxu0  ;;  %v2298_v33 = vmul.f32 %v6745_v0, %v6745_v0 }
 0x3bf   :  { %v2299_v13 = vmul.f32 %v6747_v19, %v6747_v19 }
 0x3c6   :  { %v6749_v44 = vpop.f32.mrb[2].mxu1 }
 0x3c7   :  { %v2283_v22 = vadd.f32 %v2282_v20, %v6749_v44  ;;  %v2294_v6 = vmul.f32 %v6749_v44, %v6749_v44  ;;  %v6754_v46 = vpop.f32.mrb[3].mxu1 }
 0x3c8   :  { %v2295_v56 = vmul.f32 %v6754_v46, %v6754_v46 }
 0x3c9   :  { %v2301_v42 = vadd.f32 %v2300_v21, %v2294_v6  ;;  %v2284_v48 = vadd.f32 %v2283_v22, %v6754_v46 }
 0x3cb   :  { %v2302_v49 = vadd.f32 %v2301_v42, %v2295_v56 }
 0x3d7   :  { %v6759_v28 = vpop.f32.mrb[4].mxu1 }
 0x3d8   :  { %v2285_v2 = vadd.f32 %v2284_v48, %v6759_v28  ;;  %v2296_v47 = vmul.f32 %v6759_v28, %v6759_v28  ;;  %v6764_v39 = vpop.f32.mrb[5].mxu1  ;;  %v3051_v48 = vld [vmem:[%s6805_s3] sm:$0xff]  ;;  %s3642_s3 = smov [#allocation2]  }
 0x3d9   :  { %v2297_v61 = vmul.f32 %v6764_v39, %v6764_v39 }
 0x3da   :  { %v2303_v43 = vadd.f32 %v2302_v49, %v2296_v47  ;;  %v2286_v51 = vadd.f32 %v2285_v2, %v6764_v39  ;;  %v3053_v47 = vld [vmem:[%s6806_s4] sm:$0xff]  ;;  %s3151_s4 = sshll.u32 %s3642_s3, 4  ;;  %s3152_s4 = int_to_ptr.vmem [resolvable:$true] %s3151_s4 }
 0x3db   :  { %s3605_s16 = scalar_lea.vmem %s3152_s4, 2048  ;;  %p3610_p1 = scmp.lt.s32.totalorder %s3152_s4, %s3152_s4 }
 0x3dc   :  { %v2304_v35 = vadd.f32 %v2303_v43, %v2297_v61  ;;  %v2287_v54 = vadd.f32 %v2286_v51, %v6745_v0  ;;  %p3606_p0 = scmp.ne.s32.totalorder %s3152_s4, %s3605_s16  ;;  %p3611_p2 = scmp.lt.s32.totalorder %s3605_s16, %s3605_s16 }
 0x3de   :  { %v2305_v30 = vadd.f32 %v2304_v35, %v2298_v33  ;;  %v2288_v25 = vadd.f32 %v2287_v54, %v6747_v19  ;;  %p3612_p3 = por %p3611_p2, %p3610_p1 }
 0x3e0   :  { %2289 = vadd.xlane.f32.xlu0 %v2288_v25  ;;  %v2306_v50 = vadd.f32 %v2305_v30, %v2299_v13  ;;  %p3613_p4 = pnand %p3612_p3, %p3606_p0 }
 0x3e4   :  { %2307 = vadd.xlane.f32.xlu0 %v2306_v50 }
 0x418   :  { %v2788_v37 = vpop.f32.mrb[6].mxu1 }
 0x419   :  { %v3025_v63 = vmul.f32 %v2788_v37, %v2788_v37  ;;  %v2790_v14 = vpop.f32.mrb[7].mxu1 }
 0x41a   :  { %v3015_v34 = vadd.f32 %v2790_v14, %v2788_v37  ;;  %v3026_v11 = vmul.f32 %v2790_v14, %v2790_v14 }
 0x41c   :  { %v3033_v32 = vadd.f32 %v3026_v11, %v3025_v63 }
 0x41e   :  { %v2859_v1 = vpop.f32.mrb[18].mxu0 }
 0x41f   :  { %v3016_v16 = vadd.f32 %v3015_v34, %v2859_v1  ;;  %v3027_v38 = vmul.f32 %v2859_v1, %v2859_v1  ;;  %v2861_v60 = vpop.f32.mrb[19].mxu0 }
 0x420   :  { %v3028_v59 = vmul.f32 %v2861_v60, %v2861_v60 }
 0x421   :  { %v3034_v23 = vadd.f32 %v3033_v32, %v3027_v38  ;;  %v3017_v4 = vadd.f32 %v3016_v16, %v2861_v60 }
 0x423   :  { %v3035_v12 = vadd.f32 %v3034_v23, %v3028_v59 }
 0x426   :  { %v2930_v29 = vpop.f32.mrb[8].mxu1 }
 0x427   :  { %v3018_v55 = vadd.f32 %v3017_v4, %v2930_v29  ;;  %v3029_v8 = vmul.f32 %v2930_v29, %v2930_v29  ;;  %v2932_v53 = vpop.f32.mrb[9].mxu1 }
 0x428   :  { %v3030_v17 = vmul.f32 %v2932_v53, %v2932_v53 }
 0x429   :  { %v3036_v45 = vadd.f32 %v3035_v12, %v3029_v8  ;;  %v3019_v15 = vadd.f32 %v3018_v55, %v2932_v53 }
 0x42a   :  { %v3001_v62 = vpop.f32.mrb[20].mxu0 }
 0x42b   :  { %v3031_v9 = vmul.f32 %v3001_v62, %v3001_v62  ;;  %v3003_v40 = vpop.f32.mrb[21].mxu0  ;;  %v3037_v7 = vadd.f32 %v3036_v45, %v3030_v17  ;;  %v3020_v27 = vadd.f32 %v3019_v15, %v3001_v62 }
 0x42c   :  { %v3032_v57 = vmul.f32 %v3003_v40, %v3003_v40 }
 0x42d   :  { %v3038_v36 = vadd.f32 %v3037_v7, %v3031_v9  ;;  %v3021_v18 = vadd.f32 %v3020_v27, %v3003_v40 }
 0x42f   :  { %v3039_v58 = vadd.f32 %v3038_v36, %v3032_v57  ;;  %3022 = vadd.xlane.f32.xlu1 %v3021_v18 }
 0x431   :  { %3040 = vadd.xlane.f32.xlu0 %v3039_v58 }
 0x46d   :  { %v2290_v24 = vpop.xlane.xlu0 %2289 }
 0x471   :  { %v2308_v3 = vpop.xlane.xlu0 %2307 }
 0x4bc   :  { %v3023_v26 = vpop.xlane.xlu1 %3022 }
 0x4bd   :  { %v3024_v41 = vadd.f32 %v3023_v26, %v2290_v24 }
 0x4be   :  { %v3041_v5 = vpop.xlane.xlu0 %3040 }
 0x4bf   :  { %v3044_v20 = vmul.f32 0.00048828125, %v3024_v41  ;;  %v3042_v31 = vadd.f32 %v3041_v5, %v2308_v3 }
 0x4c1   :  { %v3046_v21 = vmul.f32 %v3044_v20, %v3044_v20  ;;  %v3045_v22 = vmul.f32 0.00048828125, %v3042_v31 }
 0x4c3   :  { %v3047_v6 = vsub.f32 %v3045_v22, %v3046_v21 }
 0x4c5   :  { %v3048_v56 = vmax.f32 %v3047_v6, 0.0 }
 0x4c7   :  { %v3049_v42 = vadd.f32 1e-05, %v3048_v56 }
 0x4c9   :  { %3603 = vrsqrt.f32 %v3049_v42 }
 0x4d3   :  { %v3604_v49 = vpop.eup %3603 }
 0x4d4   :  { %v3052_v2 = vmul.f32 %v3604_v49, %v3051_v48 }
 0x4d6   :  { %3074 = vperm.xlu1 %3601, %v3052_v2   ;;  %v3054_v61 = vmul.f32 %v3052_v2, %v3044_v20 }
 0x4d8   :  { %v3055_v43 = vsub.f32 %v3053_v47, %v3054_v61 }
 0x4da   :  { %3095 = vperm.xlu0 %3602, %v3055_v43  }
 0x555   :  { %v3075_v51 = vpop.permute.xlu1 %3074 }
 0x556   :  { %v3077_v33 = vmul.f32 %v3075_v51, %v6735_v10  ;;  %v3078_v35 = vmul.f32 %v3075_v51, %v6739_v52  ;;  %v3079_v54 = vmul.f32 %v3075_v51, %v6749_v44  ;;  %v3080_v13 = vmul.f32 %v3075_v51, %v6754_v46 }
 0x557   :  { %v3081_v30 = vmul.f32 %v3075_v51, %v6759_v28  ;;  %v3082_v25 = vmul.f32 %v3075_v51, %v6764_v39  ;;  %v3083_v50 = vmul.f32 %v3075_v51, %v6745_v0  ;;  %v3084_v63 = vmul.f32 %v3075_v51, %v6747_v19 }
 0x558   :  { %v3085_v34 = vmul.f32 %v3075_v51, %v2788_v37  ;;  %v3086_v11 = vmul.f32 %v3075_v51, %v2790_v14  ;;  %v3087_v32 = vmul.f32 %v3075_v51, %v2859_v1  ;;  %v3088_v16 = vmul.f32 %v3075_v51, %v2861_v60 }
 0x559   :  { %v3089_v38 = vmul.f32 %v3075_v51, %v2930_v29  ;;  %v3090_v10 = vmul.f32 %v3075_v51, %v2932_v53  ;;  %v3091_v59 = vmul.f32 %v3075_v51, %v3001_v62  ;;  %v3092_v52 = vmul.f32 %v3075_v51, %v3003_v40  ;;  %v3096_v23 = vpop.permute.xlu0 %3095 }
 0x55a   :  { %v3098_v44 = vadd.f32 %v3096_v23, %v3077_v33  ;;  %v3099_v4 = vadd.f32 %v3096_v23, %v3078_v35  ;;  %v3100_v46 = vadd.f32 %v3096_v23, %v3079_v54  ;;  %v3101_v12 = vadd.f32 %v3096_v23, %v3080_v13 }
 0x55b   :  { %v3102_v28 = vadd.f32 %v3096_v23, %v3081_v30  ;;  %v3103_v55 = vadd.f32 %v3096_v23, %v3082_v25  ;;  %v3104_v39 = vadd.f32 %v3096_v23, %v3083_v50  ;;  %v3105_v8 = vadd.f32 %v3096_v23, %v3084_v63 }
 0x55c   :  { %v3106_v0 = vadd.f32 %v3096_v23, %v3085_v34  ;;  %v3107_v17 = vadd.f32 %v3096_v23, %v3086_v11  ;;  %v3108_v19 = vadd.f32 %v3096_v23, %v3087_v32  ;;  %v3109_v37 = vadd.f32 %v3096_v23, %v3088_v16 }
 0x55d   :  { %v3110_v14 = vadd.f32 %v3096_v23, %v3089_v38  ;;  %v3111_v1 = vadd.f32 %v3096_v23, %v3090_v10  ;;  %v3112_v60 = vadd.f32 %v3096_v23, %v3091_v59  ;;  %v3113_v29 = vadd.f32 %v3096_v23, %v3092_v52 }
 0x55e   :  { %v3114_v53 = vmax.f32 %v3098_v44, 0.0  ;;  %v3115_v45 = vmax.f32 %v3099_v4, 0.0  ;;  %v3116_v15 = vmax.f32 %v3100_v46, 0.0  ;;  %v3117_v62 = vmax.f32 %v3101_v12, 0.0 }
 0x55f   :  { %v3118_v9 = vmax.f32 %v3102_v28, 0.0  ;;  %v3119_v40 = vmax.f32 %v3103_v55, 0.0  ;;  %v3120_v7 = vmax.f32 %v3104_v39, 0.0  ;;  %v3121_v27 = vmax.f32 %v3105_v8, 0.0 }
 0x560   :  { %v3122_v57 = vmax.f32 %v3106_v0, 0.0  ;;  %v3123_v36 = vmax.f32 %v3107_v17, 0.0  ;;  %v3124_v18 = vmax.f32 %v3108_v19, 0.0  ;;  %v3125_v58 = vmax.f32 %v3109_v37, 0.0  ;;  %3130 = vst [vmem:[#allocation2] sm:$0xff] %v3114_v53  ;;  %3131 = vst [vmem:[#allocation2 + $0x8] sm:$0xff] %v3115_v45 }
 0x561   :  { %3132 = vst [vmem:[#allocation2 + $0x10] sm:$0xff] %v3116_v15  ;;  %3133 = vst [vmem:[#allocation2 + $0x18] sm:$0xff] %v3117_v62  ;;  %v3126_v24 = vmax.f32 %v3110_v14, 0.0  ;;  %v3127_v3 = vmax.f32 %v3111_v1, 0.0  ;;  %v3128_v26 = vmax.f32 %v3112_v60, 0.0  ;;  %v3129_v41 = vmax.f32 %v3113_v29, 0.0 }
 0x562   :  { %3134 = vst [vmem:[#allocation2 + $0x20] sm:$0xff] %v3118_v9  ;;  %3135 = vst [vmem:[#allocation2 + $0x28] sm:$0xff] %v3119_v40 }
 0x563   :  { %3136 = vst [vmem:[#allocation2 + $0x30] sm:$0xff] %v3120_v7  ;;  %3137 = vst [vmem:[#allocation2 + $0x38] sm:$0xff] %v3121_v27 }
 0x564   :  { %3138 = vst [vmem:[#allocation2 + $0x40] sm:$0xff] %v3122_v57  ;;  %3139 = vst [vmem:[#allocation2 + $0x48] sm:$0xff] %v3123_v36 }
 0x565   :  { %3140 = vst [vmem:[#allocation2 + $0x50] sm:$0xff] %v3124_v18  ;;  %3141 = vst [vmem:[#allocation2 + $0x58] sm:$0xff] %v3125_v58 }
 0x566   :  { %3142 = vst [vmem:[#allocation2 + $0x60] sm:$0xff] %v3126_v24  ;;  %3143 = vst [vmem:[#allocation2 + $0x68] sm:$0xff] %v3127_v3 }
 0x567   :  { %3144 = vst [vmem:[#allocation2 + $0x70] sm:$0xff] %v3128_v26  ;;  %3145 = vst [vmem:[#allocation2 + $0x78] sm:$0xff] %v3129_v41 }
 0x568   :  { %3616 = shalt.err (!%p3613_p4)
}
 0x569   :  { %s3617_s19 = scalar_lea.hbm %s6807_s5, 2048 }
 0x56a   :  { %p3618_p5 = scmp.ne.s32.totalorder %s6807_s5, %s3617_s19  ;;  %p3621_p6 = scmp.lt.u32.totalorder %s3617_s19, %s6807_s5 }
 0x56c   :  { %p3623_p7 = pnand %p3621_p6, %p3618_p5 }
 0x56e   :  { %3626 = shalt.err (!%p3623_p7)
}
 0x56f   :  { %s3643_s1 = smov 1024  }
 0x570   :  { %3157 = dma.vmem_to_hbm [thread:$0]  %s3152_s4, 2048, %s6807_s5, [#allocation3], %s3643_s1, %s3643_s1, %s3633_s15  }
 0x571   :  { %3627 = dma.done.wait [#allocation3], 2048  }
 0x572   :  { %3628 = vsyncadd [#allocation3], 4294965248 }
 0x573   :  { %3161 = vsyncpa [#allocation3], 1 }

</bundles_post_ra>
